<compile_context>
chip_gen: v5e
topology: v5e:2x2
jax: 0.10.0
libtpu: 0.0.40
codegen_flags: <defaults>
</compile_context>

<pallas_src>
import numpy as np
import jax
import jax.numpy as jnp
from jax import lax
from jax.experimental import pallas as pl
from jax.experimental.pallas import tpu as pltpu


# ---- static hyper-parameters (mirror E3Actor __init__ defaults) ----
HIDDEN = 64            # hidden_features (module default)
NUM_LAYERS = 3         # num_layers
NUM_BASIS = 10         # number_of_basis
LMAX = 2               # hidden_lmax -> real spherical harmonics l=0..2
SH_DIM = (LMAX + 1) ** 2          # 9
EDGE_DIM = SH_DIM + NUM_BASIS     # 19
MAX_RADIUS = 1.2       # graph_info['max_radius']
NUM_NEIGHBORS = 4.0    # graph_info['num_neighbors']
OUT_DIM = 3            # irreps_node_output = '1x1o'


def _tpu_generation():
    """Best-effort TPU generation from device_kind ('TPU v5 lite', 'TPU v6e', 'TPU7x', ...)."""
    try:
        kind = jax.devices()[0].device_kind.lower()
    except Exception:
        return 0
    for g in (7, 6, 5, 4):
        if ("v%d" % g) in kind or ("%dx" % g) in kind or ("%de" % g) in kind:
            return g
    return 0


def init_params(key, f_in, hidden=HIDDEN, layers=NUM_LAYERS):
    """Deterministic synthetic parameters (shapes implied by the forward)."""
    ks = jax.random.split(key, 16)
    s = 0.2
    msg_in = 2 * hidden + EDGE_DIM
    p = dict(
        we=jax.random.normal(ks[0], (f_in, hidden), jnp.float32) * s,
        be=jnp.zeros((1, hidden), jnp.float32),
        wm1=jax.random.normal(ks[1], (layers, msg_in, hidden), jnp.float32) * s,
        bm1=jnp.zeros((layers, hidden), jnp.float32),
        wm2=jax.random.normal(ks[2], (layers, hidden, hidden), jnp.float32) * s,
        bm2=jnp.zeros((layers, hidden), jnp.float32),
        wu1=jax.random.normal(ks[3], (layers, 2 * hidden, hidden), jnp.float32) * s,
        bu1=jnp.zeros((layers, hidden), jnp.float32),
        wu2=jax.random.normal(ks[4], (layers, hidden, hidden), jnp.float32) * s,
        bu2=jnp.zeros((layers, hidden), jnp.float32),
        wo=jax.random.normal(ks[5], (hidden, OUT_DIM), jnp.float32) * s,
        bo=jnp.zeros((1, OUT_DIM), jnp.float32),
    )
    return p


def e3actor_forward(pos, x, params):
    """pos: [B, N, 3], x: [B, N, F_in] -> u: [B, 2]  (== net(obs_graph)[..., :2])"""
    B, N, _ = pos.shape
    F_in = x.shape[-1]
    H = HIDDEN
    L = NUM_LAYERS

    gen = _tpu_generation()
    # Only v7x has 2 TensorCores; on v5e/v6e grid=(2,) is a serial loop that just
    # adds ~0.35us/step overhead and halves the already tiny matmul row counts.
    num_blocks = 2 if (gen >= 7 and B % 2 == 0 and B >= 2) else 1
    bt = B // num_blocks
    # bf16 VALU exists on v6e/v7x only; keep the [bt,N,N,H] elementwise stage f32 on v5e.
    ew_dtype = jnp.bfloat16 if gen >= 6 else jnp.float32
    # Raise the scoped-VMEM limit explicitly; keep headroom under v7x's 64 MiB physical.
    if gen >= 7:
        vmem_limit = 48 * 1024 * 1024
    elif gen in (5, 6):
        vmem_limit = 96 * 1024 * 1024
    else:
        vmem_limit = None

    # --- exact refactor of the concat-matmuls: split wm1 / wu1 along the input dim ---
    wm1 = params['wm1']
    # receiver (x_i) and sender (x_j) halves merged into ONE [H, 2H] weight per layer:
    #   concat([x_i, x_j, e_ij]) @ wm1[l]
    #     == (h @ wmab[l])[:, :H] at i  +  (h @ wmab[l])[:, H:] at j  +  e_ij @ wme[l]
    wmab = jnp.concatenate([wm1[:, :H, :], wm1[:, H:2 * H, :]],
                           axis=-1).astype(jnp.bfloat16)           # [L, H, 2H]
    # edge projection kept per layer (leading layer axis) and done on the MXU in bf16.
    wme = wm1[:, 2 * H:, :].astype(jnp.bfloat16)                   # [L, EDGE_DIM, H]
    wu1 = params['wu1']
    wua = wu1[:, :H, :].astype(jnp.bfloat16)
    wub = wu1[:, H:, :].astype(jnp.bfloat16)

    # bf16 MXU operands (f32 accumulation inside the kernel); biases stay f32.
    we = params['we'].astype(jnp.bfloat16)
    wm2 = params['wm2'].astype(jnp.bfloat16)
    wu2 = params['wu2'].astype(jnp.bfloat16)
    wo = params['wo'].astype(jnp.bfloat16)
    be, bm1, bm2, bu1, bu2, bo = (params[k] for k in
                                  ('be', 'bm1', 'bm2', 'bu1', 'bu2', 'bo'))

    pos_t = jnp.transpose(pos, (0, 2, 1))                 # [B, 3, N]  (nodes on lane axis)

    # Radial-basis constants as Python floats -> compile-time immediates.
    centers = [float(c) for c in np.linspace(0.0, MAX_RADIUS, NUM_BASIS)]
    sigma = MAX_RADIUS / NUM_BASIS
    inv_two_sig2 = 1.0 / (2.0 * sigma * sigma)
    inv_nb = 1.0 / NUM_NEIGHBORS
    s3, s5, s15 = float(np.sqrt(3.0)), float(np.sqrt(5.0)), float(np.sqrt(15.0))
    # TODO(synk): e3nn uses soft_one_hot_linspace('smooth_finite'); a Gaussian basis is used here.

    def kernel(pos_ref, x_ref,
               we_ref, be_ref,
               wmab_ref, wme_ref, bm1_ref,
               wm2_ref, bm2_ref,
               wua_ref, wub_ref, bu1_ref, wu2_ref, bu2_ref,
               wo_ref, bo_ref,
               out_ref):
        px = pos_ref[:, 0, :]                             # [bt, N]
        py = pos_ref[:, 1, :]
        pz = pos_ref[:, 2, :]

        # ---- pairwise geometry as [bt,N,N] planes ----
        dx = px[:, None, :] - px[:, :, None]              # sender j - receiver i
        dy = py[:, None, :] - py[:, :, None]
        dz = pz[:, None, :] - pz[:, :, None]
        d2 = dx * dx + dy * dy + dz * dz
        inv_d = lax.rsqrt(d2 + 1e-12)                     # EUP rsqrt instead of sqrt + divide
        d = d2 * inv_d
        ux, uy, uz = dx * inv_d, dy * inv_d, dz * inv_d

        row = lax.broadcasted_iota(jnp.int32, (bt, N, N), 1)
        col = lax.broadcasted_iota(jnp.int32, (bt, N, N), 2)
        adj32 = jnp.logical_and(d2 < MAX_RADIUS * MAX_RADIUS,
                                row != col).astype(jnp.float32)    # [bt,N,N]
        deg = jnp.sum(adj32, axis=2)                                # [bt,N]
        adj = adj32.astype(ew_dtype)

        # ---- real spherical harmonics (l=0..2) + Gaussian RBF, one plane each ----
        # TODO(synk): exact e3nn o3.spherical_harmonics normalisation and (y,z,x) l=1
        # component ordering are not reproduced bit-for-bit.
        fields = [
            jnp.ones_like(d2),
            s3 * ux, s3 * uy, s3 * uz,
            s15 * ux * uy, s15 * uy * uz,
            0.5 * s5 * (3.0 * uz * uz - 1.0),
            s15 * ux * uz, 0.5 * s15 * (ux * ux - uy * uy),
        ]
        for c in centers:
            fields.append(jnp.exp(-(d - c) * (d - c) * inv_two_sig2))  # EUP exps (free slot)

        # Pack once into a [bt*N*N, EDGE_DIM] bf16 operand; the per-layer edge
        # projection then runs on the MXU instead of a 19-term VPU fold.
        edge_feat = jnp.stack(fields, axis=-1).reshape(bt * N * N, EDGE_DIM)
        edge_feat = edge_feat.astype(jnp.bfloat16)

        # ---- node embedding; h kept flat [bt*N, H] throughout ----
        xin = x_ref[...].reshape(bt * N, F_in).astype(jnp.bfloat16)
        h = jnp.dot(xin, we_ref[...], preferred_element_type=jnp.float32) + be_ref[0]

        for l in range(L):
            h_b = h.astype(jnp.bfloat16)
            # one [bt*N,H]x[H,2H] matmul for receiver + sender message terms
            ac = jnp.dot(h_b, wmab_ref[l], preferred_element_type=jnp.float32)  # [bt*N, 2H]
            # fold bm1 into the receiver term (avoids a [bt,N,N,H] bias add)
            a3 = (ac[:, :H] + bm1_ref[l]).reshape(bt, N, H).astype(ew_dtype)
            c3 = ac[:, H:].reshape(bt, N, H).astype(ew_dtype)
            # per-layer edge projection on the MXU
            e_l = jnp.dot(edge_feat, wme_ref[l], preferred_element_type=jnp.float32)
            e_l = e_l.reshape(bt, N, N, H).astype(ew_dtype)

            # rank-structured message pre-activation:
            #   concat([x_i, x_j, e_ij]) @ wm1[l] + bm1[l]  ==  a3_i + c3_j + e_l_ij
            pre = a3[:, :, None, :] + c3[:, None, :, :] + e_l         # [bt,N,N,H]
            r = jnp.maximum(pre, 0)
            # mask + sum over senders BEFORE the second message matmul (exact by
            # linearity); accumulate the sender-sum in f32.
            s_agg = jnp.sum((r * adj[:, :, :, None]).astype(jnp.float32), axis=2)  # [bt,N,H]
            agg = (jnp.dot(s_agg.reshape(bt * N, H).astype(jnp.bfloat16), wm2_ref[l],
                           preferred_element_type=jnp.float32)
                   + deg.reshape(bt * N, 1) * bm2_ref[l]) * inv_nb
            # TODO(synk): fixed 1/num_neighbors normalisation; e3nn divides by sqrt(num_neighbors)
            # and real graphs would use the actual degree / node mask.

            # update MLP: concat([h, agg]) @ wu1[l]  ==  h @ wua[l] + agg @ wub[l]
            u1 = jnp.maximum(
                jnp.dot(h_b, wua_ref[l], preferred_element_type=jnp.float32)
                + jnp.dot(agg.astype(jnp.bfloat16), wub_ref[l],
                          preferred_element_type=jnp.float32)
                + bu1_ref[l], 0.0)
            h = h + jnp.dot(u1.astype(jnp.bfloat16), wu2_ref[l],
                            preferred_element_type=jnp.float32) + bu2_ref[l]

        # ---- avg-pool over nodes, then linear '1x1o' head (exact for a linear layer) ----
        # TODO(synk): assumes mean pooling (SEGNN pool='avg'); sum pooling would differ by N.
        hm = jnp.mean(h.reshape(bt, N, H), axis=1).astype(jnp.bfloat16)    # [bt,H]
        out = jnp.dot(hm, wo_ref[...], preferred_element_type=jnp.float32) + bo_ref[0]
        out_ref[...] = out[:, None, :]                                     # [bt,1,3]

    weights = [we, be, wmab, wme, bm1, wm2, bm2, wua, wub, bu1, wu2, bu2, wo, bo]
    # Constant block index across the grid -> weights stay VMEM-resident (no re-DMA).
    full = lambda arr: pl.BlockSpec(arr.shape, lambda g: (0,) * arr.ndim)

    grid_spec = pltpu.PrefetchScalarGridSpec(
        num_scalar_prefetch=0,
        grid=(num_blocks,),
        in_specs=[pl.BlockSpec((bt, 3, N), lambda g: (g, 0, 0)),
                  pl.BlockSpec((bt, N, F_in), lambda g: (g, 0, 0))]
                 + [full(w) for w in weights],
        out_specs=pl.BlockSpec((bt, 1, OUT_DIM), lambda g: (g, 0, 0)),
    )

    u_3d = pl.pallas_call(
        kernel,
        out_shape=jax.ShapeDtypeStruct((B, 1, OUT_DIM), jnp.float32),
        grid_spec=grid_spec,
        compiler_params=pltpu.CompilerParams(
            dimension_semantics=("parallel",),
            vmem_limit_bytes=vmem_limit),
    )(pos_t, x, *weights)

    u_3d = u_3d[:, 0, :]          # [B, 3]   == self.net(obs_graph)
    u = u_3d[..., :2]             # [B, 2]   == forward(): u_3D[..., :2]; normalize_u is identity
    return u


if __name__ == "__main__":
    key = jax.random.PRNGKey(0)
    k_pos, k_x, k_p = jax.random.split(key, 3)

    B, N, F_IN = 2, 8, 4          # small graphs: 2 graphs, 8 nodes, 4 input node features
    pos = jax.random.uniform(k_pos, (B, N, 3), jnp.float32)               # positions in [0,1]^3
    x = jax.random.normal(k_x, (B, N, F_IN), jnp.float32)                 # node input features

    params = init_params(k_p, F_IN)

    u = e3actor_forward(pos, x, params)
    u = jax.block_until_ready(u)
    assert u.shape == (B, 2) and u.dtype == jnp.float32
    assert bool(jnp.all(jnp.isfinite(u)))
    print("KERNEL_OK")
</pallas_src>

<mosaic_0001>
module attributes {stable_mosaic.version = 11 : i64} {
  func.func @kernel(%arg0: i32, %arg1: memref<2x3x8xf32, #tpu.memory_space<vmem>>, %arg2: memref<2x8x4xf32, #tpu.memory_space<vmem>>, %arg3: memref<4x64xbf16, #tpu.memory_space<vmem>>, %arg4: memref<1x64xf32, #tpu.memory_space<vmem>>, %arg5: memref<3x64x128xbf16, #tpu.memory_space<vmem>>, %arg6: memref<3x19x64xbf16, #tpu.memory_space<vmem>>, %arg7: memref<3x64xf32, #tpu.memory_space<vmem>>, %arg8: memref<3x64x64xbf16, #tpu.memory_space<vmem>>, %arg9: memref<3x64xf32, #tpu.memory_space<vmem>>, %arg10: memref<3x64x64xbf16, #tpu.memory_space<vmem>>, %arg11: memref<3x64x64xbf16, #tpu.memory_space<vmem>>, %arg12: memref<3x64xf32, #tpu.memory_space<vmem>>, %arg13: memref<3x64x64xbf16, #tpu.memory_space<vmem>>, %arg14: memref<3x64xf32, #tpu.memory_space<vmem>>, %arg15: memref<64x3xbf16, #tpu.memory_space<vmem>>, %arg16: memref<1x3xf32, #tpu.memory_space<vmem>>, %arg17: memref<2x1x3xf32, #tpu.memory_space<vmem>>) attributes {dimension_semantics = [#tpu.dimension_semantics<parallel>], iteration_bounds = array<i64: 1>, scalar_prefetch = 0 : i64, scratch_operands = 0 : i64, tpu.core_type = #tpu.core_type<tc>, window_params = [{transform_indices = @transform_0, window_bounds = array<i64: 2, 3, 8>}, {transform_indices = @transform_1, window_bounds = array<i64: 2, 8, 4>}, {pipeline_mode = #tpu.pipeline_mode<synchronous>, transform_indices = @transform_2, window_bounds = array<i64: 4, 64>}, {pipeline_mode = #tpu.pipeline_mode<synchronous>, transform_indices = @transform_3, window_bounds = array<i64: 1, 64>}, {pipeline_mode = #tpu.pipeline_mode<synchronous>, transform_indices = @transform_4, window_bounds = array<i64: 3, 64, 128>}, {pipeline_mode = #tpu.pipeline_mode<synchronous>, transform_indices = @transform_5, window_bounds = array<i64: 3, 19, 64>}, {pipeline_mode = #tpu.pipeline_mode<synchronous>, transform_indices = @transform_6, window_bounds = array<i64: 3, 64>}, {pipeline_mode = #tpu.pipeline_mode<synchronous>, transform_indices = @transform_7, window_bounds = array<i64: 3, 64, 64>}, {pipeline_mode = #tpu.pipeline_mode<synchronous>, transform_indices = @transform_8, window_bounds = array<i64: 3, 64>}, {pipeline_mode = #tpu.pipeline_mode<synchronous>, transform_indices = @transform_9, window_bounds = array<i64: 3, 64, 64>}, {pipeline_mode = #tpu.pipeline_mode<synchronous>, transform_indices = @transform_10, window_bounds = array<i64: 3, 64, 64>}, {pipeline_mode = #tpu.pipeline_mode<synchronous>, transform_indices = @transform_11, window_bounds = array<i64: 3, 64>}, {pipeline_mode = #tpu.pipeline_mode<synchronous>, transform_indices = @transform_12, window_bounds = array<i64: 3, 64, 64>}, {pipeline_mode = #tpu.pipeline_mode<synchronous>, transform_indices = @transform_13, window_bounds = array<i64: 3, 64>}, {pipeline_mode = #tpu.pipeline_mode<synchronous>, transform_indices = @transform_14, window_bounds = array<i64: 64, 3>}, {pipeline_mode = #tpu.pipeline_mode<synchronous>, transform_indices = @transform_15, window_bounds = array<i64: 1, 3>}, {transform_indices = @transform_16, window_bounds = array<i64: 2, 1, 3>}]} {
    %c0 = arith.constant 0 : index
    %c0_0 = arith.constant 0 : index
    %c0_1 = arith.constant 0 : index
    %0 = vector.load %arg1[%c0, %c0_0, %c0_1] : memref<2x3x8xf32, #tpu.memory_space<vmem>>, vector<2x1x8xf32>
    %1 = vector.shape_cast %0 : vector<2x1x8xf32> to vector<2x8xf32>
    %c0_2 = arith.constant 0 : index
    %c1 = arith.constant 1 : index
    %c0_3 = arith.constant 0 : index
    %2 = vector.load %arg1[%c0_2, %c1, %c0_3] : memref<2x3x8xf32, #tpu.memory_space<vmem>>, vector<2x1x8xf32>
    %3 = vector.shape_cast %2 : vector<2x1x8xf32> to vector<2x8xf32>
    %c0_4 = arith.constant 0 : index
    %c2 = arith.constant 2 : index
    %c0_5 = arith.constant 0 : index
    %4 = vector.load %arg1[%c0_4, %c2, %c0_5] : memref<2x3x8xf32, #tpu.memory_space<vmem>>, vector<2x1x8xf32>
    %5 = vector.shape_cast %4 : vector<2x1x8xf32> to vector<2x8xf32>
    %6 = vector.shape_cast %1 : vector<2x8xf32> to vector<2x1x8xf32>
    %7 = vector.shape_cast %1 : vector<2x8xf32> to vector<2x8x1xf32>
    %8 = vector.broadcast %6 : vector<2x1x8xf32> to vector<2x8x8xf32>
    %9 = vector.broadcast %7 : vector<2x8x1xf32> to vector<2x8x8xf32>
    %10 = arith.subf %8, %9 : vector<2x8x8xf32>
    %11 = vector.shape_cast %3 : vector<2x8xf32> to vector<2x1x8xf32>
    %12 = vector.shape_cast %3 : vector<2x8xf32> to vector<2x8x1xf32>
    %13 = vector.broadcast %11 : vector<2x1x8xf32> to vector<2x8x8xf32>
    %14 = vector.broadcast %12 : vector<2x8x1xf32> to vector<2x8x8xf32>
    %15 = arith.subf %13, %14 : vector<2x8x8xf32>
    %16 = vector.shape_cast %5 : vector<2x8xf32> to vector<2x1x8xf32>
    %17 = vector.shape_cast %5 : vector<2x8xf32> to vector<2x8x1xf32>
    %18 = vector.broadcast %16 : vector<2x1x8xf32> to vector<2x8x8xf32>
    %19 = vector.broadcast %17 : vector<2x8x1xf32> to vector<2x8x8xf32>
    %20 = arith.subf %18, %19 : vector<2x8x8xf32>
    %21 = arith.mulf %10, %10 : vector<2x8x8xf32>
    %22 = arith.mulf %15, %15 : vector<2x8x8xf32>
    %23 = arith.addf %21, %22 : vector<2x8x8xf32>
    %24 = arith.mulf %20, %20 : vector<2x8x8xf32>
    %25 = arith.addf %23, %24 : vector<2x8x8xf32>
    %cst = arith.constant 9.99999996E-13 : f32
    %26 = vector.broadcast %cst : f32 to vector<2x8x8xf32>
    %27 = arith.addf %25, %26 : vector<2x8x8xf32>
    %28 = math.rsqrt %27 : vector<2x8x8xf32>
    %29 = arith.mulf %25, %28 : vector<2x8x8xf32>
    %30 = arith.mulf %10, %28 : vector<2x8x8xf32>
    %31 = arith.mulf %15, %28 : vector<2x8x8xf32>
    %32 = arith.mulf %20, %28 : vector<2x8x8xf32>
    %33 = tpu.iota {dimensions = array<i32: 1>} : vector<2x8x8xi32>
    %34 = tpu.iota {dimensions = array<i32: 2>} : vector<2x8x8xi32>
    %cst_6 = arith.constant 1.440000e+00 : f32
    %35 = vector.broadcast %cst_6 : f32 to vector<2x8x8xf32>
    %36 = arith.cmpf olt, %25, %35 : vector<2x8x8xf32>
    %37 = arith.cmpi ne, %33, %34 : vector<2x8x8xi32>
    %38 = arith.andi %36, %37 : vector<2x8x8xi1>
    %39 = arith.extui %38 : vector<2x8x8xi1> to vector<2x8x8xi32>
    %40 = arith.sitofp %39 : vector<2x8x8xi32> to vector<2x8x8xf32>
    %cst_7 = arith.constant dense<0.000000e+00> : vector<2x8xf32>
    %41 = vector.multi_reduction <add>, %40, %cst_7 [2] : vector<2x8x8xf32> to vector<2x8xf32>
    %cst_8 = arith.constant 1.000000e+00 : f32
    %42 = vector.broadcast %cst_8 : f32 to vector<2x8x8xf32>
    %cst_9 = arith.constant 1.73205078 : f32
    %43 = vector.broadcast %cst_9 : f32 to vector<2x8x8xf32>
    %44 = arith.mulf %43, %30 : vector<2x8x8xf32>
    %cst_10 = arith.constant 1.73205078 : f32
    %45 = vector.broadcast %cst_10 : f32 to vector<2x8x8xf32>
    %46 = arith.mulf %45, %31 : vector<2x8x8xf32>
    %cst_11 = arith.constant 1.73205078 : f32
    %47 = vector.broadcast %cst_11 : f32 to vector<2x8x8xf32>
    %48 = arith.mulf %47, %32 : vector<2x8x8xf32>
    %cst_12 = arith.constant 3.87298346 : f32
    %49 = vector.broadcast %cst_12 : f32 to vector<2x8x8xf32>
    %50 = arith.mulf %49, %30 : vector<2x8x8xf32>
    %51 = arith.mulf %50, %31 : vector<2x8x8xf32>
    %cst_13 = arith.constant 3.87298346 : f32
    %52 = vector.broadcast %cst_13 : f32 to vector<2x8x8xf32>
    %53 = arith.mulf %52, %31 : vector<2x8x8xf32>
    %54 = arith.mulf %53, %32 : vector<2x8x8xf32>
    %cst_14 = arith.constant 3.000000e+00 : f32
    %55 = vector.broadcast %cst_14 : f32 to vector<2x8x8xf32>
    %56 = arith.mulf %55, %32 : vector<2x8x8xf32>
    %57 = arith.mulf %56, %32 : vector<2x8x8xf32>
    %cst_15 = arith.constant 1.000000e+00 : f32
    %58 = vector.broadcast %cst_15 : f32 to vector<2x8x8xf32>
    %59 = arith.subf %57, %58 : vector<2x8x8xf32>
    %cst_16 = arith.constant 1.11803401 : f32
    %60 = vector.broadcast %cst_16 : f32 to vector<2x8x8xf32>
    %61 = arith.mulf %60, %59 : vector<2x8x8xf32>
    %cst_17 = arith.constant 3.87298346 : f32
    %62 = vector.broadcast %cst_17 : f32 to vector<2x8x8xf32>
    %63 = arith.mulf %62, %30 : vector<2x8x8xf32>
    %64 = arith.mulf %63, %32 : vector<2x8x8xf32>
    %65 = arith.mulf %30, %30 : vector<2x8x8xf32>
    %66 = arith.mulf %31, %31 : vector<2x8x8xf32>
    %67 = arith.subf %65, %66 : vector<2x8x8xf32>
    %cst_18 = arith.constant 1.93649173 : f32
    %68 = vector.broadcast %cst_18 : f32 to vector<2x8x8xf32>
    %69 = arith.mulf %68, %67 : vector<2x8x8xf32>
    %cst_19 = arith.constant 0.000000e+00 : f32
    %70 = vector.broadcast %cst_19 : f32 to vector<2x8x8xf32>
    %71 = arith.subf %29, %70 : vector<2x8x8xf32>
    %cst_20 = arith.constant 0.000000e+00 : f32
    %72 = vector.broadcast %cst_20 : f32 to vector<2x8x8xf32>
    %73 = arith.subf %72, %71 : vector<2x8x8xf32>
    %cst_21 = arith.constant 0.000000e+00 : f32
    %74 = vector.broadcast %cst_21 : f32 to vector<2x8x8xf32>
    %75 = arith.subf %29, %74 : vector<2x8x8xf32>
    %76 = arith.mulf %73, %75 : vector<2x8x8xf32>
    %cst_22 = arith.constant 34.7222214 : f32
    %77 = vector.broadcast %cst_22 : f32 to vector<2x8x8xf32>
    %78 = arith.mulf %76, %77 : vector<2x8x8xf32>
    %79 = math.exp %78 : vector<2x8x8xf32>
    %cst_23 = arith.constant 0.13333334 : f32
    %80 = vector.broadcast %cst_23 : f32 to vector<2x8x8xf32>
    %81 = arith.subf %29, %80 : vector<2x8x8xf32>
    %cst_24 = arith.constant 0.000000e+00 : f32
    %82 = vector.broadcast %cst_24 : f32 to vector<2x8x8xf32>
    %83 = arith.subf %82, %81 : vector<2x8x8xf32>
    %cst_25 = arith.constant 0.13333334 : f32
    %84 = vector.broadcast %cst_25 : f32 to vector<2x8x8xf32>
    %85 = arith.subf %29, %84 : vector<2x8x8xf32>
    %86 = arith.mulf %83, %85 : vector<2x8x8xf32>
    %cst_26 = arith.constant 34.7222214 : f32
    %87 = vector.broadcast %cst_26 : f32 to vector<2x8x8xf32>
    %88 = arith.mulf %86, %87 : vector<2x8x8xf32>
    %89 = math.exp %88 : vector<2x8x8xf32>
    %cst_27 = arith.constant 0.266666681 : f32
    %90 = vector.broadcast %cst_27 : f32 to vector<2x8x8xf32>
    %91 = arith.subf %29, %90 : vector<2x8x8xf32>
    %cst_28 = arith.constant 0.000000e+00 : f32
    %92 = vector.broadcast %cst_28 : f32 to vector<2x8x8xf32>
    %93 = arith.subf %92, %91 : vector<2x8x8xf32>
    %cst_29 = arith.constant 0.266666681 : f32
    %94 = vector.broadcast %cst_29 : f32 to vector<2x8x8xf32>
    %95 = arith.subf %29, %94 : vector<2x8x8xf32>
    %96 = arith.mulf %93, %95 : vector<2x8x8xf32>
    %cst_30 = arith.constant 34.7222214 : f32
    %97 = vector.broadcast %cst_30 : f32 to vector<2x8x8xf32>
    %98 = arith.mulf %96, %97 : vector<2x8x8xf32>
    %99 = math.exp %98 : vector<2x8x8xf32>
    %cst_31 = arith.constant 4.000000e-01 : f32
    %100 = vector.broadcast %cst_31 : f32 to vector<2x8x8xf32>
    %101 = arith.subf %29, %100 : vector<2x8x8xf32>
    %cst_32 = arith.constant 0.000000e+00 : f32
    %102 = vector.broadcast %cst_32 : f32 to vector<2x8x8xf32>
    %103 = arith.subf %102, %101 : vector<2x8x8xf32>
    %cst_33 = arith.constant 4.000000e-01 : f32
    %104 = vector.broadcast %cst_33 : f32 to vector<2x8x8xf32>
    %105 = arith.subf %29, %104 : vector<2x8x8xf32>
    %106 = arith.mulf %103, %105 : vector<2x8x8xf32>
    %cst_34 = arith.constant 34.7222214 : f32
    %107 = vector.broadcast %cst_34 : f32 to vector<2x8x8xf32>
    %108 = arith.mulf %106, %107 : vector<2x8x8xf32>
    %109 = math.exp %108 : vector<2x8x8xf32>
    %cst_35 = arith.constant 0.533333361 : f32
    %110 = vector.broadcast %cst_35 : f32 to vector<2x8x8xf32>
    %111 = arith.subf %29, %110 : vector<2x8x8xf32>
    %cst_36 = arith.constant 0.000000e+00 : f32
    %112 = vector.broadcast %cst_36 : f32 to vector<2x8x8xf32>
    %113 = arith.subf %112, %111 : vector<2x8x8xf32>
    %cst_37 = arith.constant 0.533333361 : f32
    %114 = vector.broadcast %cst_37 : f32 to vector<2x8x8xf32>
    %115 = arith.subf %29, %114 : vector<2x8x8xf32>
    %116 = arith.mulf %113, %115 : vector<2x8x8xf32>
    %cst_38 = arith.constant 34.7222214 : f32
    %117 = vector.broadcast %cst_38 : f32 to vector<2x8x8xf32>
    %118 = arith.mulf %116, %117 : vector<2x8x8xf32>
    %119 = math.exp %118 : vector<2x8x8xf32>
    %cst_39 = arith.constant 0.666666686 : f32
    %120 = vector.broadcast %cst_39 : f32 to vector<2x8x8xf32>
    %121 = arith.subf %29, %120 : vector<2x8x8xf32>
    %cst_40 = arith.constant 0.000000e+00 : f32
    %122 = vector.broadcast %cst_40 : f32 to vector<2x8x8xf32>
    %123 = arith.subf %122, %121 : vector<2x8x8xf32>
    %cst_41 = arith.constant 0.666666686 : f32
    %124 = vector.broadcast %cst_41 : f32 to vector<2x8x8xf32>
    %125 = arith.subf %29, %124 : vector<2x8x8xf32>
    %126 = arith.mulf %123, %125 : vector<2x8x8xf32>
    %cst_42 = arith.constant 34.7222214 : f32
    %127 = vector.broadcast %cst_42 : f32 to vector<2x8x8xf32>
    %128 = arith.mulf %126, %127 : vector<2x8x8xf32>
    %129 = math.exp %128 : vector<2x8x8xf32>
    %cst_43 = arith.constant 8.000000e-01 : f32
    %130 = vector.broadcast %cst_43 : f32 to vector<2x8x8xf32>
    %131 = arith.subf %29, %130 : vector<2x8x8xf32>
    %cst_44 = arith.constant 0.000000e+00 : f32
    %132 = vector.broadcast %cst_44 : f32 to vector<2x8x8xf32>
    %133 = arith.subf %132, %131 : vector<2x8x8xf32>
    %cst_45 = arith.constant 8.000000e-01 : f32
    %134 = vector.broadcast %cst_45 : f32 to vector<2x8x8xf32>
    %135 = arith.subf %29, %134 : vector<2x8x8xf32>
    %136 = arith.mulf %133, %135 : vector<2x8x8xf32>
    %cst_46 = arith.constant 34.7222214 : f32
    %137 = vector.broadcast %cst_46 : f32 to vector<2x8x8xf32>
    %138 = arith.mulf %136, %137 : vector<2x8x8xf32>
    %139 = math.exp %138 : vector<2x8x8xf32>
    %cst_47 = arith.constant 0.933333337 : f32
    %140 = vector.broadcast %cst_47 : f32 to vector<2x8x8xf32>
    %141 = arith.subf %29, %140 : vector<2x8x8xf32>
    %cst_48 = arith.constant 0.000000e+00 : f32
    %142 = vector.broadcast %cst_48 : f32 to vector<2x8x8xf32>
    %143 = arith.subf %142, %141 : vector<2x8x8xf32>
    %cst_49 = arith.constant 0.933333337 : f32
    %144 = vector.broadcast %cst_49 : f32 to vector<2x8x8xf32>
    %145 = arith.subf %29, %144 : vector<2x8x8xf32>
    %146 = arith.mulf %143, %145 : vector<2x8x8xf32>
    %cst_50 = arith.constant 34.7222214 : f32
    %147 = vector.broadcast %cst_50 : f32 to vector<2x8x8xf32>
    %148 = arith.mulf %146, %147 : vector<2x8x8xf32>
    %149 = math.exp %148 : vector<2x8x8xf32>
    %cst_51 = arith.constant 1.06666672 : f32
    %150 = vector.broadcast %cst_51 : f32 to vector<2x8x8xf32>
    %151 = arith.subf %29, %150 : vector<2x8x8xf32>
    %cst_52 = arith.constant 0.000000e+00 : f32
    %152 = vector.broadcast %cst_52 : f32 to vector<2x8x8xf32>
    %153 = arith.subf %152, %151 : vector<2x8x8xf32>
    %cst_53 = arith.constant 1.06666672 : f32
    %154 = vector.broadcast %cst_53 : f32 to vector<2x8x8xf32>
    %155 = arith.subf %29, %154 : vector<2x8x8xf32>
    %156 = arith.mulf %153, %155 : vector<2x8x8xf32>
    %cst_54 = arith.constant 34.7222214 : f32
    %157 = vector.broadcast %cst_54 : f32 to vector<2x8x8xf32>
    %158 = arith.mulf %156, %157 : vector<2x8x8xf32>
    %159 = math.exp %158 : vector<2x8x8xf32>
    %cst_55 = arith.constant 1.200000e+00 : f32
    %160 = vector.broadcast %cst_55 : f32 to vector<2x8x8xf32>
    %161 = arith.subf %29, %160 : vector<2x8x8xf32>
    %cst_56 = arith.constant 0.000000e+00 : f32
    %162 = vector.broadcast %cst_56 : f32 to vector<2x8x8xf32>
    %163 = arith.subf %162, %161 : vector<2x8x8xf32>
    %cst_57 = arith.constant 1.200000e+00 : f32
    %164 = vector.broadcast %cst_57 : f32 to vector<2x8x8xf32>
    %165 = arith.subf %29, %164 : vector<2x8x8xf32>
    %166 = arith.mulf %163, %165 : vector<2x8x8xf32>
    %cst_58 = arith.constant 34.7222214 : f32
    %167 = vector.broadcast %cst_58 : f32 to vector<2x8x8xf32>
    %168 = arith.mulf %166, %167 : vector<2x8x8xf32>
    %169 = math.exp %168 : vector<2x8x8xf32>
    %170 = vector.shape_cast %42 : vector<2x8x8xf32> to vector<2x8x8x1xf32>
    %171 = vector.shape_cast %44 : vector<2x8x8xf32> to vector<2x8x8x1xf32>
    %172 = vector.shape_cast %46 : vector<2x8x8xf32> to vector<2x8x8x1xf32>
    %173 = vector.shape_cast %48 : vector<2x8x8xf32> to vector<2x8x8x1xf32>
    %174 = vector.shape_cast %51 : vector<2x8x8xf32> to vector<2x8x8x1xf32>
    %175 = vector.shape_cast %54 : vector<2x8x8xf32> to vector<2x8x8x1xf32>
    %176 = vector.shape_cast %61 : vector<2x8x8xf32> to vector<2x8x8x1xf32>
    %177 = vector.shape_cast %64 : vector<2x8x8xf32> to vector<2x8x8x1xf32>
    %178 = vector.shape_cast %69 : vector<2x8x8xf32> to vector<2x8x8x1xf32>
    %179 = vector.shape_cast %79 : vector<2x8x8xf32> to vector<2x8x8x1xf32>
    %180 = vector.shape_cast %89 : vector<2x8x8xf32> to vector<2x8x8x1xf32>
    %181 = vector.shape_cast %99 : vector<2x8x8xf32> to vector<2x8x8x1xf32>
    %182 = vector.shape_cast %109 : vector<2x8x8xf32> to vector<2x8x8x1xf32>
    %183 = vector.shape_cast %119 : vector<2x8x8xf32> to vector<2x8x8x1xf32>
    %184 = vector.shape_cast %129 : vector<2x8x8xf32> to vector<2x8x8x1xf32>
    %185 = vector.shape_cast %139 : vector<2x8x8xf32> to vector<2x8x8x1xf32>
    %186 = vector.shape_cast %149 : vector<2x8x8xf32> to vector<2x8x8x1xf32>
    %187 = vector.shape_cast %159 : vector<2x8x8xf32> to vector<2x8x8x1xf32>
    %188 = vector.shape_cast %169 : vector<2x8x8xf32> to vector<2x8x8x1xf32>
    %189 = tpu.concatenate %170, %171, %172, %173, %174, %175, %176, %177, %178, %179, %180, %181, %182, %183, %184, %185 in 3 : vector<2x8x8x1xf32>, vector<2x8x8x1xf32>, vector<2x8x8x1xf32>, vector<2x8x8x1xf32>, vector<2x8x8x1xf32>, vector<2x8x8x1xf32>, vector<2x8x8x1xf32>, vector<2x8x8x1xf32>, vector<2x8x8x1xf32>, vector<2x8x8x1xf32>, vector<2x8x8x1xf32>, vector<2x8x8x1xf32>, vector<2x8x8x1xf32>, vector<2x8x8x1xf32>, vector<2x8x8x1xf32>, vector<2x8x8x1xf32> -> vector<2x8x8x16xf32>
    %190 = tpu.concatenate %186, %187, %188 in 3 : vector<2x8x8x1xf32>, vector<2x8x8x1xf32>, vector<2x8x8x1xf32> -> vector<2x8x8x3xf32>
    %191 = tpu.concatenate %189, %190 in 3 : vector<2x8x8x16xf32>, vector<2x8x8x3xf32> -> vector<2x8x8x19xf32>
    %192 = vector.shape_cast %191 : vector<2x8x8x19xf32> to vector<128x19xf32>
    %193 = arith.truncf %192 : vector<128x19xf32> to vector<128x19xbf16>
    %c0_59 = arith.constant 0 : index
    %c0_60 = arith.constant 0 : index
    %c0_61 = arith.constant 0 : index
    %194 = vector.load %arg2[%c0_59, %c0_60, %c0_61] : memref<2x8x4xf32, #tpu.memory_space<vmem>>, vector<2x8x4xf32>
    %195 = vector.shape_cast %194 : vector<2x8x4xf32> to vector<16x4xf32>
    %196 = arith.truncf %195 : vector<16x4xf32> to vector<16x4xbf16>
    %c0_62 = arith.constant 0 : index
    %c0_63 = arith.constant 0 : index
    %197 = vector.load %arg3[%c0_62, %c0_63] : memref<4x64xbf16, #tpu.memory_space<vmem>>, vector<4x64xbf16>
    %cst_64 = arith.constant dense<0.000000e+00> : vector<16x64xf32>
    %198 = tpu.matmul %196, %197, %cst_64 {dimension_numbers = #tpu.dot_dimension_numbers<[1], [0], [0], [1], [0, 0, 1, 1], [], []>} : vector<16x4xbf16>, vector<4x64xbf16>, vector<16x64xf32> -> vector<16x64xf32>
    %c0_65 = arith.constant 0 : index
    %c0_66 = arith.constant 0 : index
    %199 = vector.load %arg4[%c0_65, %c0_66] : memref<1x64xf32, #tpu.memory_space<vmem>>, vector<1x64xf32>
    %200 = vector.shape_cast %199 : vector<1x64xf32> to vector<64xf32>
    %201 = vector.shape_cast %200 : vector<64xf32> to vector<1x64xf32>
    %202 = vector.broadcast %201 : vector<1x64xf32> to vector<16x64xf32>
    %203 = arith.addf %198, %202 : vector<16x64xf32>
    %204 = arith.truncf %203 : vector<16x64xf32> to vector<16x64xbf16>
    %c0_67 = arith.constant 0 : index
    %c0_68 = arith.constant 0 : index
    %c0_69 = arith.constant 0 : index
    %205 = vector.load %arg5[%c0_67, %c0_68, %c0_69] : memref<3x64x128xbf16, #tpu.memory_space<vmem>>, vector<1x64x128xbf16>
    %206 = vector.shape_cast %205 : vector<1x64x128xbf16> to vector<64x128xbf16>
    %cst_70 = arith.constant dense<0.000000e+00> : vector<16x128xf32>
    %207 = tpu.matmul %204, %206, %cst_70 {dimension_numbers = #tpu.dot_dimension_numbers<[1], [0], [0], [1], [0, 0, 1, 1], [], []>} : vector<16x64xbf16>, vector<64x128xbf16>, vector<16x128xf32> -> vector<16x128xf32>
    %208 = vector.extract_strided_slice %207 {offsets = [0, 0], sizes = [16, 64], strides = [1, 1]} : vector<16x128xf32> to vector<16x64xf32>
    %c0_71 = arith.constant 0 : index
    %c0_72 = arith.constant 0 : index
    %209 = vector.load %arg7[%c0_71, %c0_72] : memref<3x64xf32, #tpu.memory_space<vmem>>, vector<1x64xf32>
    %210 = vector.shape_cast %209 : vector<1x64xf32> to vector<64xf32>
    %211 = vector.shape_cast %210 : vector<64xf32> to vector<1x64xf32>
    %212 = vector.broadcast %211 : vector<1x64xf32> to vector<16x64xf32>
    %213 = arith.addf %208, %212 : vector<16x64xf32>
    %214 = vector.shape_cast %213 : vector<16x64xf32> to vector<2x8x64xf32>
    %215 = vector.extract_strided_slice %207 {offsets = [0, 64], sizes = [16, 64], strides = [1, 1]} : vector<16x128xf32> to vector<16x64xf32>
    %216 = vector.shape_cast %215 : vector<16x64xf32> to vector<2x8x64xf32>
    %c0_73 = arith.constant 0 : index
    %c0_74 = arith.constant 0 : index
    %c0_75 = arith.constant 0 : index
    %217 = vector.load %arg6[%c0_73, %c0_74, %c0_75] : memref<3x19x64xbf16, #tpu.memory_space<vmem>>, vector<1x19x64xbf16>
    %218 = vector.shape_cast %217 : vector<1x19x64xbf16> to vector<19x64xbf16>
    %cst_76 = arith.constant dense<0.000000e+00> : vector<128x64xf32>
    %219 = tpu.matmul %193, %218, %cst_76 {dimension_numbers = #tpu.dot_dimension_numbers<[1], [0], [0], [1], [0, 0, 1, 1], [], []>} : vector<128x19xbf16>, vector<19x64xbf16>, vector<128x64xf32> -> vector<128x64xf32>
    %220 = vector.shape_cast %219 : vector<128x64xf32> to vector<2x8x8x64xf32>
    %221 = vector.shape_cast %214 : vector<2x8x64xf32> to vector<2x8x1x64xf32>
    %222 = vector.shape_cast %216 : vector<2x8x64xf32> to vector<2x1x8x64xf32>
    %223 = vector.broadcast %221 : vector<2x8x1x64xf32> to vector<2x8x8x64xf32>
    %224 = vector.broadcast %222 : vector<2x1x8x64xf32> to vector<2x8x8x64xf32>
    %225 = arith.addf %223, %224 : vector<2x8x8x64xf32>
    %226 = arith.addf %225, %220 : vector<2x8x8x64xf32>
    %cst_77 = arith.constant 0.000000e+00 : f32
    %227 = vector.broadcast %cst_77 : f32 to vector<2x8x8x64xf32>
    %228 = arith.maximumf %226, %227 : vector<2x8x8x64xf32>
    %229 = vector.shape_cast %40 : vector<2x8x8xf32> to vector<2x8x8x1xf32>
    %230 = vector.broadcast %229 : vector<2x8x8x1xf32> to vector<2x8x8x64xf32>
    %231 = arith.mulf %228, %230 : vector<2x8x8x64xf32>
    %cst_78 = arith.constant dense<0.000000e+00> : vector<2x8x64xf32>
    %232 = vector.multi_reduction <add>, %231, %cst_78 [2] : vector<2x8x8x64xf32> to vector<2x8x64xf32>
    %233 = vector.shape_cast %232 : vector<2x8x64xf32> to vector<16x64xf32>
    %234 = arith.truncf %233 : vector<16x64xf32> to vector<16x64xbf16>
    %c0_79 = arith.constant 0 : index
    %c0_80 = arith.constant 0 : index
    %c0_81 = arith.constant 0 : index
    %235 = vector.load %arg8[%c0_79, %c0_80, %c0_81] : memref<3x64x64xbf16, #tpu.memory_space<vmem>>, vector<1x64x64xbf16>
    %236 = vector.shape_cast %235 : vector<1x64x64xbf16> to vector<64x64xbf16>
    %cst_82 = arith.constant dense<0.000000e+00> : vector<16x64xf32>
    %237 = tpu.matmul %234, %236, %cst_82 {dimension_numbers = #tpu.dot_dimension_numbers<[1], [0], [0], [1], [0, 0, 1, 1], [], []>} : vector<16x64xbf16>, vector<64x64xbf16>, vector<16x64xf32> -> vector<16x64xf32>
    %238 = vector.shape_cast %41 : vector<2x8xf32> to vector<16x1xf32>
    %c0_83 = arith.constant 0 : index
    %c0_84 = arith.constant 0 : index
    %239 = vector.load %arg9[%c0_83, %c0_84] : memref<3x64xf32, #tpu.memory_space<vmem>>, vector<1x64xf32>
    %240 = vector.shape_cast %239 : vector<1x64xf32> to vector<64xf32>
    %241 = vector.shape_cast %240 : vector<64xf32> to vector<1x64xf32>
    %242 = vector.broadcast %238 : vector<16x1xf32> to vector<16x64xf32>
    %243 = vector.broadcast %241 : vector<1x64xf32> to vector<16x64xf32>
    %244 = arith.mulf %242, %243 : vector<16x64xf32>
    %245 = arith.addf %237, %244 : vector<16x64xf32>
    %cst_85 = arith.constant 2.500000e-01 : f32
    %246 = vector.broadcast %cst_85 : f32 to vector<16x64xf32>
    %247 = arith.mulf %245, %246 : vector<16x64xf32>
    %c0_86 = arith.constant 0 : index
    %c0_87 = arith.constant 0 : index
    %c0_88 = arith.constant 0 : index
    %248 = vector.load %arg10[%c0_86, %c0_87, %c0_88] : memref<3x64x64xbf16, #tpu.memory_space<vmem>>, vector<1x64x64xbf16>
    %249 = vector.shape_cast %248 : vector<1x64x64xbf16> to vector<64x64xbf16>
    %cst_89 = arith.constant dense<0.000000e+00> : vector<16x64xf32>
    %250 = tpu.matmul %204, %249, %cst_89 {dimension_numbers = #tpu.dot_dimension_numbers<[1], [0], [0], [1], [0, 0, 1, 1], [], []>} : vector<16x64xbf16>, vector<64x64xbf16>, vector<16x64xf32> -> vector<16x64xf32>
    %251 = arith.truncf %247 : vector<16x64xf32> to vector<16x64xbf16>
    %c0_90 = arith.constant 0 : index
    %c0_91 = arith.constant 0 : index
    %c0_92 = arith.constant 0 : index
    %252 = vector.load %arg11[%c0_90, %c0_91, %c0_92] : memref<3x64x64xbf16, #tpu.memory_space<vmem>>, vector<1x64x64xbf16>
    %253 = vector.shape_cast %252 : vector<1x64x64xbf16> to vector<64x64xbf16>
    %cst_93 = arith.constant dense<0.000000e+00> : vector<16x64xf32>
    %254 = tpu.matmul %251, %253, %cst_93 {dimension_numbers = #tpu.dot_dimension_numbers<[1], [0], [0], [1], [0, 0, 1, 1], [], []>} : vector<16x64xbf16>, vector<64x64xbf16>, vector<16x64xf32> -> vector<16x64xf32>
    %255 = arith.addf %250, %254 : vector<16x64xf32>
    %c0_94 = arith.constant 0 : index
    %c0_95 = arith.constant 0 : index
    %256 = vector.load %arg12[%c0_94, %c0_95] : memref<3x64xf32, #tpu.memory_space<vmem>>, vector<1x64xf32>
    %257 = vector.shape_cast %256 : vector<1x64xf32> to vector<64xf32>
    %258 = vector.shape_cast %257 : vector<64xf32> to vector<1x64xf32>
    %259 = vector.broadcast %258 : vector<1x64xf32> to vector<16x64xf32>
    %260 = arith.addf %255, %259 : vector<16x64xf32>
    %cst_96 = arith.constant 0.000000e+00 : f32
    %261 = vector.broadcast %cst_96 : f32 to vector<16x64xf32>
    %262 = arith.maximumf %260, %261 : vector<16x64xf32>
    %263 = arith.truncf %262 : vector<16x64xf32> to vector<16x64xbf16>
    %c0_97 = arith.constant 0 : index
    %c0_98 = arith.constant 0 : index
    %c0_99 = arith.constant 0 : index
    %264 = vector.load %arg13[%c0_97, %c0_98, %c0_99] : memref<3x64x64xbf16, #tpu.memory_space<vmem>>, vector<1x64x64xbf16>
    %265 = vector.shape_cast %264 : vector<1x64x64xbf16> to vector<64x64xbf16>
    %cst_100 = arith.constant dense<0.000000e+00> : vector<16x64xf32>
    %266 = tpu.matmul %263, %265, %cst_100 {dimension_numbers = #tpu.dot_dimension_numbers<[1], [0], [0], [1], [0, 0, 1, 1], [], []>} : vector<16x64xbf16>, vector<64x64xbf16>, vector<16x64xf32> -> vector<16x64xf32>
    %267 = arith.addf %203, %266 : vector<16x64xf32>
    %c0_101 = arith.constant 0 : index
    %c0_102 = arith.constant 0 : index
    %268 = vector.load %arg14[%c0_101, %c0_102] : memref<3x64xf32, #tpu.memory_space<vmem>>, vector<1x64xf32>
    %269 = vector.shape_cast %268 : vector<1x64xf32> to vector<64xf32>
    %270 = vector.shape_cast %269 : vector<64xf32> to vector<1x64xf32>
    %271 = vector.broadcast %270 : vector<1x64xf32> to vector<16x64xf32>
    %272 = arith.addf %267, %271 : vector<16x64xf32>
    %273 = arith.truncf %272 : vector<16x64xf32> to vector<16x64xbf16>
    %c1_103 = arith.constant 1 : index
    %c0_104 = arith.constant 0 : index
    %c0_105 = arith.constant 0 : index
    %274 = vector.load %arg5[%c1_103, %c0_104, %c0_105] : memref<3x64x128xbf16, #tpu.memory_space<vmem>>, vector<1x64x128xbf16>
    %275 = vector.shape_cast %274 : vector<1x64x128xbf16> to vector<64x128xbf16>
    %cst_106 = arith.constant dense<0.000000e+00> : vector<16x128xf32>
    %276 = tpu.matmul %273, %275, %cst_106 {dimension_numbers = #tpu.dot_dimension_numbers<[1], [0], [0], [1], [0, 0, 1, 1], [], []>} : vector<16x64xbf16>, vector<64x128xbf16>, vector<16x128xf32> -> vector<16x128xf32>
    %277 = vector.extract_strided_slice %276 {offsets = [0, 0], sizes = [16, 64], strides = [1, 1]} : vector<16x128xf32> to vector<16x64xf32>
    %c1_107 = arith.constant 1 : index
    %c0_108 = arith.constant 0 : index
    %278 = vector.load %arg7[%c1_107, %c0_108] : memref<3x64xf32, #tpu.memory_space<vmem>>, vector<1x64xf32>
    %279 = vector.shape_cast %278 : vector<1x64xf32> to vector<64xf32>
    %280 = vector.shape_cast %279 : vector<64xf32> to vector<1x64xf32>
    %281 = vector.broadcast %280 : vector<1x64xf32> to vector<16x64xf32>
    %282 = arith.addf %277, %281 : vector<16x64xf32>
    %283 = vector.shape_cast %282 : vector<16x64xf32> to vector<2x8x64xf32>
    %284 = vector.extract_strided_slice %276 {offsets = [0, 64], sizes = [16, 64], strides = [1, 1]} : vector<16x128xf32> to vector<16x64xf32>
    %285 = vector.shape_cast %284 : vector<16x64xf32> to vector<2x8x64xf32>
    %c1_109 = arith.constant 1 : index
    %c0_110 = arith.constant 0 : index
    %c0_111 = arith.constant 0 : index
    %286 = vector.load %arg6[%c1_109, %c0_110, %c0_111] : memref<3x19x64xbf16, #tpu.memory_space<vmem>>, vector<1x19x64xbf16>
    %287 = vector.shape_cast %286 : vector<1x19x64xbf16> to vector<19x64xbf16>
    %cst_112 = arith.constant dense<0.000000e+00> : vector<128x64xf32>
    %288 = tpu.matmul %193, %287, %cst_112 {dimension_numbers = #tpu.dot_dimension_numbers<[1], [0], [0], [1], [0, 0, 1, 1], [], []>} : vector<128x19xbf16>, vector<19x64xbf16>, vector<128x64xf32> -> vector<128x64xf32>
    %289 = vector.shape_cast %288 : vector<128x64xf32> to vector<2x8x8x64xf32>
    %290 = vector.shape_cast %283 : vector<2x8x64xf32> to vector<2x8x1x64xf32>
    %291 = vector.shape_cast %285 : vector<2x8x64xf32> to vector<2x1x8x64xf32>
    %292 = vector.broadcast %290 : vector<2x8x1x64xf32> to vector<2x8x8x64xf32>
    %293 = vector.broadcast %291 : vector<2x1x8x64xf32> to vector<2x8x8x64xf32>
    %294 = arith.addf %292, %293 : vector<2x8x8x64xf32>
    %295 = arith.addf %294, %289 : vector<2x8x8x64xf32>
    %cst_113 = arith.constant 0.000000e+00 : f32
    %296 = vector.broadcast %cst_113 : f32 to vector<2x8x8x64xf32>
    %297 = arith.maximumf %295, %296 : vector<2x8x8x64xf32>
    %298 = vector.shape_cast %40 : vector<2x8x8xf32> to vector<2x8x8x1xf32>
    %299 = vector.broadcast %298 : vector<2x8x8x1xf32> to vector<2x8x8x64xf32>
    %300 = arith.mulf %297, %299 : vector<2x8x8x64xf32>
    %cst_114 = arith.constant dense<0.000000e+00> : vector<2x8x64xf32>
    %301 = vector.multi_reduction <add>, %300, %cst_114 [2] : vector<2x8x8x64xf32> to vector<2x8x64xf32>
    %302 = vector.shape_cast %301 : vector<2x8x64xf32> to vector<16x64xf32>
    %303 = arith.truncf %302 : vector<16x64xf32> to vector<16x64xbf16>
    %c1_115 = arith.constant 1 : index
    %c0_116 = arith.constant 0 : index
    %c0_117 = arith.constant 0 : index
    %304 = vector.load %arg8[%c1_115, %c0_116, %c0_117] : memref<3x64x64xbf16, #tpu.memory_space<vmem>>, vector<1x64x64xbf16>
    %305 = vector.shape_cast %304 : vector<1x64x64xbf16> to vector<64x64xbf16>
    %cst_118 = arith.constant dense<0.000000e+00> : vector<16x64xf32>
    %306 = tpu.matmul %303, %305, %cst_118 {dimension_numbers = #tpu.dot_dimension_numbers<[1], [0], [0], [1], [0, 0, 1, 1], [], []>} : vector<16x64xbf16>, vector<64x64xbf16>, vector<16x64xf32> -> vector<16x64xf32>
    %307 = vector.shape_cast %41 : vector<2x8xf32> to vector<16x1xf32>
    %c1_119 = arith.constant 1 : index
    %c0_120 = arith.constant 0 : index
    %308 = vector.load %arg9[%c1_119, %c0_120] : memref<3x64xf32, #tpu.memory_space<vmem>>, vector<1x64xf32>
    %309 = vector.shape_cast %308 : vector<1x64xf32> to vector<64xf32>
    %310 = vector.shape_cast %309 : vector<64xf32> to vector<1x64xf32>
    %311 = vector.broadcast %307 : vector<16x1xf32> to vector<16x64xf32>
    %312 = vector.broadcast %310 : vector<1x64xf32> to vector<16x64xf32>
    %313 = arith.mulf %311, %312 : vector<16x64xf32>
    %314 = arith.addf %306, %313 : vector<16x64xf32>
    %cst_121 = arith.constant 2.500000e-01 : f32
    %315 = vector.broadcast %cst_121 : f32 to vector<16x64xf32>
    %316 = arith.mulf %314, %315 : vector<16x64xf32>
    %c1_122 = arith.constant 1 : index
    %c0_123 = arith.constant 0 : index
    %c0_124 = arith.constant 0 : index
    %317 = vector.load %arg10[%c1_122, %c0_123, %c0_124] : memref<3x64x64xbf16, #tpu.memory_space<vmem>>, vector<1x64x64xbf16>
    %318 = vector.shape_cast %317 : vector<1x64x64xbf16> to vector<64x64xbf16>
    %cst_125 = arith.constant dense<0.000000e+00> : vector<16x64xf32>
    %319 = tpu.matmul %273, %318, %cst_125 {dimension_numbers = #tpu.dot_dimension_numbers<[1], [0], [0], [1], [0, 0, 1, 1], [], []>} : vector<16x64xbf16>, vector<64x64xbf16>, vector<16x64xf32> -> vector<16x64xf32>
    %320 = arith.truncf %316 : vector<16x64xf32> to vector<16x64xbf16>
    %c1_126 = arith.constant 1 : index
    %c0_127 = arith.constant 0 : index
    %c0_128 = arith.constant 0 : index
    %321 = vector.load %arg11[%c1_126, %c0_127, %c0_128] : memref<3x64x64xbf16, #tpu.memory_space<vmem>>, vector<1x64x64xbf16>
    %322 = vector.shape_cast %321 : vector<1x64x64xbf16> to vector<64x64xbf16>
    %cst_129 = arith.constant dense<0.000000e+00> : vector<16x64xf32>
    %323 = tpu.matmul %320, %322, %cst_129 {dimension_numbers = #tpu.dot_dimension_numbers<[1], [0], [0], [1], [0, 0, 1, 1], [], []>} : vector<16x64xbf16>, vector<64x64xbf16>, vector<16x64xf32> -> vector<16x64xf32>
    %324 = arith.addf %319, %323 : vector<16x64xf32>
    %c1_130 = arith.constant 1 : index
    %c0_131 = arith.constant 0 : index
    %325 = vector.load %arg12[%c1_130, %c0_131] : memref<3x64xf32, #tpu.memory_space<vmem>>, vector<1x64xf32>
    %326 = vector.shape_cast %325 : vector<1x64xf32> to vector<64xf32>
    %327 = vector.shape_cast %326 : vector<64xf32> to vector<1x64xf32>
    %328 = vector.broadcast %327 : vector<1x64xf32> to vector<16x64xf32>
    %329 = arith.addf %324, %328 : vector<16x64xf32>
    %cst_132 = arith.constant 0.000000e+00 : f32
    %330 = vector.broadcast %cst_132 : f32 to vector<16x64xf32>
    %331 = arith.maximumf %329, %330 : vector<16x64xf32>
    %332 = arith.truncf %331 : vector<16x64xf32> to vector<16x64xbf16>
    %c1_133 = arith.constant 1 : index
    %c0_134 = arith.constant 0 : index
    %c0_135 = arith.constant 0 : index
    %333 = vector.load %arg13[%c1_133, %c0_134, %c0_135] : memref<3x64x64xbf16, #tpu.memory_space<vmem>>, vector<1x64x64xbf16>
    %334 = vector.shape_cast %333 : vector<1x64x64xbf16> to vector<64x64xbf16>
    %cst_136 = arith.constant dense<0.000000e+00> : vector<16x64xf32>
    %335 = tpu.matmul %332, %334, %cst_136 {dimension_numbers = #tpu.dot_dimension_numbers<[1], [0], [0], [1], [0, 0, 1, 1], [], []>} : vector<16x64xbf16>, vector<64x64xbf16>, vector<16x64xf32> -> vector<16x64xf32>
    %336 = arith.addf %272, %335 : vector<16x64xf32>
    %c1_137 = arith.constant 1 : index
    %c0_138 = arith.constant 0 : index
    %337 = vector.load %arg14[%c1_137, %c0_138] : memref<3x64xf32, #tpu.memory_space<vmem>>, vector<1x64xf32>
    %338 = vector.shape_cast %337 : vector<1x64xf32> to vector<64xf32>
    %339 = vector.shape_cast %338 : vector<64xf32> to vector<1x64xf32>
    %340 = vector.broadcast %339 : vector<1x64xf32> to vector<16x64xf32>
    %341 = arith.addf %336, %340 : vector<16x64xf32>
    %342 = arith.truncf %341 : vector<16x64xf32> to vector<16x64xbf16>
    %c2_139 = arith.constant 2 : index
    %c0_140 = arith.constant 0 : index
    %c0_141 = arith.constant 0 : index
    %343 = vector.load %arg5[%c2_139, %c0_140, %c0_141] : memref<3x64x128xbf16, #tpu.memory_space<vmem>>, vector<1x64x128xbf16>
    %344 = vector.shape_cast %343 : vector<1x64x128xbf16> to vector<64x128xbf16>
    %cst_142 = arith.constant dense<0.000000e+00> : vector<16x128xf32>
    %345 = tpu.matmul %342, %344, %cst_142 {dimension_numbers = #tpu.dot_dimension_numbers<[1], [0], [0], [1], [0, 0, 1, 1], [], []>} : vector<16x64xbf16>, vector<64x128xbf16>, vector<16x128xf32> -> vector<16x128xf32>
    %346 = vector.extract_strided_slice %345 {offsets = [0, 0], sizes = [16, 64], strides = [1, 1]} : vector<16x128xf32> to vector<16x64xf32>
    %c2_143 = arith.constant 2 : index
    %c0_144 = arith.constant 0 : index
    %347 = vector.load %arg7[%c2_143, %c0_144] : memref<3x64xf32, #tpu.memory_space<vmem>>, vector<1x64xf32>
    %348 = vector.shape_cast %347 : vector<1x64xf32> to vector<64xf32>
    %349 = vector.shape_cast %348 : vector<64xf32> to vector<1x64xf32>
    %350 = vector.broadcast %349 : vector<1x64xf32> to vector<16x64xf32>
    %351 = arith.addf %346, %350 : vector<16x64xf32>
    %352 = vector.shape_cast %351 : vector<16x64xf32> to vector<2x8x64xf32>
    %353 = vector.extract_strided_slice %345 {offsets = [0, 64], sizes = [16, 64], strides = [1, 1]} : vector<16x128xf32> to vector<16x64xf32>
    %354 = vector.shape_cast %353 : vector<16x64xf32> to vector<2x8x64xf32>
    %c2_145 = arith.constant 2 : index
    %c0_146 = arith.constant 0 : index
    %c0_147 = arith.constant 0 : index
    %355 = vector.load %arg6[%c2_145, %c0_146, %c0_147] : memref<3x19x64xbf16, #tpu.memory_space<vmem>>, vector<1x19x64xbf16>
    %356 = vector.shape_cast %355 : vector<1x19x64xbf16> to vector<19x64xbf16>
    %cst_148 = arith.constant dense<0.000000e+00> : vector<128x64xf32>
    %357 = tpu.matmul %193, %356, %cst_148 {dimension_numbers = #tpu.dot_dimension_numbers<[1], [0], [0], [1], [0, 0, 1, 1], [], []>} : vector<128x19xbf16>, vector<19x64xbf16>, vector<128x64xf32> -> vector<128x64xf32>
    %358 = vector.shape_cast %357 : vector<128x64xf32> to vector<2x8x8x64xf32>
    %359 = vector.shape_cast %352 : vector<2x8x64xf32> to vector<2x8x1x64xf32>
    %360 = vector.shape_cast %354 : vector<2x8x64xf32> to vector<2x1x8x64xf32>
    %361 = vector.broadcast %359 : vector<2x8x1x64xf32> to vector<2x8x8x64xf32>
    %362 = vector.broadcast %360 : vector<2x1x8x64xf32> to vector<2x8x8x64xf32>
    %363 = arith.addf %361, %362 : vector<2x8x8x64xf32>
    %364 = arith.addf %363, %358 : vector<2x8x8x64xf32>
    %cst_149 = arith.constant 0.000000e+00 : f32
    %365 = vector.broadcast %cst_149 : f32 to vector<2x8x8x64xf32>
    %366 = arith.maximumf %364, %365 : vector<2x8x8x64xf32>
    %367 = vector.shape_cast %40 : vector<2x8x8xf32> to vector<2x8x8x1xf32>
    %368 = vector.broadcast %367 : vector<2x8x8x1xf32> to vector<2x8x8x64xf32>
    %369 = arith.mulf %366, %368 : vector<2x8x8x64xf32>
    %cst_150 = arith.constant dense<0.000000e+00> : vector<2x8x64xf32>
    %370 = vector.multi_reduction <add>, %369, %cst_150 [2] : vector<2x8x8x64xf32> to vector<2x8x64xf32>
    %371 = vector.shape_cast %370 : vector<2x8x64xf32> to vector<16x64xf32>
    %372 = arith.truncf %371 : vector<16x64xf32> to vector<16x64xbf16>
    %c2_151 = arith.constant 2 : index
    %c0_152 = arith.constant 0 : index
    %c0_153 = arith.constant 0 : index
    %373 = vector.load %arg8[%c2_151, %c0_152, %c0_153] : memref<3x64x64xbf16, #tpu.memory_space<vmem>>, vector<1x64x64xbf16>
    %374 = vector.shape_cast %373 : vector<1x64x64xbf16> to vector<64x64xbf16>
    %cst_154 = arith.constant dense<0.000000e+00> : vector<16x64xf32>
    %375 = tpu.matmul %372, %374, %cst_154 {dimension_numbers = #tpu.dot_dimension_numbers<[1], [0], [0], [1], [0, 0, 1, 1], [], []>} : vector<16x64xbf16>, vector<64x64xbf16>, vector<16x64xf32> -> vector<16x64xf32>
    %376 = vector.shape_cast %41 : vector<2x8xf32> to vector<16x1xf32>
    %c2_155 = arith.constant 2 : index
    %c0_156 = arith.constant 0 : index
    %377 = vector.load %arg9[%c2_155, %c0_156] : memref<3x64xf32, #tpu.memory_space<vmem>>, vector<1x64xf32>
    %378 = vector.shape_cast %377 : vector<1x64xf32> to vector<64xf32>
    %379 = vector.shape_cast %378 : vector<64xf32> to vector<1x64xf32>
    %380 = vector.broadcast %376 : vector<16x1xf32> to vector<16x64xf32>
    %381 = vector.broadcast %379 : vector<1x64xf32> to vector<16x64xf32>
    %382 = arith.mulf %380, %381 : vector<16x64xf32>
    %383 = arith.addf %375, %382 : vector<16x64xf32>
    %cst_157 = arith.constant 2.500000e-01 : f32
    %384 = vector.broadcast %cst_157 : f32 to vector<16x64xf32>
    %385 = arith.mulf %383, %384 : vector<16x64xf32>
    %c2_158 = arith.constant 2 : index
    %c0_159 = arith.constant 0 : index
    %c0_160 = arith.constant 0 : index
    %386 = vector.load %arg10[%c2_158, %c0_159, %c0_160] : memref<3x64x64xbf16, #tpu.memory_space<vmem>>, vector<1x64x64xbf16>
    %387 = vector.shape_cast %386 : vector<1x64x64xbf16> to vector<64x64xbf16>
    %cst_161 = arith.constant dense<0.000000e+00> : vector<16x64xf32>
    %388 = tpu.matmul %342, %387, %cst_161 {dimension_numbers = #tpu.dot_dimension_numbers<[1], [0], [0], [1], [0, 0, 1, 1], [], []>} : vector<16x64xbf16>, vector<64x64xbf16>, vector<16x64xf32> -> vector<16x64xf32>
    %389 = arith.truncf %385 : vector<16x64xf32> to vector<16x64xbf16>
    %c2_162 = arith.constant 2 : index
    %c0_163 = arith.constant 0 : index
    %c0_164 = arith.constant 0 : index
    %390 = vector.load %arg11[%c2_162, %c0_163, %c0_164] : memref<3x64x64xbf16, #tpu.memory_space<vmem>>, vector<1x64x64xbf16>
    %391 = vector.shape_cast %390 : vector<1x64x64xbf16> to vector<64x64xbf16>
    %cst_165 = arith.constant dense<0.000000e+00> : vector<16x64xf32>
    %392 = tpu.matmul %389, %391, %cst_165 {dimension_numbers = #tpu.dot_dimension_numbers<[1], [0], [0], [1], [0, 0, 1, 1], [], []>} : vector<16x64xbf16>, vector<64x64xbf16>, vector<16x64xf32> -> vector<16x64xf32>
    %393 = arith.addf %388, %392 : vector<16x64xf32>
    %c2_166 = arith.constant 2 : index
    %c0_167 = arith.constant 0 : index
    %394 = vector.load %arg12[%c2_166, %c0_167] : memref<3x64xf32, #tpu.memory_space<vmem>>, vector<1x64xf32>
    %395 = vector.shape_cast %394 : vector<1x64xf32> to vector<64xf32>
    %396 = vector.shape_cast %395 : vector<64xf32> to vector<1x64xf32>
    %397 = vector.broadcast %396 : vector<1x64xf32> to vector<16x64xf32>
    %398 = arith.addf %393, %397 : vector<16x64xf32>
    %cst_168 = arith.constant 0.000000e+00 : f32
    %399 = vector.broadcast %cst_168 : f32 to vector<16x64xf32>
    %400 = arith.maximumf %398, %399 : vector<16x64xf32>
    %401 = arith.truncf %400 : vector<16x64xf32> to vector<16x64xbf16>
    %c2_169 = arith.constant 2 : index
    %c0_170 = arith.constant 0 : index
    %c0_171 = arith.constant 0 : index
    %402 = vector.load %arg13[%c2_169, %c0_170, %c0_171] : memref<3x64x64xbf16, #tpu.memory_space<vmem>>, vector<1x64x64xbf16>
    %403 = vector.shape_cast %402 : vector<1x64x64xbf16> to vector<64x64xbf16>
    %cst_172 = arith.constant dense<0.000000e+00> : vector<16x64xf32>
    %404 = tpu.matmul %401, %403, %cst_172 {dimension_numbers = #tpu.dot_dimension_numbers<[1], [0], [0], [1], [0, 0, 1, 1], [], []>} : vector<16x64xbf16>, vector<64x64xbf16>, vector<16x64xf32> -> vector<16x64xf32>
    %405 = arith.addf %341, %404 : vector<16x64xf32>
    %c2_173 = arith.constant 2 : index
    %c0_174 = arith.constant 0 : index
    %406 = vector.load %arg14[%c2_173, %c0_174] : memref<3x64xf32, #tpu.memory_space<vmem>>, vector<1x64xf32>
    %407 = vector.shape_cast %406 : vector<1x64xf32> to vector<64xf32>
    %408 = vector.shape_cast %407 : vector<64xf32> to vector<1x64xf32>
    %409 = vector.broadcast %408 : vector<1x64xf32> to vector<16x64xf32>
    %410 = arith.addf %405, %409 : vector<16x64xf32>
    %411 = vector.shape_cast %410 : vector<16x64xf32> to vector<2x8x64xf32>
    %cst_175 = arith.constant dense<0.000000e+00> : vector<2x64xf32>
    %412 = vector.multi_reduction <add>, %411, %cst_175 [1] : vector<2x8x64xf32> to vector<2x64xf32>
    %cst_176 = arith.constant 8.000000e+00 : f32
    %413 = vector.broadcast %cst_176 : f32 to vector<2x64xf32>
    %414 = arith.divf %412, %413 : vector<2x64xf32>
    %415 = arith.truncf %414 : vector<2x64xf32> to vector<2x64xbf16>
    %c0_177 = arith.constant 0 : index
    %c0_178 = arith.constant 0 : index
    %416 = vector.load %arg15[%c0_177, %c0_178] : memref<64x3xbf16, #tpu.memory_space<vmem>>, vector<64x3xbf16>
    %cst_179 = arith.constant dense<0.000000e+00> : vector<2x3xf32>
    %417 = tpu.matmul %415, %416, %cst_179 {dimension_numbers = #tpu.dot_dimension_numbers<[1], [0], [0], [1], [0, 0, 1, 1], [], []>} : vector<2x64xbf16>, vector<64x3xbf16>, vector<2x3xf32> -> vector<2x3xf32>
    %c0_180 = arith.constant 0 : index
    %c0_181 = arith.constant 0 : index
    %418 = vector.load %arg16[%c0_180, %c0_181] : memref<1x3xf32, #tpu.memory_space<vmem>>, vector<1x3xf32>
    %419 = vector.shape_cast %418 : vector<1x3xf32> to vector<3xf32>
    %420 = vector.shape_cast %419 : vector<3xf32> to vector<1x3xf32>
    %421 = vector.broadcast %420 : vector<1x3xf32> to vector<2x3xf32>
    %422 = arith.addf %417, %421 : vector<2x3xf32>
    %423 = vector.shape_cast %422 : vector<2x3xf32> to vector<2x1x3xf32>
    %c0_182 = arith.constant 0 : index
    %c0_183 = arith.constant 0 : index
    %c0_184 = arith.constant 0 : index
    %424 = vector.load %arg17[%c0_182, %c0_183, %c0_184] : memref<2x1x3xf32, #tpu.memory_space<vmem>>, vector<2x1x3xf32>
    tpu.vector_store %arg17[%c0_182, %c0_183, %c0_184], %423 {strides = array<i32>} : memref<2x1x3xf32, #tpu.memory_space<vmem>>, vector<2x1x3xf32>,
    return
  }
  func.func @transform_0(%arg0: i32) -> (i32, i32, i32) {
    %c0_i32 = arith.constant 0 : i32
    %c0_i32_0 = arith.constant 0 : i32
    %c0_i32_1 = arith.constant 0 : i32
    return %arg0, %c0_i32, %c0_i32_0 : i32, i32, i32
  }
  func.func @transform_1(%arg0: i32) -> (i32, i32, i32) {
    %c0_i32 = arith.constant 0 : i32
    %c0_i32_0 = arith.constant 0 : i32
    %c0_i32_1 = arith.constant 0 : i32
    return %arg0, %c0_i32, %c0_i32_0 : i32, i32, i32
  }
  func.func @transform_2(%arg0: i32) -> (i32, i32) {
    %c0_i32 = arith.constant 0 : i32
    %c0_i32_0 = arith.constant 0 : i32
    %c0_i32_1 = arith.constant 0 : i32
    return %c0_i32, %c0_i32_0 : i32, i32
  }
  func.func @transform_3(%arg0: i32) -> (i32, i32) {
    %c0_i32 = arith.constant 0 : i32
    %c0_i32_0 = arith.constant 0 : i32
    %c0_i32_1 = arith.constant 0 : i32
    return %c0_i32, %c0_i32_0 : i32, i32
  }
  func.func @transform_4(%arg0: i32) -> (i32, i32, i32) {
    %c0_i32 = arith.constant 0 : i32
    %c0_i32_0 = arith.constant 0 : i32
    %c0_i32_1 = arith.constant 0 : i32
    %c0_i32_2 = arith.constant 0 : i32
    return %c0_i32, %c0_i32_0, %c0_i32_1 : i32, i32, i32
  }
  func.func @transform_5(%arg0: i32) -> (i32, i32, i32) {
    %c0_i32 = arith.constant 0 : i32
    %c0_i32_0 = arith.constant 0 : i32
    %c0_i32_1 = arith.constant 0 : i32
    %c0_i32_2 = arith.constant 0 : i32
    return %c0_i32, %c0_i32_0, %c0_i32_1 : i32, i32, i32
  }
  func.func @transform_6(%arg0: i32) -> (i32, i32) {
    %c0_i32 = arith.constant 0 : i32
    %c0_i32_0 = arith.constant 0 : i32
    %c0_i32_1 = arith.constant 0 : i32
    return %c0_i32, %c0_i32_0 : i32, i32
  }
  func.func @transform_7(%arg0: i32) -> (i32, i32, i32) {
    %c0_i32 = arith.constant 0 : i32
    %c0_i32_0 = arith.constant 0 : i32
    %c0_i32_1 = arith.constant 0 : i32
    %c0_i32_2 = arith.constant 0 : i32
    return %c0_i32, %c0_i32_0, %c0_i32_1 : i32, i32, i32
  }
  func.func @transform_8(%arg0: i32) -> (i32, i32) {
    %c0_i32 = arith.constant 0 : i32
    %c0_i32_0 = arith.constant 0 : i32
    %c0_i32_1 = arith.constant 0 : i32
    return %c0_i32, %c0_i32_0 : i32, i32
  }
  func.func @transform_9(%arg0: i32) -> (i32, i32, i32) {
    %c0_i32 = arith.constant 0 : i32
    %c0_i32_0 = arith.constant 0 : i32
    %c0_i32_1 = arith.constant 0 : i32
    %c0_i32_2 = arith.constant 0 : i32
    return %c0_i32, %c0_i32_0, %c0_i32_1 : i32, i32, i32
  }
  func.func @transform_10(%arg0: i32) -> (i32, i32, i32) {
    %c0_i32 = arith.constant 0 : i32
    %c0_i32_0 = arith.constant 0 : i32
    %c0_i32_1 = arith.constant 0 : i32
    %c0_i32_2 = arith.constant 0 : i32
    return %c0_i32, %c0_i32_0, %c0_i32_1 : i32, i32, i32
  }
  func.func @transform_11(%arg0: i32) -> (i32, i32) {
    %c0_i32 = arith.constant 0 : i32
    %c0_i32_0 = arith.constant 0 : i32
    %c0_i32_1 = arith.constant 0 : i32
    return %c0_i32, %c0_i32_0 : i32, i32
  }
  func.func @transform_12(%arg0: i32) -> (i32, i32, i32) {
    %c0_i32 = arith.constant 0 : i32
    %c0_i32_0 = arith.constant 0 : i32
    %c0_i32_1 = arith.constant 0 : i32
    %c0_i32_2 = arith.constant 0 : i32
    return %c0_i32, %c0_i32_0, %c0_i32_1 : i32, i32, i32
  }
  func.func @transform_13(%arg0: i32) -> (i32, i32) {
    %c0_i32 = arith.constant 0 : i32
    %c0_i32_0 = arith.constant 0 : i32
    %c0_i32_1 = arith.constant 0 : i32
    return %c0_i32, %c0_i32_0 : i32, i32
  }
  func.func @transform_14(%arg0: i32) -> (i32, i32) {
    %c0_i32 = arith.constant 0 : i32
    %c0_i32_0 = arith.constant 0 : i32
    %c0_i32_1 = arith.constant 0 : i32
    return %c0_i32, %c0_i32_0 : i32, i32
  }
  func.func @transform_15(%arg0: i32) -> (i32, i32) {
    %c0_i32 = arith.constant 0 : i32
    %c0_i32_0 = arith.constant 0 : i32
    %c0_i32_1 = arith.constant 0 : i32
    return %c0_i32, %c0_i32_0 : i32, i32
  }
  func.func @transform_16(%arg0: i32) -> (i32, i32, i32) {
    %c0_i32 = arith.constant 0 : i32
    %c0_i32_0 = arith.constant 0 : i32
    %c0_i32_1 = arith.constant 0 : i32
    return %arg0, %c0_i32, %c0_i32_0 : i32, i32, i32
  }
}

</mosaic_0001>

<bundles_post_ra>
// kernel: tpu_custom_call.1
= control target key start
LH: loop header
LB: loop body
LE: loop exit
PB: predicated region body
PF: predicated region fallthrough
CT: control target
= control target key end

     0   :  { %s8331_s0 = inlined_call_operand.vmem [shape: f32[2,3,8], index: 0, kind: input, shape index: {}]   ;;  %s8332_s1 = inlined_call_operand.vmem [shape: f32[2,8,4], index: 1, kind: input, shape index: {}]   ;;  %s8333_s2 = inlined_call_operand.vmem [shape: bf16[4,64], index: 2, kind: input, shape index: {}]   ;;  %s8334_s3 = inlined_call_operand.vmem [shape: f32[1,64], index: 3, kind: input, shape index: {}]   ;;  %s8335_s4 = inlined_call_operand.hbm [shape: bf16[3,64,128], index: 4, kind: input, shape index: {}]   ;;  %s8336_s5 = inlined_call_operand.vmem [shape: bf16[3,19,64], index: 5, kind: input, shape index: {}]   ;;  %s8337_s6 = inlined_call_operand.vmem [shape: f32[3,64], index: 6, kind: input, shape index: {}]   ;;  %s8338_s7 = inlined_call_operand.hbm [shape: bf16[3,64,64], index: 7, kind: input, shape index: {}]   ;;  %s8339_s8 = inlined_call_operand.vmem [shape: f32[3,64], index: 8, kind: input, shape index: {}]   ;;  %s8340_s9 = inlined_call_operand.hbm [shape: bf16[3,64,64], index: 9, kind: input, shape index: {}]   ;;  %s8341_s10 = inlined_call_operand.hbm [shape: bf16[3,64,64], index: 10, kind: input, shape index: {}]   ;;  %s8342_s11 = inlined_call_operand.vmem [shape: f32[3,64], index: 11, kind: input, shape index: {}]   ;;  %s8343_s12 = inlined_call_operand.hbm [shape: bf16[3,64,64], index: 12, kind: input, shape index: {}]   ;;  %s8344_s13 = inlined_call_operand.vmem [shape: f32[3,64], index: 13, kind: input, shape index: {}]   ;;  %s8345_s14 = inlined_call_operand.vmem [shape: bf16[64,3], index: 14, kind: input, shape index: {}]   ;;  %s8346_s15 = inlined_call_operand.vmem [shape: f32[1,3], index: 15, kind: input, shape index: {}]   ;;  %s8347_s16 = inlined_call_operand.hbm [shape: f32[2,1,3], index: 16, kind: output, shape index: {}]  }
   0x1   :  { %8386 = sst [smem:[#allocation30_spill]] %s8331_s0 }
   0x2   :  { %21 = vsyncpa [#allocation3], 0 }
   0x3   :  { %22 = vsyncpa [#allocation6], 0 }
   0x4   :  { %23 = vsyncpa [#allocation9], 0 }
   0x5   :  { %24 = vsyncpa [#allocation4], 0  ;;  %s54_s23 = sshll.u32 %s8338_s7, 4  ;;  %s6408_s24 = smov [#allocation5]   ;;  %s55_s23 = int_to_ptr.hbm [resolvable:$true] %s54_s23 }
   0x6   :  { %s56_s25 = sshll.u32 %s6408_s24, 4  ;;  %s82_s28 = sshll.u32 %s8341_s10, 4  ;;  %s57_s25 = int_to_ptr.vmem [resolvable:$true] %s56_s25  ;;  %s83_s28 = int_to_ptr.hbm [resolvable:$true] %s82_s28 }
   0x7   :  { %s6409_s29 = smov 64   ;;  %s6410_s30 = smov 4  }
   0x8   :  { %62 = dma.hbm_to_vmem [thread:$0]  %s55_s23, 1536, %s57_s25, [#allocation6], %s6409_s29, %s6409_s29, %s6410_s30  }
   0x9   :  { %s6411_s0 = smov [#allocation8]   ;;  %s37_s7 = sshll.u32 %s8335_s4, 4  ;;  %s38_s7 = int_to_ptr.hbm [resolvable:$true] %s37_s7 }
   0xa   :  { %s84_s17 = sshll.u32 %s6411_s0, 4  ;;  %s69_s10 = sshll.u32 %s8340_s9, 4  ;;  %s85_s17 = int_to_ptr.vmem [resolvable:$true] %s84_s17  ;;  %s70_s10 = int_to_ptr.hbm [resolvable:$true] %s69_s10 }
   0xb   :  { %90 = dma.hbm_to_vmem [thread:$0]  %s83_s28, 1536, %s85_s17, [#allocation9], %s6409_s29, %s6409_s29, %s6410_s30  }
   0xc   :  { %s6412_s22 = smov [#allocation2]   ;;  %s6413_s23 = smov [#allocation7]  }
   0xd   :  { %s39_s24 = sshll.u32 %s6412_s22, 4  ;;  %s71_s25 = sshll.u32 %s6413_s23, 4  ;;  %s40_s24 = int_to_ptr.vmem [resolvable:$true] %s39_s24  ;;  %s72_s25 = int_to_ptr.vmem [resolvable:$true] %s71_s25 }
   0xe   :  { %45 = dma.hbm_to_vmem [thread:$0]  %s38_s7, 1536, %s40_s24, [#allocation3], %s6409_s29, %s6409_s29, %s6410_s30  }
   0xf   :  { %s97_s27 = sshll.u32 %s8343_s12, 4  ;;  %s6414_s28 = smov [#allocation10]   ;;  %s98_s27 = int_to_ptr.hbm [resolvable:$true] %s97_s27 }
  0x10   :  { %77 = dma.hbm_to_vmem [thread:$0]  %s70_s10, 1536, %s72_s25, [#allocation6], %s6409_s29, %s6409_s29, %s6410_s30  }
  0x11   :  { %s99_s9 = sshll.u32 %s6414_s28, 4  ;;  %s100_s9 = int_to_ptr.vmem [resolvable:$true] %s99_s9 }
  0x12   :  { %105 = dma.hbm_to_vmem [thread:$0]  %s98_s27, 1536, %s100_s9, [#allocation9], %s6409_s29, %s6409_s29, %s6410_s30  }
  0x13   :  { %6400 = dma.done.wait [#allocation3], 1536  }
  0x14   :  { %6401 = vsyncadd [#allocation3], 4294965760 }
  0x15   :  { %6402 = dma.done.wait [#allocation6], 3072  }
  0x16   :  { %6403 = vsyncadd [#allocation6], 4294964224 }
  0x17   :  { %6404 = dma.done.wait [#allocation9], 3072  }
  0x18   :  { %6405 = vsyncadd [#allocation9], 4294964224  ;;  %v140_v0 = vlaneseq  ;;  %s8387_s17 = sld [smem:[#allocation30_spill]]  ;;  %vm2799_vm11 = vcmask 1041408   ;;  %vm8363_vm12 = vcmask 31744   ;;  %vm2413_vm13 = vcmask 7168  }
  0x19   :  { %vm2430_vm14 = vcmask 15360   ;;  %vm2447_vm15 = vcmask 23552   ;;  %s4950_s0 = sshll.u32 %s8347_s16, 4  ;;  %s6420_s19 = smov 1   ;;  %s4951_s0 = int_to_ptr.hbm [resolvable:$true] %s4950_s0 }
  0x1a   :  { %v141_v1 = vshrl.u32 %v140_v0, 7  ;;  %v230_v21 = vand.u32 127, %v140_v0 }
  0x1c   :  { %5387 = vset.pattern.permute.xlu1 %v141_v1  ;;  %5386 = vset.pattern.permute.xlu0 %v141_v1  ;;  %vm233_vm0 = vcmp.ne.s32.totalorder %v141_v1, %v230_v21 }
  0x1d   :  { %5388 = vset.pattern.permute.xlu2 %v141_v1 }
  0x1e   :  { %v6189_v2 = vld [vmem:[%s8387_s17 + $0x2] ss:$0 sm:$0xff]  ;;  %v6190_v3 = vld [vmem:[%s8387_s17] ss:$0 sm:$0xff]  ;;  %v6193_v4 = vld [vmem:[%s8387_s17 + $0x5] ss:$0 sm:$0xff] }
  0x1f   :  { %v6191_v5 = vld [vmem:[%s8387_s17 + $0x4] ss:$0 sm:$0xff]  ;;  %v6192_v6 = vld [vmem:[%s8387_s17 + $0x1] ss:$0 sm:$0xff]  ;;  %v6194_v7 = vld [vmem:[%s8387_s17 + $0x6] ss:$0 sm:$0xff] }
  0x20   :  { %s6419_s17 = smov [#allocation11]  }
  0x21   :  { %s4948_s18 = sshll.u32 %s6419_s17, 4  ;;  %s4949_s18 = int_to_ptr.vmem [resolvable:$true] %s4948_s18 }
  0x24   :  { %176 = vperm.xlu1 %5387, %v6189_v2   ;;  %144 = vperm.xlu0 %5386, %v6190_v3  }
  0x25   :  { %167 = vperm.xlu2 %5388, %v6193_v4  }
  0x2c   :  { %151 = vperm.xlu1 %5387, %v6191_v5   ;;  %160 = vperm.xlu0 %5386, %v6192_v6  }
  0x2d   :  { %183 = vperm.xlu2 %5388, %v6194_v7  }
  0x7f   :  { %v168_v8 = vpop.permute.xlu2 %167 }
  0x80   :  { %v170_v12 = vsub.f32 %v6193_v4, %v168_v8 }
  0x82   :  { %v190_v18 = vmul.f32 %v170_v12, %v170_v12 }
  0x87   :  { %v184_v11 = vpop.permute.xlu2 %183 }
  0x88   :  { %v186_v13 = vsub.f32 %v6194_v7, %v184_v11 }
  0x8a   :  { %v194_v22 = vmul.f32 %v186_v13, %v186_v13 }
  0x96   :  { %v177_v9 = vpop.permute.xlu1 %176  ;;  %v145_v10 = vpop.permute.xlu0 %144 }
  0x97   :  { %v185_v14 = vsub.f32 %v6189_v2, %v177_v9  ;;  %v153_v15 = vsub.f32 %v6190_v3, %v145_v10 }
  0x99   :  { %v193_v23 = vmul.f32 %v185_v14, %v185_v14  ;;  %v187_v24 = vmul.f32 %v153_v15, %v153_v15 }
  0x9e   :  { %v152_v16 = vpop.permute.xlu1 %151  ;;  %v161_v17 = vpop.permute.xlu0 %160 }
  0x9f   :  { %v154_v19 = vsub.f32 %v6191_v5, %v152_v16  ;;  %v169_v20 = vsub.f32 %v6192_v6, %v161_v17 }
  0xa1   :  { %v188_v25 = vmul.f32 %v154_v19, %v154_v19  ;;  %v189_v26 = vmul.f32 %v169_v20, %v169_v20 }
  0xa3   :  { %v192_v27 = vadd.f32 %v190_v18, %v188_v25  ;;  %v191_v28 = vadd.f32 %v189_v26, %v187_v24 }
  0xa5   :  { %v6549_v29 = vadd.f32 %v193_v23, %v191_v28  ;;  %v6551_v30 = vadd.f32 %v194_v22, %v192_v27 }
  0xa7   :  { %vm231_vm1 = vcmp.lt.f32.partialorder %v6549_v29, 1.44  ;;  %v198_v31 = vadd.f32 1e-12, %v6551_v30  ;;  %vm232_vm2 = vcmp.lt.f32.partialorder %v6551_v30, 1.44 }
  0xa8   :  { %vm6556_vm3 = vmand %vm231_vm1, %vm233_vm0  ;;  %v197_v34 = vadd.f32 1e-12, %v6549_v29  ;;  %vm2498_vm1 = vcmask 48128  }
  0xa9   :  { %vm6560_vm4 = vmand %vm232_vm2, %vm233_vm0  ;;  %6209 = vrsqrt.f32 %v198_v31  ;;  %vm215_vm6 = vweird.f32 %v198_v31  ;;  %vm8364_vm0 = vcmask 39936   ;;  %vm8359_vm2 = vcmask 64512  }
  0xaa   :  { %6211 = vrsqrt.f32 %v197_v34  ;;  %vm205_vm9 = vweird.f32 %v197_v34 }
  0xaf   :  { %v6210_v35 = vpop.eup %6209 }
  0xb0   :  { %v210_v36 = vmul.f32 %v6210_v35, %v198_v31  ;;  %v6212_v39 = vpop.eup %6211  ;;  %vm216_vm5 = vweird.f32 %v6210_v35 }
  0xb1   :  { %v200_v41 = vmul.f32 %v6212_v39, %v197_v34  ;;  %vm217_vm7 = vmor %vm215_vm6, %vm216_vm5  ;;  %vm206_vm8 = vweird.f32 %v6212_v39  ;;  %vm2565_vm5 = vcmask 80896   ;;  %vm2582_vm6 = vcmask 89088  }
  0xb2   :  { %v211_v37 = vmul.f32 %v6210_v35, %v210_v36  ;;  %vm207_vm10 = vmor %vm205_vm9, %vm206_vm8  ;;  %vm2616_vm8 = vcmask 105472   ;;  %vm8360_vm9 = vcmask 113664  }
  0xb3   :  { %v201_v43 = vmul.f32 %v6212_v39, %v200_v41 }
  0xb4   :  { %v212_v38 = vmul.f32 0.5, %v211_v37 }
  0xb5   :  { %v202_v45 = vmul.f32 0.5, %v201_v43 }
  0xb6   :  { %v213_v40 = vsub.f32 1.5, %v212_v38 }
  0xb7   :  { %v203_v47 = vsub.f32 1.5, %v202_v45 }
  0xb8   :  { %v214_v42 = vmul.f32 %v6210_v35, %v213_v40 }
  0xb9   :  { %v204_v48 = vmul.f32 %v6212_v39, %v203_v47 }
  0xba   :  { %v6565_v44 = vsel %vm217_vm7, %v6210_v35, %v214_v42  ;;  %vm2599_vm7 = vcmask 97280  }
  0xbb   :  { %v6568_v46 = vmul.f32 %v6565_v44, %v154_v19  ;;  %v6571_v49 = vmul.f32 %v6565_v44, %v170_v12  ;;  %v6574_v50 = vmul.f32 %v6565_v44, %v186_v13  ;;  %v6576_v51 = vsel %vm207_vm10, %v6212_v39, %v204_v48 }
  0xbc   :  { %v6583_v53 = vmul.f32 %v6576_v51, %v185_v14  ;;  %v6604_v62 = vmul.f32 %v6576_v51, %v169_v20  ;;  %v6607_v1 = vmul.f32 %v6576_v51, %v153_v15  ;;  %vm8361_vm10 = vcmask 523264  }
  0xbd   :  { %v6580_v52 = vmul.f32 %v6568_v46, %v6568_v46  ;;  %v254_v54 = vmul.f32 3.8729835, %v6568_v46  ;;  %v258_v55 = vmul.f32 3.8729835, %v6571_v49  ;;  %v6589_v56 = vmul.f32 %v6571_v49, %v6571_v49 }
  0xbe   :  { %v251_v61 = vmul.f32 1.7320508, %v6583_v53  ;;  %v249_v2 = vmul.f32 1.7320508, %v6604_v62  ;;  %v247_v4 = vmul.f32 1.7320508, %v6607_v1 }
  0xbf   :  { %v6592_v57 = vmul.f32 %v254_v54, %v6571_v49  ;;  %v6595_v58 = vmul.f32 %v258_v55, %v6574_v50  ;;  %v6598_v59 = vmul.f32 %v254_v54, %v6574_v50  ;;  %v257_v27 = vmul.f32 3.8729835, %v6604_v62 }
  0xc0   :  { %v621_v63 = vperm.slane %v251_v61, 0  ;;  %v628_v0 = vperm.slane %v251_v61, 1  ;;  %v509_v5 = vperm.slane %v249_v2, 0  ;;  %v516_v6 = vperm.slane %v249_v2, 1 }
  0xc1   :  { %v397_v7 = vperm.slane %v247_v4, 0  ;;  %v404_v9 = vperm.slane %v247_v4, 1  ;;  %v523_v10 = vperm.slane %v249_v2, 2  ;;  %v530_v11 = vperm.slane %v249_v2, 3 }
  0xc2   :  { %v5399_v3 = vpack.i.bf16 %v628_v0, %v621_v63  ;;  %v5394_v8 = vpack.i.bf16 %v516_v6, %v509_v5  ;;  %v411_v14 = vperm.slane %v247_v4, 2  ;;  %v418_v15 = vperm.slane %v247_v4, 3 }
  0xc3   :  { %v5389_v12 = vpack.i.bf16 %v404_v9, %v397_v7  ;;  %v5409_v13 = vpack.i.bf16 %v530_v11, %v523_v10  ;;  %v635_v16 = vperm.slane %v251_v61, 2  ;;  %v642_v17 = vperm.slane %v251_v61, 3 }
  0xc4   :  { %5400 = vperm.xlu2 %5388, %v5399_v3   ;;  %5395 = vperm.xlu1 %5387, %v5394_v8   ;;  %v425_v18 = vperm.slane %v247_v4, 4  ;;  %v432_v19 = vperm.slane %v247_v4, 5  ;;  %v5404_v20 = vpack.i.bf16 %v418_v15, %v411_v14  ;;  %v649_v23 = vperm.slane %v251_v61, 4 }
  0xc5   :  { %5390 = vperm.xlu0 %5386, %v5389_v12   ;;  %v5414_v21 = vpack.i.bf16 %v642_v17, %v635_v16  ;;  %v656_v24 = vperm.slane %v251_v61, 5  ;;  %v537_v25 = vperm.slane %v249_v2, 4  ;;  %v544_v26 = vperm.slane %v249_v2, 5 }
  0xc6   :  { %v5419_v22 = vpack.i.bf16 %v432_v19, %v425_v18  ;;  %v663_v28 = vperm.slane %v251_v61, 6  ;;  %v670_v31 = vperm.slane %v251_v61, 7  ;;  %v6613_v36 = vmul.f32 %v257_v27, %v6583_v53 }
  0xc7   :  { %v5429_v34 = vpack.i.bf16 %v656_v24, %v649_v23  ;;  %v5424_v35 = vpack.i.bf16 %v544_v26, %v537_v25  ;;  %v551_v38 = vperm.slane %v249_v2, 6  ;;  %v558_v39 = vperm.slane %v249_v2, 7 }
  0xc8   :  { %v5444_v37 = vpack.i.bf16 %v670_v31, %v663_v28  ;;  %v253_v40 = vmul.f32 3.8729835, %v6607_v1  ;;  %v439_v41 = vperm.slane %v247_v4, 6  ;;  %v446_v42 = vperm.slane %v247_v4, 7 }
  0xc9   :  { %v859_v43 = vperm.slane %v6613_v36, 2  ;;  %v866_v45 = vperm.slane %v6613_v36, 3  ;;  %v5439_v47 = vpack.i.bf16 %v558_v39, %v551_v38  ;;  %v845_v61 = vperm.slane %v6613_v36, 0 }
  0xca   :  { %v6619_v48 = vmul.f32 %v253_v40, %v6604_v62  ;;  %v5434_v54 = vpack.i.bf16 %v446_v42, %v439_v41  ;;  %v852_v63 = vperm.slane %v6613_v36, 1  ;;  %v6629_v6 = vmul.f32 %v6576_v51, %v6549_v29 }
  0xcb   :  { %v5469_v55 = vpack.i.bf16 %v866_v45, %v859_v43  ;;  %v6632_v7 = vmul.f32 %v253_v40, %v6583_v53  ;;  %v271_v9 = vmul.f32 %v6607_v1, %v6607_v1  ;;  %v273_v10 = vmul.f32 %v6604_v62, %v6604_v62 }
  0xcc   :  { %5410 = vperm.xlu2 %5388, %v5409_v13   ;;  %5405 = vperm.xlu1 %5387, %v5404_v20   ;;  %v733_v0 = vperm.slane %v6619_v48, 0  ;;  %v740_v2 = vperm.slane %v6619_v48, 1  ;;  %v761_v3 = vperm.slane %v6619_v48, 4  ;;  %v768_v4 = vperm.slane %v6619_v48, 5 }
  0xcd   :  { %5415 = vperm.xlu0 %5386, %v5414_v21   ;;  %v5454_v5 = vpack.i.bf16 %v852_v63, %v845_v61  ;;  %v747_v12 = vperm.slane %v6619_v48, 2  ;;  %v754_v13 = vperm.slane %v6619_v48, 3  ;;  %v279_v29 = vsub.f32 0.0, %v6629_v6 }
  0xce   :  { %v5449_v8 = vpack.i.bf16 %v740_v2, %v733_v0  ;;  %v5479_v11 = vpack.i.bf16 %v768_v4, %v761_v3  ;;  %v1069_v51 = vperm.slane %v6632_v7, 0  ;;  %v1076_v14 = vperm.slane %v6632_v7, 1 }
  0xcf   :  { %v261_v15 = vmul.f32 3.0, %v6583_v53  ;;  %v275_v16 = vsub.f32 %v271_v9, %v273_v10  ;;  %v1097_v1 = vperm.slane %v6632_v7, 4  ;;  %v1104_v62 = vperm.slane %v6632_v7, 5 }
  0xd0   :  { %v5464_v17 = vpack.i.bf16 %v754_v13, %v747_v12  ;;  %v281_v18 = vmul.f32 %v279_v29, %v6629_v6  ;;  %v4985_v19 = vadd.f32 -1.2, %v6629_v6  ;;  %v5459_v20 = vpack.i.bf16 %v1076_v14, %v1069_v51 }
  0xd1   :  { %v263_v21 = vmul.f32 %v261_v15, %v6583_v53  ;;  %v5489_v23 = vpack.i.bf16 %v1104_v62, %v1097_v1  ;;  %v1083_v24 = vperm.slane %v6632_v7, 2  ;;  %v1090_v25 = vperm.slane %v6632_v7, 3 }
  0xd2   :  { %v283_v26 = vmul.f32 34.72222, %v281_v18  ;;  %v387_v27 = vsub.f32 0.0, %v4985_v19  ;;  %v873_v28 = vperm.slane %v6613_v36, 4  ;;  %v880_v31 = vperm.slane %v6613_v36, 5 }
  0xd3   :  { %v5474_v38 = vpack.i.bf16 %v1090_v25, %v1083_v24  ;;  %v4981_v39 = vadd.f32 -0.93333334, %v6629_v6 }
  0xd4   :  { %5420 = vperm.xlu2 %5388, %v5419_v22   ;;  %5430 = vperm.xlu1 %5387, %v5429_v34   ;;  %v6649_v22 = vmul.f32 1.9364917, %v275_v16  ;;  %v4967_v34 = vadd.f32 -1.0, %v263_v21  ;;  %v285_v40 = vmul.f32 1.442695, %v283_v26  ;;  %v389_v41 = vmul.f32 %v4985_v19, %v387_v27 }
  0xd5   :  { %5425 = vperm.xlu0 %5386, %v5424_v35   ;;  %v4983_v35 = vadd.f32 -1.0666667, %v6629_v6  ;;  %v5484_v42 = vpack.i.bf16 %v880_v31, %v873_v28  ;;  %v363_v61 = vsub.f32 0.0, %v4981_v39 }
  0xd6   :  { %v1209_v53 = vperm.slane %v6649_v22, 4  ;;  %v6659_v43 = vmul.f32 1.118034, %v4967_v34  ;;  %6213 = vpow2.f32 %v285_v40  ;;  %v391_v63 = vmul.f32 34.72222, %v389_v41 }
  0xd7   :  { %v375_v45 = vsub.f32 0.0, %v4983_v35  ;;  %v1181_v0 = vperm.slane %v6649_v22, 0  ;;  %v1188_v2 = vperm.slane %v6649_v22, 1  ;;  %v365_v9 = vmul.f32 %v4981_v39, %v363_v61 }
  0xd8   :  { %v957_v4 = vperm.slane %v6659_v43, 0  ;;  %v393_v10 = vmul.f32 1.442695, %v391_v63  ;;  %v985_v51 = vperm.slane %v6659_v43, 4  ;;  %v992_v14 = vperm.slane %v6659_v43, 5 }
  0xd9   :  { %v377_v3 = vmul.f32 %v4983_v35, %v375_v45  ;;  %v367_v15 = vmul.f32 34.72222, %v365_v9  ;;  %v971_v16 = vperm.slane %v6659_v43, 2  ;;  %v978_v1 = vperm.slane %v6659_v43, 3 }
  0xda   :  { %6215 = vpow2.f32 %v393_v10  ;;  %v5519_v19 = vpack.i.bf16 %v992_v14, %v985_v51  ;;  %v4971_v10 = vadd.f32 -0.26666668, %v6629_v6 }
  0xdb   :  { %v379_v12 = vmul.f32 34.72222, %v377_v3  ;;  %v369_v21 = vmul.f32 1.442695, %v367_v15  ;;  %v5514_v24 = vpack.i.bf16 %v978_v1, %v971_v16 }
  0xdc   :  { %5445 = vperm.xlu2 %5388, %v5444_v37   ;;  %5440 = vperm.xlu1 %5387, %v5439_v47   ;;  %v1216_v37 = vperm.slane %v6649_v22, 5  ;;  %v6667_v29 = vpop.eup %6213 }
  0xdd   :  { %5435 = vperm.xlu0 %5386, %v5434_v54   ;;  %v1195_v54 = vperm.slane %v6649_v22, 2  ;;  %v381_v62 = vmul.f32 1.442695, %v379_v12  ;;  %v1300_v18 = vperm.slane %v6667_v29, 1  ;;  %v1321_v27 = vperm.slane %v6667_v29, 4 }
  0xde   :  { %v5504_v47 = vpack.i.bf16 %v1216_v37, %v1209_v53  ;;  %v1328_v28 = vperm.slane %v6667_v29, 5  ;;  %v1307_v35 = vperm.slane %v6667_v29, 2  ;;  %v1314_v53 = vperm.slane %v6667_v29, 3 }
  0xdf   :  { %6217 = vpow2.f32 %v381_v62  ;;  %v303_v62 = vsub.f32 0.0, %v4971_v10 }
  0xe0   :  { %v6677_v26 = vpop.eup %6215  ;;  %6219 = vpow2.f32 %v369_v21  ;;  %v5534_v39 = vpack.i.bf16 %v1328_v28, %v1321_v27  ;;  %v4977_v28 = vadd.f32 -0.6666667, %v6629_v6 }
  0xe1   :  { %v2301_v37 = vperm.slane %v6677_v26, 0  ;;  %v2322_v12 = vperm.slane %v6677_v26, 3  ;;  %v305_v27 = vmul.f32 %v4971_v10, %v303_v62 }
  0xe4   :  { %5470 = vperm.xlu2 %5388, %v5469_v55   ;;  %5455 = vperm.xlu1 %5387, %v5454_v5   ;;  %v1202_v55 = vperm.slane %v6649_v22, 3  ;;  %v964_v5 = vperm.slane %v6659_v43, 1 }
  0xe5   :  { %5450 = vperm.xlu0 %5386, %v5449_v8   ;;  %v6685_v40 = vpop.eup %6217 }
  0xe6   :  { %v5499_v8 = vpack.i.bf16 %v1202_v55, %v1195_v54  ;;  %v5509_v13 = vpack.i.bf16 %v964_v5, %v957_v4  ;;  %v5529_v54 = vpack.i.bf16 %v1314_v53, %v1307_v35  ;;  %v6689_v55 = vpop.eup %6219  ;;  %v2189_v63 = vperm.slane %v6685_v40, 0 }
  0xe7   :  { %v2084_v9 = vperm.slane %v6689_v55, 1 }
  0xec   :  { %5480 = vperm.xlu2 %5388, %v5479_v11   ;;  %5465 = vperm.xlu1 %5387, %v5464_v17   ;;  %v5494_v11 = vpack.i.bf16 %v1188_v2, %v1181_v0  ;;  %v1293_v17 = vperm.slane %v6667_v29, 0  ;;  %v2196_v0 = vperm.slane %v6685_v40, 1 }
  0xed   :  { %5460 = vperm.xlu0 %5386, %v5459_v20   ;;  %v4969_v20 = vadd.f32 -0.13333334, %v6629_v6 }
  0xee   :  { %v5524_v25 = vpack.i.bf16 %v1300_v18, %v1293_v17  ;;  %v2203_v18 = vperm.slane %v6685_v40, 2 }
  0xef   :  { %v291_v31 = vsub.f32 0.0, %v4969_v20 }
  0xf1   :  { %v293_v41 = vmul.f32 %v4969_v20, %v291_v31  ;;  %v2217_v31 = vperm.slane %v6685_v40, 4 }
  0xf3   :  { %v295_v2 = vmul.f32 34.72222, %v293_v41  ;;  %v307_v41 = vmul.f32 34.72222, %v305_v27 }
  0xf4   :  { %5490 = vperm.xlu2 %5388, %v5489_v23   ;;  %5475 = vperm.xlu1 %5387, %v5474_v38   ;;  %v4973_v23 = vadd.f32 -0.4, %v6629_v6  ;;  %v2308_v38 = vperm.slane %v6677_v26, 1 }
  0xf5   :  { %5485 = vperm.xlu0 %5386, %v5484_v42   ;;  %v4975_v42 = vadd.f32 -0.53333336, %v6629_v6  ;;  %v297_v51 = vmul.f32 1.442695, %v295_v2 }
  0xf6   :  { %v315_v34 = vsub.f32 0.0, %v4973_v23  ;;  %v5549_v61 = vpack.i.bf16 %v2308_v38, %v2301_v37 }
  0xf7   :  { %v327_v3 = vsub.f32 0.0, %v4975_v42  ;;  %6221 = vpow2.f32 %v297_v51 }
  0xf8   :  { %v317_v45 = vmul.f32 %v4973_v23, %v315_v34  ;;  %v2224_v34 = vperm.slane %v6685_v40, 5 }
  0xf9   :  { %v329_v14 = vmul.f32 %v4975_v42, %v327_v3  ;;  %v339_v42 = vsub.f32 0.0, %v4977_v28 }
  0xfa   :  { %v319_v4 = vmul.f32 34.72222, %v317_v45  ;;  %v5574_v45 = vpack.i.bf16 %v2224_v34, %v2217_v31  ;;  %v2788_v31 = vld [vmem:[%s8332_s1] sm:$0xff] }
  0xfb   :  { %v331_v20 = vmul.f32 34.72222, %v329_v14  ;;  %v341_v2 = vmul.f32 %v4977_v28, %v339_v42  ;;  %v2329_v14 = vperm.slane %v6677_v26, 4  ;;  %v2231_v42 = vperm.slane %v6685_v40, 6 }
  0xfc   :  { %5505 = vperm.xlu2 %5388, %v5504_v47   ;;  %5500 = vperm.xlu1 %5387, %v5499_v8   ;;  %v4979_v47 = vadd.f32 -0.8, %v6629_v6  ;;  %v2077_v8 = vperm.slane %v6689_v55, 0  ;;  %v321_v15 = vmul.f32 1.442695, %v319_v4  ;;  %v2112_v6 = vperm.slane %v6689_v55, 5 }
  0xfd   :  { %5495 = vperm.xlu0 %5386, %v5494_v11   ;;  %v2315_v11 = vperm.slane %v6677_v26, 2  ;;  %v333_v53 = vmul.f32 1.442695, %v331_v20 }
  0xfe   :  { %v351_v5 = vsub.f32 0.0, %v4979_v47  ;;  %v5539_v1 = vpack.i.bf16 %v2084_v9, %v2077_v8  ;;  %6223 = vpow2.f32 %v321_v15  ;;  %v6721_v9 = vmul.f32 %v6565_v44, %v6551_v30 }
  0xff   :  { %v5564_v17 = vpack.i.bf16 %v2322_v12, %v2315_v11  ;;  %6225 = vpow2.f32 %v333_v53  ;;  %v343_v12 = vmul.f32 34.72222, %v341_v2  ;;  %v2336_v15 = vperm.slane %v6677_v26, 5  ;;  %v2789_v53 = vld [vmem:[%s8332_s1 + $0x8] sm:$0xff] }
 0x100   :  { %v353_v16 = vmul.f32 %v4979_v47, %v351_v5 }
 0x102   :  { %v355_v23 = vmul.f32 34.72222, %v353_v16  ;;  %v4982_v16 = vadd.f32 -0.93333334, %v6721_v9 }
 0x104   :  { %5510 = vperm.xlu2 %5388, %v5509_v13   ;;  %5520 = vperm.xlu1 %5387, %v5519_v19   ;;  %v5544_v13 = vpack.i.bf16 %v2196_v0, %v2189_v63  ;;  %v2210_v19 = vperm.slane %v6685_v40, 3  ;;  %v357_v37 = vmul.f32 1.442695, %v355_v23  ;;  %v309_v0 = vmul.f32 1.442695, %v307_v41 }
 0x105   :  { %5515 = vperm.xlu0 %5386, %v5514_v24   ;;  %v2091_v24 = vperm.slane %v6689_v55, 2  ;;  %v364_v23 = vsub.f32 0.0, %v4982_v16  ;;  %v4984_v41 = vadd.f32 -1.0666667, %v6721_v9 }
 0x106   :  { %v5559_v35 = vpack.i.bf16 %v2210_v19, %v2203_v18  ;;  %6227 = vpow2.f32 %v357_v37  ;;  %v5579_v19 = vpack.i.bf16 %v2336_v15, %v2329_v14  ;;  %v2790_v37 = vpack.c.bf16 %v2789_v53, %v2788_v31 }
 0x107   :  { %6229 = vpow2.f32 %v309_v0  ;;  %v2126_v0 = vperm.slane %v6689_v55, 7  ;;  %v2343_v53 = vperm.slane %v6677_v26, 6 }
 0x10c   :  { %5525 = vperm.xlu2 %5388, %v5524_v25   ;;  %5535 = vperm.xlu1 %5387, %v5534_v39   ;;  %v2098_v25 = vperm.slane %v6689_v55, 3  ;;  %v6707_v39 = vpop.eup %6221 }
 0x10d   :  { %5530 = vperm.xlu0 %5386, %v5529_v54   ;;  %v6709_v47 = vpop.eup %6223  ;;  %v2105_v54 = vperm.slane %v6689_v55, 4  ;;  %v1412_v63 = vperm.slane %v6707_v39, 1 }
 0x10e   :  { %v5554_v38 = vpack.i.bf16 %v2098_v25, %v2091_v24  ;;  %v1629_v4 = vperm.slane %v6709_v47, 0  ;;  %v1636_v5 = vperm.slane %v6709_v47, 1  ;;  %v6723_v11 = vpop.eup %6225  ;;  %v2791_v25 = vld [vmem:[%s8333_s2] sm:$0x3] }
 0x10f   :  { %v5569_v8 = vpack.i.bf16 %v2112_v6, %v2105_v54  ;;  %v6725_v51 = vpop.eup %6227  ;;  %v1741_v30 = vperm.slane %v6723_v11, 0  ;;  %v1748_v44 = vperm.slane %v6723_v11, 1  ;;  %v2801_v28 = vsel %vm2799_vm11, %v2791_v25, 0 }
 0x110   :  { %v1972_v18 = vperm.slane %v6725_v51, 1  ;;  %v6736_v20 = vpop.eup %6229  ;;  %2810 = vmatpush.bf16.msra.mxu0 %v2801_v28  ;;  %v6415_v54 = vmov 0.0   ;;  %v1650_v25 = vperm.slane %v6709_v47, 3  ;;  %v1769_v60 = vperm.slane %v6723_v11, 4 }
 0x111   :  { %v5599_v24 = vpack.i.bf16 %v1748_v44, %v1741_v30  ;;  %v1517_v34 = vperm.slane %v6736_v20, 0  ;;  %v6755_v6 = vsel %vm6556_vm3, 1.0, %v6415_v54  ;;  %v6764_v2 = vsel %vm6560_vm4, 1.0, %v6415_v54 }
 0x112   :  { %8392 = vst [vmem:[#allocation16_spill] sm:$0xff] %v6755_v6  ;;  %v3082_v14 = vperm.slane %v6755_v6, 2  ;;  %v3138_v33 = vperm.slane %v6764_v2, 2  ;;  %v3117_v44 = vperm.slane %v6755_v6, 7  ;;  %v3103_v28 = vperm.slane %v6755_v6, 5 }
 0x113   :  { %4987 = vmatmul.msk.bf16.vlgmr.msra.gmra.mxu0 %vm8363_vm12, %v2790_v37  ;;  %8394 = vst [vmem:[#allocation18_spill] sm:$0xff] %v6764_v2  ;;  %v3159_v31 = vperm.slane %v6764_v2, 5  ;;  %v2350_v37 = vperm.slane %v6677_v26, 7  ;;  %v3145_v54 = vperm.slane %v6764_v2, 3  ;;  %vm8362_vm3 = vcmask 56320  }
 0x114   :  { %5550 = vperm.xlu2 %5388, %v5549_v61   ;;  %5545 = vperm.xlu1 %5387, %v5544_v13   ;;  %v1405_v61 = vperm.slane %v6707_v39, 0  ;;  %v5594_v13 = vpack.i.bf16 %v1636_v5, %v1629_v4  ;;  %vm2548_vm4 = vcmask 72704  }
 0x115   :  { %5540 = vperm.xlu0 %5386, %v5539_v1   ;;  %v345_v1 = vmul.f32 1.442695, %v343_v12  ;;  %v3096_v12 = vperm.slane %v6755_v6, 4 }
 0x116   :  { %v5584_v10 = vpack.i.bf16 %v1412_v63, %v1405_v61  ;;  %v2119_v63 = vperm.slane %v6689_v55, 6  ;;  %v3152_v55 = vperm.slane %v6764_v2, 4 }
 0x117   :  { %6231 = vpow2.f32 %v345_v1  ;;  %v3173_v1 = vperm.slane %v6764_v2, 7 }
 0x11c   :  { %5565 = vperm.xlu2 %5388, %v5564_v17   ;;  %5560 = vperm.xlu1 %5387, %v5559_v35   ;;  %v1965_v17 = vperm.slane %v6725_v51, 0  ;;  %v1524_v35 = vperm.slane %v6736_v20, 1 }
 0x11d   :  { %5555 = vperm.xlu0 %5386, %v5554_v38   ;;  %v366_v38 = vmul.f32 %v4982_v16, %v364_v23  ;;  %v6766_v5 = vpop.eup %6231  ;;  %v6782_v23 = vpack.i.bf16 %v3138_v33, %v3082_v14  ;;  %v1426_v14 = vperm.slane %v6707_v39, 3 }
 0x11e   :  { %v6700_v21 = vpop.permute.xlu2 %5400  ;;  %v5609_v27 = vpack.i.bf16 %v1972_v18, %v1965_v17  ;;  %v5589_v4 = vpack.i.bf16 %v1524_v35, %v1517_v34  ;;  %v1853_v16 = vperm.slane %v6766_v5, 0  ;;  %v1860_v30 = vperm.slane %v6766_v5, 1 }
 0x11f   :  { %v368_v32 = vmul.f32 34.72222, %v366_v38  ;;  %v1643_v18 = vperm.slane %v6709_v47, 2  ;;  %8396 = vst [vmem:[#allocation20_spill] sm:$0xff] %v6782_v23  ;;  %v3089_v38 = vperm.slane %v6755_v6, 3  ;;  %v1230_v23 = vperm.slane %v6649_v22, 7 }
 0x124   :  { %5575 = vperm.xlu2 %5388, %v5574_v45   ;;  %5570 = vperm.xlu1 %5387, %v5569_v8   ;;  %v2238_v45 = vperm.slane %v6685_v40, 7  ;;  %v4986_v40 = vadd.f32 -1.2, %v6721_v9  ;;  %v376_v8 = vsub.f32 0.0, %v4984_v41 }
 0x125   :  { %5585 = vperm.xlu0 %5386, %v5584_v10  }
 0x126   :  { %v6715_v3 = vpop.permute.xlu2 %5410  ;;  %v5619_v10 = vpack.i.bf16 %v2238_v45, %v2231_v42  ;;  %v388_v17 = vsub.f32 0.0, %v4986_v40  ;;  %v378_v34 = vmul.f32 %v4984_v41, %v376_v8  ;;  %v5604_v42 = vpack.i.bf16 %v1860_v30, %v1853_v16 }
 0x127   :  { %v6796_v45 = vpack.i.bf16 %v3159_v31, %v3103_v28  ;;  %v6800_v41 = vpack.i.bf16 %v3145_v54, %v3089_v38  ;;  %v3166_v8 = vperm.slane %v6764_v2, 6  ;;  %v1979_v16 = vperm.slane %v6725_v51, 2 }
 0x128   :  { %v1986_v30 = vperm.slane %v6725_v51, 3  ;;  %v1755_v38 = vperm.slane %v6723_v11, 2 }
 0x129   :  { %8398 = vst [vmem:[#allocation22_spill] sm:$0xff] %v6796_v45 }
 0x12a   :  { %8399 = vst [vmem:[#allocation23_spill] sm:$0xff] %v6800_v41  ;;  %v5654_v31 = vpack.i.bf16 %v1986_v30, %v1979_v16  ;;  %v775_v41 = vperm.slane %v6619_v48, 6 }
 0x12c   :  { %5595 = vperm.xlu2 %5388, %v5594_v13   ;;  %5580 = vperm.xlu1 %5387, %v5579_v19   ;;  %v5614_v13 = vpack.i.bf16 %v2126_v0, %v2119_v63  ;;  %v6780_v19 = vpack.i.bf16 %v3152_v55, %v3096_v12  ;;  %v371_v63 = vmul.f32 1.442695, %v368_v32  ;;  %v390_v0 = vmul.f32 %v4986_v40, %v388_v17 }
 0x12d   :  { %5600 = vperm.xlu0 %5386, %v5599_v24   ;;  %v380_v12 = vmul.f32 34.72222, %v378_v34  ;;  %v1419_v55 = vperm.slane %v6707_v39, 2  ;;  %v1531_v17 = vperm.slane %v6736_v20, 2 }
 0x12e   :  { %v6732_v62 = vpop.permute.xlu2 %5420  ;;  %8395 = vst [vmem:[#allocation19_spill] sm:$0xff] %v6780_v19  ;;  %6233 = vpow2.f32 %v371_v63  ;;  %v392_v40 = vmul.f32 34.72222, %v390_v0 }
 0x130   :  { %v395_v28 = vmul.f32 1.442695, %v392_v40 }
 0x134   :  { %5610 = vperm.xlu2 %5388, %v5609_v27   ;;  %5590 = vperm.xlu1 %5387, %v5589_v4   ;;  %v6787_v27 = vpack.i.bf16 %v3173_v1, %v3117_v44  ;;  %v3110_v4 = vperm.slane %v6755_v6, 6  ;;  %v383_v44 = vmul.f32 1.442695, %v380_v12  ;;  %v6817_v34 = vpop.eup %6233  ;;  %v782_v6 = vperm.slane %v6619_v48, 7 }
 0x135   :  { %5620 = vperm.xlu0 %5386, %v5619_v10   ;;  %v5639_v10 = vpack.i.bf16 %v1650_v25, %v1643_v18  ;;  %v1538_v18 = vperm.slane %v6736_v20, 3  ;;  %v5629_v25 = vpack.i.bf16 %v1426_v14, %v1419_v55  ;;  %v2133_v63 = vperm.slane %v6817_v34, 0 }
 0x136   :  { %v6757_v61 = vpop.permute.xlu2 %5445  ;;  %v6773_v15 = vpop.permute.xlu1 %5395  ;;  %8397 = vst [vmem:[#allocation21_spill] sm:$0xff] %v6787_v27  ;;  %v6807_v33 = vpack.i.bf16 %v3166_v8, %v3110_v4  ;;  %6235 = vpow2.f32 %v383_v44  ;;  %v2140_v0 = vperm.slane %v6817_v34, 1  ;;  %v1874_v8 = vperm.slane %v6766_v5, 3 }
 0x137   :  { %8393 = vst [vmem:[#allocation17_spill] sm:$0xff] %v6757_v61  ;;  %v6784_v24 = vpop.permute.xlu0 %5390  ;;  %6237 = vpow2.f32 %v395_v28  ;;  %v999_v27 = vperm.slane %v6659_v43, 6  ;;  %v2154_v48 = vperm.slane %v6817_v34, 3  ;;  %v6881_v61 = vpack.i.bf16 %v782_v6, %v775_v41 }
 0x138   :  { %8400 = vst [vmem:[#allocation24_spill] sm:$0xff] %v6807_v33  ;;  %v5659_v55 = vpack.i.bf16 %v2140_v0, %v2133_v63  ;;  %v894_v33 = vperm.slane %v6613_v36, 7 }
 0x13c   :  { %5615 = vperm.xlu2 %5388, %v5614_v13   ;;  %5605 = vperm.xlu1 %5387, %v5604_v42   ;;  %v5624_v13 = vpack.i.bf16 %v2350_v37, %v2343_v53  ;;  %v5634_v53 = vpack.i.bf16 %v1538_v18, %v1531_v17  ;;  %v1762_v42 = vperm.slane %v6723_v11, 3 }
 0x13d   :  { %5640 = vperm.xlu0 %5386, %v5639_v10   ;;  %v1867_v10 = vperm.slane %v6766_v5, 2 }
 0x13e   :  { %v6791_v35 = vpop.permute.xlu2 %5470  ;;  %v6803_v26 = vpop.permute.xlu1 %5405  ;;  %v5644_v12 = vpack.i.bf16 %v1762_v42, %v1755_v38 }
 0x13f   :  { %v6809_v32 = vpop.permute.xlu0 %5415  ;;  %v5649_v40 = vpack.i.bf16 %v1874_v8, %v1867_v10  ;;  %v1657_v10 = vperm.slane %v6709_v47, 4  ;;  %v1664_v8 = vperm.slane %v6709_v47, 5 }
 0x144   :  { %5625 = vperm.xlu2 %5388, %v5624_v13   ;;  %5630 = vperm.xlu1 %5387, %v5629_v25   ;;  %v6831_v13 = vpop.eup %6235 }
 0x145   :  { %5655 = vperm.xlu0 %5386, %v5654_v31   ;;  %v6833_v14 = vpop.eup %6237  ;;  %v2245_v30 = vperm.slane %v6831_v13, 0  ;;  %v2252_v44 = vperm.slane %v6831_v13, 1  ;;  %v1433_v31 = vperm.slane %v6707_v39, 4 }
 0x146   :  { %v6813_v1 = vpop.permute.xlu2 %5480  ;;  %v6819_v37 = vpop.permute.xlu1 %5430  ;;  %v2357_v18 = vperm.slane %v6833_v14, 0  ;;  %v2364_v25 = vperm.slane %v6833_v14, 1  ;;  %v2378_v6 = vperm.slane %v6833_v14, 3 }
 0x147   :  { %v6823_v54 = vpop.permute.xlu0 %5425  ;;  %v5664_v38 = vpack.i.bf16 %v2252_v44, %v2245_v30  ;;  %v1776_v30 = vperm.slane %v6723_v11, 5 }
 0x148   :  { %v5669_v42 = vpack.i.bf16 %v2364_v25, %v2357_v18  ;;  %v1993_v18 = vperm.slane %v6725_v51, 4  ;;  %v5684_v25 = vpack.i.bf16 %v1664_v8, %v1657_v10  ;;  %v1006_v10 = vperm.slane %v6659_v43, 7 }
 0x149   :  { %v5689_v45 = vpack.i.bf16 %v1776_v30, %v1769_v60  ;;  %v1111_v8 = vperm.slane %v6632_v7, 6  ;;  %v2147_v60 = vperm.slane %v6817_v34, 2  ;;  %v1335_v30 = vperm.slane %v6667_v29, 6 }
 0x14a   :  { %v1342_v43 = vperm.slane %v6667_v29, 7  ;;  %v2266_v29 = vperm.slane %v6831_v13, 3 }
 0x14b   :  { %v6895_v41 = vpack.i.bf16 %v2154_v48, %v2147_v60  ;;  %v5407_v60 = vunpack.i.l.bf16 %v6803_v26 }
 0x14c   :  { %5635 = vperm.xlu2 %5388, %v5634_v53   ;;  %5645 = vperm.xlu1 %5387, %v5644_v12   ;;  %v1440_v53 = vperm.slane %v6707_v39, 5  ;;  %v1545_v12 = vperm.slane %v6736_v20, 4 }
 0x14d   :  { %5660 = vperm.xlu0 %5386, %v5659_v55   ;;  %v1552_v55 = vperm.slane %v6736_v20, 5 }
 0x14e   :  { %v6827_v4 = vpop.permute.xlu2 %5490  ;;  %v6835_v16 = vpop.permute.xlu1 %5440  ;;  %v5674_v63 = vpack.i.bf16 %v1440_v53, %v1433_v31  ;;  %v2000_v53 = vperm.slane %v6725_v51, 5 }
 0x14f   :  { %8401 = vst [vmem:[#allocation25_spill] sm:$0xff] %v6835_v16  ;;  %v6839_v17 = vpop.permute.xlu0 %5435  ;;  %v5679_v31 = vpack.i.bf16 %v1552_v55, %v1545_v12  ;;  %v1118_v12 = vperm.slane %v6632_v7, 7  ;;  %v1223_v55 = vperm.slane %v6649_v22, 6  ;;  %v5714_v22 = vpack.i.bf16 %v1006_v10, %v999_v27 }
 0x150   :  { %8402 = vst [vmem:[#allocation26_spill] sm:$0xff] %v6839_v17  ;;  %v5704_v19 = vpack.i.bf16 %v2000_v53, %v1993_v18  ;;  %v5392_v18 = vunpack.i.l.bf16 %v6784_v24  ;;  %v2259_v17 = vperm.slane %v6831_v13, 2  ;;  %v6897_v27 = vpack.i.bf16 %v1342_v43, %v1335_v30 }
 0x151   :  { %v6887_v53 = vpack.i.bf16 %v1118_v12, %v1111_v8  ;;  %v6889_v16 = vpack.i.bf16 %v1230_v23, %v1223_v55  ;;  %v5398_v23 = vunpack.i.h.bf16 %v6773_v15  ;;  %v5422_v10 = vunpack.i.l.bf16 %v6732_v62 }
 0x152   :  { %v2414_v12 = vsel %vm2413_vm13, 1.0, %v5392_v18  ;;  %v5408_v55 = vunpack.i.h.bf16 %v6803_v26  ;;  %v5729_v48 = vpack.i.bf16 %v2266_v29, %v2259_v17  ;;  %v5413_v43 = vunpack.i.h.bf16 %v6715_v3 }
 0x153   :  { %v2418_v29 = vsel %vm2413_vm13, 1.0, %v5422_v10  ;;  %v5418_v10 = vunpack.i.h.bf16 %v6809_v32 }
 0x154   :  { %5650 = vperm.xlu2 %5388, %v5649_v40   ;;  %5665 = vperm.xlu1 %5387, %v5664_v38   ;;  %v1881_v38 = vperm.slane %v6766_v5, 4 }
 0x155   :  { %5670 = vperm.xlu0 %5386, %v5669_v42   ;;  %v1888_v42 = vperm.slane %v6766_v5, 5 }
 0x156   :  { %v6843_v28 = vpop.permute.xlu2 %5505  ;;  %v6847_v0 = vpop.permute.xlu1 %5455 }
 0x157   :  { %v6853_v40 = vpop.permute.xlu0 %5450  ;;  %v5694_v7 = vpack.i.bf16 %v1888_v42, %v1881_v38  ;;  %v2371_v38 = vperm.slane %v6833_v14, 2  ;;  %v5397_v42 = vunpack.i.l.bf16 %v6773_v15  ;;  %v5403_v15 = vunpack.i.h.bf16 %v6700_v21 }
 0x159   :  { %v6911_v30 = vpack.i.bf16 %v2378_v6, %v2371_v38  ;;  %v2417_v6 = vsel %vm2413_vm13, 1.0, %v5408_v55 }
 0x15a   :  { %v2434_v55 = vsel %vm2430_vm14, %v2417_v6, %v5413_v43 }
 0x15c   :  { %5675 = vperm.xlu2 %5388, %v5674_v63   ;;  %v887_v63 = vperm.slane %v6613_v36, 6  ;;  %5685 = vperm.xlu1 %5387, %v5684_v25  }
 0x15d   :  { %5680 = vperm.xlu0 %5386, %v5679_v31   ;;  %v5393_v31 = vunpack.i.h.bf16 %v6784_v24  ;;  %v1671_v24 = vperm.slane %v6709_v47, 6 }
 0x15e   :  { %v6857_v44 = vpop.permute.xlu2 %5510  ;;  %v6873_v36 = vpop.permute.xlu1 %5465  ;;  %v5709_v2 = vpack.i.bf16 %v894_v33, %v887_v63  ;;  %v1678_v33 = vperm.slane %v6709_v47, 7  ;;  %v5423_v63 = vunpack.i.h.bf16 %v6732_v62 }
 0x15f   :  { %v6879_v25 = vpop.permute.xlu0 %5460  ;;  %v2415_v8 = vsel %vm2413_vm13, 1.0, %v5393_v31  ;;  %v5412_v31 = vunpack.i.l.bf16 %v6715_v3  ;;  %v2416_v3 = vsel %vm2413_vm13, 1.0, %v5407_v60  ;;  %v5467_v6 = vunpack.i.l.bf16 %v6873_v36 }
 0x160   :  { %v6915_v62 = vpack.i.bf16 %v1678_v33, %v1671_v24  ;;  %v2432_v26 = vsel %vm2430_vm14, %v2415_v8, %v5398_v23  ;;  %v2419_v17 = vsel %vm2413_vm13, 1.0, %v5423_v63  ;;  %v5428_v24 = vunpack.i.h.bf16 %v6823_v54 }
 0x161   :  { %v5427_v33 = vunpack.i.l.bf16 %v6823_v54  ;;  %v2449_v23 = vsel %vm2447_vm15, %v2432_v26, %v5403_v15  ;;  %v5452_v63 = vunpack.i.l.bf16 %v6853_v40  ;;  %v5417_v8 = vunpack.i.l.bf16 %v6809_v32 }
 0x162   :  { %v2433_v60 = vsel %vm2430_vm14, %v2416_v3, %v5412_v31  ;;  %v5483_v54 = vunpack.i.h.bf16 %v6813_v1  ;;  %v5433_v15 = vunpack.i.h.bf16 %v6819_v37  ;;  %v2436_v26 = vsel %vm2430_vm14, %v2419_v17, %v5428_v24 }
 0x163   :  { %v5457_v32 = vunpack.i.l.bf16 %v6847_v0  ;;  %v5512_v31 = vunpack.i.l.bf16 %v6857_v44  ;;  %v2450_v17 = vsel %vm2447_vm15, %v2433_v60, %v5417_v8  ;;  %v5493_v24 = vunpack.i.h.bf16 %v6827_v4 }
 0x164   :  { %5690 = vperm.xlu2 %5388, %v5689_v45   ;;  %5705 = vperm.xlu1 %5387, %v5704_v19   ;;  %v5402_v19 = vunpack.i.l.bf16 %v6700_v21  ;;  %v5473_v21 = vunpack.i.h.bf16 %v6791_v35 }
 0x165   :  { %5695 = vperm.xlu0 %5386, %v5694_v7   ;;  %v2431_v7 = vsel %vm2430_vm14, %v2414_v12, %v5397_v42  ;;  %v5453_v12 = vunpack.i.h.bf16 %v6853_v40 }
 0x166   :  { %v6885_v45 = vpop.permute.xlu2 %5525  ;;  %v6909_v47 = vpop.permute.xlu1 %5475  ;;  %v2448_v42 = vsel %vm2447_vm15, %v2431_v7, %v5402_v19  ;;  %v5432_v19 = vunpack.i.l.bf16 %v6819_v37  ;;  %v2435_v7 = vsel %vm2430_vm14, %v2418_v29, %v5427_v33  ;;  %v2451_v37 = vsel %vm2447_vm15, %v2434_v55, %v5418_v10 }
 0x167   :  { %v6921_v18 = vpop.permute.xlu0 %5485  ;;  %v2465_v43 = vsel %vm8363_vm12, %v2448_v42, %v5452_v63  ;;  %v5482_v29 = vunpack.i.l.bf16 %v6813_v1  ;;  %v5513_v33 = vunpack.i.h.bf16 %v6857_v44  ;;  %v5468_v1 = vunpack.i.h.bf16 %v6873_v36 }
 0x168   :  { %v2452_v63 = vsel %vm2447_vm15, %v2435_v7, %v5432_v19  ;;  %v2482_v10 = vsel %vm8364_vm0, %v2465_v43, %v5457_v32  ;;  %v5463_v44 = vunpack.i.h.bf16 %v6879_v25  ;;  %v5488_v55 = vunpack.i.h.bf16 %v6921_v18 }
 0x169   :  { %v2499_v8 = vsel %vm2498_vm1, %v2482_v10, %v5512_v31  ;;  %v5487_v60 = vunpack.i.l.bf16 %v6921_v18  ;;  %v2469_v36 = vsel %vm8363_vm12, %v2452_v63, %v5482_v29  ;;  %v2468_v7 = vsel %vm8363_vm12, %v2451_v37, %v5468_v1 }
 0x16a   :  { %v5528_v32 = vunpack.i.h.bf16 %v6885_v45  ;;  %v2485_v10 = vsel %vm8364_vm0, %v2468_v7, %v5473_v21  ;;  %v1447_v7 = vperm.slane %v6707_v39, 6 }
 0x16b   :  { %v2486_v37 = vsel %vm8364_vm0, %v2469_v36, %v5487_v60  ;;  %v1566_v36 = vperm.slane %v6736_v20, 7 }
 0x16c   :  { %5715 = vperm.xlu2 %5388, %v5714_v22   ;;  %v5472_v22 = vunpack.i.l.bf16 %v6791_v35  ;;  %5710 = vperm.xlu1 %5387, %v5709_v2   ;;  %v5458_v2 = vunpack.i.h.bf16 %v6847_v0  ;;  %v5492_v0 = vunpack.i.l.bf16 %v6827_v4  ;;  %v5462_v4 = vunpack.i.l.bf16 %v6879_v25 }
 0x16d   :  { %5700 = vperm.xlu0 %5386, %v6881_v61   ;;  %v2466_v61 = vsel %vm8363_vm12, %v2449_v23, %v5453_v12  ;;  %v2467_v12 = vsel %vm8363_vm12, %v2450_v17, %v5467_v6  ;;  %v5527_v25 = vunpack.i.l.bf16 %v6885_v45 }
 0x16e   :  { %v6927_v38 = vpop.permute.xlu2 %5550  ;;  %v6948_v40 = vpop.permute.xlu1 %5500  ;;  %v2483_v23 = vsel %vm8364_vm0, %v2466_v61, %v5458_v2  ;;  %v2516_v43 = vsel %vm8362_vm3, %v2499_v8, %v5462_v4  ;;  %v2484_v6 = vsel %vm8364_vm0, %v2467_v12, %v5472_v22  ;;  %v5478_v22 = vunpack.i.h.bf16 %v6909_v47 }
 0x16f   :  { %v5496_v3 = vpop.permute.xlu0 %5495  ;;  %v2500_v19 = vsel %vm2498_vm1, %v2483_v23, %v5513_v33  ;;  %v5503_v1 = vunpack.i.h.bf16 %v6948_v40  ;;  %v5502_v23 = vunpack.i.l.bf16 %v6948_v40 }
 0x170   :  { %v5498_v2 = vunpack.i.h.bf16 %v5496_v3 }
 0x174   :  { %5730 = vperm.xlu2 %5388, %v5729_v48   ;;  %v2453_v48 = vsel %vm2447_vm15, %v2436_v26, %v5433_v15  ;;  %v5497_v15 = vunpack.i.l.bf16 %v5496_v3  ;;  %5725 = vperm.xlu1 %5387, %v6895_v41  }
 0x175   :  { %v2470_v26 = vsel %vm8363_vm12, %v2453_v48, %v5483_v54  ;;  %5720 = vperm.xlu0 %5386, %v6887_v53   ;;  %v2517_v54 = vsel %vm8362_vm3, %v2500_v19, %v5463_v44 }
 0x176   :  { %v6961_v42 = vpop.permute.xlu2 %5565  ;;  %v5521_v18 = vpop.permute.xlu1 %5520  ;;  %v2487_v45 = vsel %vm8364_vm0, %v2470_v26, %v5488_v55  ;;  %v2532_v17 = vsel %vm8359_vm2, %v2516_v43, %v5497_v15  ;;  %v2533_v63 = vsel %vm8359_vm2, %v2517_v54, %v5498_v2  ;;  %v5507_v15 = vunpack.i.l.bf16 %v6843_v28 }
 0x177   :  { %v5523_v41 = vunpack.i.h.bf16 %v5521_v18  ;;  %v5522_v31 = vunpack.i.l.bf16 %v5521_v18  ;;  %v5516_v53 = vpop.permute.xlu0 %5515  ;;  %v7010_v35 = vsel %vm2548_vm4, %v2532_v17, %v5527_v25  ;;  %v7016_v60 = vsel %vm2548_vm4, %v2533_v63, %v5528_v32 }
 0x178   :  { %v5518_v3 = vunpack.i.h.bf16 %v5516_v53  ;;  %v5517_v33 = vunpack.i.l.bf16 %v5516_v53  ;;  %v1454_v25 = vperm.slane %v6707_v39, 7  ;;  %v2014_v18 = vperm.slane %v6725_v51, 7 }
 0x179   :  { %v2503_v29 = vsel %vm2498_vm1, %v2486_v37, %v5522_v31  ;;  %v2504_v61 = vsel %vm2498_vm1, %v2487_v45, %v5523_v41  ;;  %v1895_v53 = vperm.slane %v6766_v5, 6 }
 0x17a   :  { %v2501_v8 = vsel %vm2498_vm1, %v2484_v6, %v5517_v33  ;;  %v2502_v12 = vsel %vm2498_vm1, %v2485_v10, %v5518_v3  ;;  %v2520_v4 = vsel %vm8362_vm3, %v2503_v29, %v5492_v0  ;;  %v2521_v21 = vsel %vm8362_vm3, %v2504_v61, %v5493_v24 }
 0x17b   :  { %v5508_v0 = vunpack.i.h.bf16 %v6843_v28  ;;  %v2536_v32 = vsel %vm8359_vm2, %v2520_v4, %v5507_v15  ;;  %v5749_v37 = vpack.i.bf16 %v1454_v25, %v1447_v7  ;;  %v1902_v29 = vperm.slane %v6766_v5, 7 }
 0x17c   :  { %5745 = vperm.xlu2 %5388, %v6897_v27   ;;  %v5477_v27 = vunpack.i.l.bf16 %v6909_v47  ;;  %v2519_v47 = vsel %vm8362_vm3, %v2502_v12, %v5478_v22  ;;  %5740 = vperm.xlu1 %5387, %v6911_v30   ;;  %v1559_v30 = vperm.slane %v6736_v20, 6  ;;  %v262_v61 = vmul.f32 3.0, %v6574_v50 }
 0x17d   :  { %v2535_v40 = vsel %vm8359_vm2, %v2519_v47, %v5503_v1  ;;  %5735 = vperm.xlu0 %5386, %v6889_v16   ;;  %v2537_v2 = vsel %vm8359_vm2, %v2521_v21, %v5508_v0  ;;  %v2007_v16 = vperm.slane %v6725_v51, 6  ;;  %v7045_v51 = vmul.f32 1.7320508, %v6571_v49 }
 0x17e   :  { %v6993_v48 = vpop.permute.xlu2 %5575  ;;  %v2518_v44 = vsel %vm8362_vm3, %v2501_v8, %v5477_v27  ;;  %v5536_v19 = vpop.permute.xlu1 %5535  ;;  %v1783_v33 = vperm.slane %v6723_v11, 6  ;;  %v1790_v22 = vperm.slane %v6723_v11, 7  ;;  %v7061_v10 = vmul.f32 1.7320508, %v6568_v46 }
 0x17f   :  { %v2534_v55 = vsel %vm8359_vm2, %v2518_v44, %v5502_v23  ;;  %v5538_v26 = vunpack.i.h.bf16 %v5536_v19  ;;  %v5537_v24 = vunpack.i.l.bf16 %v5536_v19  ;;  %v5531_v28 = vpop.permute.xlu0 %5530  ;;  %v5774_v45 = vpack.i.bf16 %v2014_v18, %v2007_v16 }
 0x180   :  { %v5533_v41 = vunpack.i.h.bf16 %v5531_v28  ;;  %v5532_v31 = vunpack.i.l.bf16 %v5531_v28  ;;  %v565_v49 = vperm.slane %v7045_v51, 0  ;;  %v572_v63 = vperm.slane %v7045_v51, 1 }
 0x181   :  { %v7031_v43 = vsel %vm2548_vm4, %v2537_v2, %v5538_v26  ;;  %v7034_v20 = vsel %vm2548_vm4, %v2536_v32, %v5537_v24  ;;  %v280_v5 = vsub.f32 0.0, %v6721_v9  ;;  %v4972_v1 = vadd.f32 -0.26666668, %v6721_v9 }
 0x182   :  { %v7039_v6 = vsel %vm2548_vm4, %v2535_v40, %v5533_v41  ;;  %v7042_v54 = vsel %vm2548_vm4, %v2534_v55, %v5532_v31  ;;  %v5769_v23 = vpack.i.bf16 %v1902_v29, %v1895_v53  ;;  %v7066_v8 = vmul.f32 1.7320508, %v6574_v50 }
 0x183   :  { %v264_v12 = vmul.f32 %v262_v61, %v6574_v50  ;;  %v5764_v11 = vpack.i.bf16 %v1790_v22, %v1783_v33  ;;  %v5784_v4 = vpack.i.bf16 %v572_v63, %v565_v49  ;;  %v282_v44 = vmul.f32 %v280_v5, %v6721_v9 }
 0x184   :  { %5760 = vperm.xlu2 %5388, %v6915_v62   ;;  %v5754_v62 = vpack.i.bf16 %v1566_v36, %v1559_v30  ;;  %v304_v47 = vsub.f32 0.0, %v4972_v1  ;;  %v453_v46 = vperm.slane %v7061_v10, 0  ;;  %v460_v55 = vperm.slane %v7061_v10, 1 }
 0x185   :  { %5750 = vperm.xlu0 %5386, %v5749_v37   ;;  %v4970_v40 = vadd.f32 -0.13333334, %v6721_v9  ;;  %v4974_v0 = vadd.f32 -0.4, %v6721_v9  ;;  %v4978_v15 = vadd.f32 -0.6666667, %v6721_v9 }
 0x186   :  { %v7036_v39 = vpop.permute.xlu2 %5595  ;;  %5755 = vperm.xlu1 %5387, %v5754_v62   ;;  %v7047_v17 = vpop.permute.xlu1 %5545  ;;  %v4968_v50 = vadd.f32 -1.0, %v264_v12  ;;  %v677_v30 = vperm.slane %v7066_v8, 0  ;;  %v684_v36 = vperm.slane %v7066_v8, 1  ;;  %v901_v24 = vperm.slane %v6595_v58, 0 }
 0x187   :  { %v7052_v3 = vpop.permute.xlu0 %5540  ;;  %v908_v7 = vperm.slane %v6595_v58, 1  ;;  %v284_v25 = vmul.f32 34.72222, %v282_v44  ;;  %v306_v32 = vmul.f32 %v4972_v1, %v304_v47  ;;  %v5779_v2 = vpack.i.bf16 %v460_v55, %v453_v46 }
 0x188   :  { %v292_v28 = vsub.f32 0.0, %v4970_v40  ;;  %v316_v16 = vsub.f32 0.0, %v4974_v0  ;;  %v4976_v18 = vadd.f32 -0.53333336, %v6721_v9  ;;  %v340_v41 = vsub.f32 0.0, %v4978_v15 }
 0x189   :  { %v7086_v31 = vmul.f32 1.118034, %v4968_v50  ;;  %v4980_v62 = vadd.f32 -0.8, %v6721_v9  ;;  %v5789_v37 = vpack.i.bf16 %v684_v36, %v677_v30  ;;  %v287_v53 = vmul.f32 1.442695, %v284_v25 }
 0x18a   :  { %v308_v29 = vmul.f32 34.72222, %v306_v32  ;;  %v789_v33 = vperm.slane %v6592_v57, 0  ;;  %v796_v22 = vperm.slane %v6592_v57, 1  ;;  %v294_v49 = vmul.f32 %v4970_v40, %v292_v28 }
 0x18b   :  { %v318_v63 = vmul.f32 %v4974_v0, %v316_v16  ;;  %v328_v5 = vsub.f32 0.0, %v4976_v18  ;;  %v342_v1 = vmul.f32 %v4978_v15, %v340_v41  ;;  %v1013_v12 = vperm.slane %v7086_v31, 0 }
 0x18c   :  { %5775 = vperm.xlu2 %5388, %v5774_v45   ;;  %v5799_v45 = vpack.i.bf16 %v908_v7, %v901_v24  ;;  %v2161_v46 = vperm.slane %v6817_v34, 4  ;;  %v2168_v55 = vperm.slane %v6817_v34, 5  ;;  %v311_v40 = vmul.f32 1.442695, %v308_v29 }
 0x18d   :  { %5765 = vperm.xlu0 %5386, %v5764_v11   ;;  %v1020_v11 = vperm.slane %v7086_v31, 1  ;;  %v5794_v0 = vpack.i.bf16 %v796_v22, %v789_v33  ;;  %v296_v50 = vmul.f32 34.72222, %v294_v49  ;;  %v320_v36 = vmul.f32 34.72222, %v318_v63 }
 0x18e   :  { %v7056_v27 = vpop.permute.xlu2 %5610  ;;  %5770 = vperm.xlu1 %5387, %v5769_v23   ;;  %v7070_v21 = vpop.permute.xlu1 %5560  ;;  %v352_v23 = vsub.f32 0.0, %v4980_v62  ;;  %v330_v24 = vmul.f32 %v4976_v18, %v328_v5  ;;  %6239 = vpow2.f32 %v287_v53  ;;  %v344_v25 = vmul.f32 34.72222, %v342_v1 }
 0x18f   :  { %v7077_v19 = vpop.permute.xlu0 %5555  ;;  %v5804_v7 = vpack.i.bf16 %v1020_v11, %v1013_v12  ;;  %6241 = vpow2.f32 %v311_v40  ;;  %v1125_v16 = vperm.slane %v6598_v59, 0  ;;  %v1132_v41 = vperm.slane %v6598_v59, 1 }
 0x190   :  { %v354_v32 = vmul.f32 %v4980_v62, %v352_v23  ;;  %v299_v18 = vmul.f32 1.442695, %v296_v50  ;;  %v2273_v62 = vperm.slane %v6831_v13, 4  ;;  %v2280_v29 = vperm.slane %v6831_v13, 5 }
 0x191   :  { %v347_v33 = vmul.f32 1.442695, %v344_v25  ;;  %v2385_v63 = vperm.slane %v6833_v14, 4  ;;  %v2392_v5 = vperm.slane %v6833_v14, 5 }
 0x192   :  { %v356_v22 = vmul.f32 34.72222, %v354_v32  ;;  %6243 = vpow2.f32 %v299_v18 }
 0x194   :  { %5785 = vperm.xlu2 %5388, %v5784_v4   ;;  %v359_v12 = vmul.f32 1.442695, %v356_v22 }
 0x195   :  { %5790 = vperm.xlu0 %5386, %v5789_v37   ;;  %v323_v37 = vmul.f32 1.442695, %v320_v36 }
 0x196   :  { %v7081_v26 = vpop.permute.xlu2 %5615  ;;  %5780 = vperm.xlu1 %5387, %v5779_v2   ;;  %v7089_v61 = vpop.permute.xlu1 %5570  ;;  %v5814_v2 = vpack.i.bf16 %v2168_v55, %v2161_v46 }
 0x197   :  { %v5586_v9 = vpop.permute.xlu0 %5585  ;;  %6245 = vpow2.f32 %v323_v37 }
 0x198   :  { %v5588_v4 = vunpack.i.h.bf16 %v5586_v9  ;;  %v5587_v44 = vunpack.i.l.bf16 %v5586_v9  ;;  %v5819_v9 = vpack.i.bf16 %v2280_v29, %v2273_v62  ;;  %6247 = vpow2.f32 %v347_v33 }
 0x19a   :  { %v2566_v15 = vsel %vm2565_vm5, %v7010_v35, %v5587_v44  ;;  %v2567_v30 = vsel %vm2565_vm5, %v7016_v60, %v5588_v4  ;;  %v8403_v35 = vsub.f32 %v6580_v52, %v6589_v56  ;;  %v5809_v52 = vpack.i.bf16 %v1132_v41, %v1125_v16  ;;  %v7118_v56 = vpop.eup %6239 }
 0x19b   :  { %v7120_v1 = vpop.eup %6241  ;;  %v5829_v4 = vpack.i.bf16 %v2392_v5, %v2385_v63  ;;  %v1349_v55 = vperm.slane %v7118_v56, 0  ;;  %v1356_v40 = vperm.slane %v7118_v56, 1 }
 0x19c   :  { %5800 = vperm.xlu2 %5388, %v5799_v45   ;;  %v7110_v60 = vmul.f32 1.9364917, %v8403_v35  ;;  %v332_v45 = vmul.f32 34.72222, %v330_v24  ;;  %v1573_v36 = vperm.slane %v7120_v1, 0  ;;  %v5598_v24 = vunpack.i.h.bf16 %v7036_v39 }
 0x19d   :  { %5805 = vperm.xlu0 %5386, %v5804_v7   ;;  %v5597_v7 = vunpack.i.l.bf16 %v7036_v39  ;;  %v1580_v32 = vperm.slane %v7120_v1, 1 }
 0x19e   :  { %v7095_v47 = vpop.permute.xlu2 %5625  ;;  %5795 = vperm.xlu1 %5387, %v5794_v0   ;;  %v7103_v28 = vpop.permute.xlu1 %5580  ;;  %v335_v23 = vmul.f32 1.442695, %v332_v45  ;;  %v1237_v11 = vperm.slane %v7110_v60, 0  ;;  %v1244_v46 = vperm.slane %v7110_v60, 1  ;;  %v5305_v45 = vld [vmem:[#allocation2 + $0x18] sm:$0xff] }
 0x19f   :  { %v5601_v53 = vpop.permute.xlu0 %5600  ;;  %2858 = vmatpush.bf16.msra.mxu1 %v5305_v45  ;;  %v5844_v5 = vpack.i.bf16 %v1580_v32, %v1573_v36 }
 0x1a0   :  { %v5603_v16 = vunpack.i.h.bf16 %v5601_v53  ;;  %v5602_v41 = vunpack.i.l.bf16 %v5601_v53  ;;  %v5824_v33 = vpack.i.bf16 %v1244_v46, %v1237_v11  ;;  %6249 = vpow2.f32 %v335_v23 }
 0x1a1   :  { %6251 = vpow2.f32 %v359_v12 }
 0x1a4   :  { %5815 = vperm.xlu2 %5388, %v5814_v2   ;;  %v7132_v2 = vpop.eup %6243 }
 0x1a5   :  { %5820 = vperm.xlu0 %5386, %v5819_v9   ;;  %v7138_v62 = vpop.eup %6245  ;;  %v1461_v9 = vperm.slane %v7132_v2, 0  ;;  %v1468_v11 = vperm.slane %v7132_v2, 1 }
 0x1a6   :  { %v7114_v49 = vpop.permute.xlu2 %5635  ;;  %5810 = vperm.xlu1 %5387, %v5809_v52   ;;  %v5591_v44 = vpop.permute.xlu1 %5590  ;;  %v1692_v23 = vperm.slane %v7138_v62, 1 }
 0x1a7   :  { %v5593_v0 = vunpack.i.h.bf16 %v5591_v44  ;;  %v5592_v50 = vunpack.i.l.bf16 %v5591_v44  ;;  %v7129_v25 = vpop.permute.xlu0 %5620  ;;  %v7142_v22 = vpop.eup %6247  ;;  %v5839_v32 = vpack.i.bf16 %v1468_v11, %v1461_v9 }
 0x1a8   :  { %v1909_v36 = vperm.slane %v7142_v22, 0 }
 0x1a9   :  { %v2583_v35 = vsel %vm2582_vm6, %v2566_v15, %v5592_v50  ;;  %v2584_v18 = vsel %vm2582_vm6, %v2567_v30, %v5593_v0  ;;  %v5304_v15 = vld [vmem:[#allocation2 + $0x10] sm:$0xff]  ;;  %v5834_v30 = vpack.i.bf16 %v1356_v40, %v1349_v55  ;;  %v1685_v50 = vperm.slane %v7138_v62, 0 }
 0x1aa   :  { %v2600_v39 = vsel %vm2599_vm7, %v2583_v35, %v5597_v7  ;;  %v2601_v29 = vsel %vm2599_vm7, %v2584_v18, %v5598_v24  ;;  %2859 = vmatpush.bf16.msra.mxu1 %v5304_v15  ;;  %v1916_v24 = vperm.slane %v7142_v22, 1  ;;  %v7158_v7 = vpop.eup %6249  ;;  %v6195_v18 = vld [vmem:[%s8334_s3] ss:$0 sm:$0xff]  ;;  %s6416_s3 = smov 16  }
 0x1ab   :  { %v2617_v63 = vsel %vm2616_vm8, %v2600_v39, %v5602_v41  ;;  %v2618_v53 = vsel %vm2616_vm8, %v2601_v29, %v5603_v16  ;;  %v7160_v35 = vpop.eup %6251  ;;  %v5849_v45 = vpack.i.bf16 %v1692_v23, %v1685_v50  ;;  %v1797_v15 = vperm.slane %v7158_v7, 0 }
 0x1ac   :  { %5830 = vperm.xlu2 %5388, %v5829_v4   ;;  %v2812_v4 = vpop.f32.mrf.mxu0  ;;  %v5638_v50 = vunpack.i.h.bf16 %v7114_v49  ;;  %v5637_v23 = vunpack.i.l.bf16 %v7114_v49 }
 0x1ad   :  { %5835 = vperm.xlu0 %5386, %v5834_v30   ;;  %v1804_v30 = vperm.slane %v7158_v7, 1 }
 0x1ae   :  { %v7136_v37 = vpop.permute.xlu2 %5650  ;;  %5825 = vperm.xlu1 %5387, %v5824_v33   ;;  %v5606_v52 = vpop.permute.xlu1 %5605  ;;  %v5303_v33 = vld [vmem:[#allocation2 + $0x8] sm:$0xff] }
 0x1af   :  { %v5608_v44 = vunpack.i.h.bf16 %v5606_v52  ;;  %v5607_v46 = vunpack.i.l.bf16 %v5606_v52  ;;  %v5641_v0 = vpop.permute.xlu0 %5640  ;;  %v2028_v52 = vperm.slane %v7160_v35, 1  ;;  %2860 = vmatpush.bf16.msra.mxu1 %v5303_v33  ;;  %v5854_v33 = vpack.i.bf16 %v1804_v30, %v1797_v15 }
 0x1b0   :  { %v586_v15 = vperm.slane %v7045_v51, 3 }
 0x1b1   :  { %v7151_v12 = vsel %vm8360_vm9, %v2617_v63, %v5607_v46  ;;  %v7154_v55 = vsel %vm8360_vm9, %v2618_v53, %v5608_v44  ;;  %v5859_v63 = vpack.i.bf16 %v1916_v24, %v1909_v36  ;;  %v467_v36 = vperm.slane %v7061_v10, 2 }
 0x1b2   :  { %v474_v24 = vperm.slane %v7061_v10, 3 }
 0x1b4   :  { %5845 = vperm.xlu2 %5388, %v5844_v5   ;;  %v2021_v5 = vperm.slane %v7160_v35, 0  ;;  %v2814_v9 = vpop.f32.mrf.mxu0  ;;  %v5869_v30 = vpack.i.bf16 %v474_v24, %v467_v36  ;;  %v5548_v36 = vunpack.i.h.bf16 %v7047_v17  ;;  %v5547_v24 = vunpack.i.l.bf16 %v7047_v17 }
 0x1b5   :  { %5850 = vperm.xlu0 %5386, %v5849_v45   ;;  %v7179_v46 = vadd.f32 %v6195_v18, %v2814_v9  ;;  %v698_v9 = vperm.slane %v7066_v8, 3 }
 0x1b6   :  { %v5676_v40 = vpop.permute.xlu2 %5675  ;;  %5840 = vperm.xlu1 %5387, %v5839_v32   ;;  %v5631_v53 = vpop.permute.xlu1 %5630  ;;  %v5643_v32 = vunpack.i.h.bf16 %v5641_v0 }
 0x1b7   :  { %v5678_v16 = vunpack.i.h.bf16 %v5676_v40  ;;  %v5677_v41 = vunpack.i.l.bf16 %v5676_v40  ;;  %v5633_v11 = vunpack.i.h.bf16 %v5631_v53  ;;  %v5632_v44 = vunpack.i.l.bf16 %v5631_v53  ;;  %8405 = vst [vmem:[#allocation28_spill] sm:$0xff] %v7179_v46  ;;  %v7183_v40 = vpop.permute.xlu0 %5655 }
 0x1b9   :  { %v7167_v39 = vsel %vm2565_vm5, %v7031_v43, %v5678_v16  ;;  %v7171_v29 = vsel %vm2565_vm5, %v7034_v20, %v5677_v41  ;;  %v5302_v43 = vld [vmem:[#allocation2] sm:$0xff]  ;;  %v7177_v20 = vadd.f32 %v6195_v18, %v2812_v4  ;;  %v5642_v16 = vunpack.i.l.bf16 %v5641_v0 }
 0x1ba   :  { %v2568_v41 = vsel %vm2565_vm5, %v7042_v54, %v5632_v44  ;;  %v2569_v4 = vsel %vm2565_vm5, %v7039_v6, %v5633_v11  ;;  %2861 = vmatpush.bf16.msra.mxu1 %v5302_v43  ;;  %v5864_v54 = vpack.i.bf16 %v2028_v52, %v2021_v5  ;;  %v691_v6 = vperm.slane %v7066_v8, 2 }
 0x1bb   :  { %8404 = vst [vmem:[#allocation27_spill] sm:$0xff] %v7177_v20  ;;  %v2585_v45 = vsel %vm2582_vm6, %v2568_v41, %v5637_v23  ;;  %v2586_v49 = vsel %vm2582_vm6, %v2569_v4, %v5638_v50  ;;  %v7199_v0 = vpack.c.bf16 %v7179_v46, %v7177_v20  ;;  %v579_v11 = vperm.slane %v7045_v51, 2 }
 0x1bc   :  { %5860 = vperm.xlu2 %5388, %v5859_v63   ;;  %v2602_v63 = vsel %vm2599_vm7, %v2585_v45, %v5642_v16  ;;  %v2603_v53 = vsel %vm2599_vm7, %v2586_v49, %v5643_v32  ;;  %v5563_v43 = vunpack.i.h.bf16 %v7070_v21  ;;  %v5562_v44 = vunpack.i.l.bf16 %v7070_v21 }
 0x1bd   :  { %8406 = vst [vmem:[#allocation29_spill] sm:$0xff] %v7199_v0  ;;  %5004 = vmatmul.msk.bf16.vlgmr.msra.gmra.mxu1 %vm8361_vm10, %v7199_v0  ;;  %5865 = vperm.xlu0 %5386, %v5864_v54   ;;  %v803_v5 = vperm.slane %v6592_v57, 2  ;;  %v810_v52 = vperm.slane %v6592_v57, 3  ;;  %v5558_v23 = vunpack.i.h.bf16 %v7077_v19  ;;  %v5557_v32 = vunpack.i.l.bf16 %v7077_v19 }
 0x1be   :  { %v7191_v18 = vpop.permute.xlu2 %5690  ;;  %5855 = vperm.xlu1 %5387, %v5854_v33   ;;  %v5646_v50 = vpop.permute.xlu1 %5645  ;;  %v5653_v4 = vunpack.i.h.bf16 %v7136_v37  ;;  %v5652_v21 = vunpack.i.l.bf16 %v7136_v37  ;;  %v5543_v49 = vunpack.i.h.bf16 %v7052_v3  ;;  %v5542_v33 = vunpack.i.l.bf16 %v7052_v3 }
 0x1bf   :  { %v5648_v16 = vunpack.i.h.bf16 %v5646_v50  ;;  %v5647_v41 = vunpack.i.l.bf16 %v5646_v50  ;;  %v5661_v45 = vpop.permute.xlu0 %5660  ;;  %v5879_v50 = vpack.i.bf16 %v698_v9, %v691_v6  ;;  %v2670_v37 = vsel %vm2413_vm13, %v5558_v23, %v5563_v43 }
 0x1c0   :  { %v2669_v20 = vsel %vm2413_vm13, %v5557_v32, %v5562_v44  ;;  %v5572_v0 = vunpack.i.l.bf16 %v7089_v61  ;;  %v5874_v3 = vpack.i.bf16 %v586_v15, %v579_v11  ;;  %v2668_v6 = vsel %vm2413_vm13, %v5543_v49, %v5548_v36 }
 0x1c1   :  { %v2619_v54 = vsel %vm2616_vm8, %v2602_v63, %v5647_v41  ;;  %v2620_v19 = vsel %vm2616_vm8, %v2603_v53, %v5648_v16  ;;  %v5568_v63 = vunpack.i.h.bf16 %v6961_v42  ;;  %v5567_v53 = vunpack.i.l.bf16 %v6961_v42 }
 0x1c2   :  { %v7227_v17 = vsel %vm8360_vm9, %v2620_v19, %v5653_v4  ;;  %v5573_v16 = vunpack.i.h.bf16 %v7089_v61  ;;  %v5884_v41 = vpack.i.bf16 %v810_v52, %v803_v5  ;;  %v5577_v4 = vunpack.i.l.bf16 %v6993_v48 }
 0x1c3   :  { %v2667_v9 = vsel %vm2413_vm13, %v5542_v33, %v5547_v24  ;;  %v5583_v43 = vunpack.i.h.bf16 %v7103_v28  ;;  %v5582_v11 = vunpack.i.l.bf16 %v7103_v28  ;;  %v2685_v42 = vsel %vm2430_vm14, %v2669_v20, %v5567_v53 }
 0x1c4   :  { %5870 = vperm.xlu2 %5388, %v5869_v30   ;;  %v7224_v30 = vsel %vm8360_vm9, %v2619_v54, %v5652_v21  ;;  %v5578_v21 = vunpack.i.h.bf16 %v6993_v48  ;;  %v2686_v61 = vsel %vm2430_vm14, %v2670_v37, %v5568_v63  ;;  %v5553_v44 = vunpack.i.h.bf16 %v6927_v38 }
 0x1c5   :  { %5875 = vperm.xlu0 %5386, %v5874_v3   ;;  %v5552_v5 = vunpack.i.l.bf16 %v6927_v38  ;;  %v2671_v48 = vsel %vm2413_vm13, %v5572_v0, %v5577_v4  ;;  %v5623_v23 = vunpack.i.h.bf16 %v7129_v25  ;;  %v5622_v24 = vunpack.i.l.bf16 %v7129_v25 }
 0x1c6   :  { %v7221_v46 = vpop.permute.xlu2 %5715  ;;  %5880 = vperm.xlu1 %5387, %v5879_v50   ;;  %v5666_v15 = vpop.permute.xlu1 %5665  ;;  %v2672_v52 = vsel %vm2413_vm13, %v5573_v16, %v5578_v21  ;;  %v5894_v49 = vpack.i.bf16 %v2686_v61, %v2685_v42  ;;  %v2684_v33 = vsel %vm2430_vm14, %v2668_v6, %v5553_v44  ;;  %v5663_v38 = vunpack.i.h.bf16 %v5661_v45 }
 0x1c7   :  { %v5668_v32 = vunpack.i.h.bf16 %v5666_v15  ;;  %v5667_v36 = vunpack.i.l.bf16 %v5666_v15  ;;  %v5671_v28 = vpop.permute.xlu0 %5670  ;;  %v2683_v20 = vsel %vm2430_vm14, %v2667_v9, %v5552_v5  ;;  %v5662_v19 = vunpack.i.l.bf16 %v5661_v45 }
 0x1c8   :  { %v2687_v0 = vsel %vm2430_vm14, %v2671_v48, %v5582_v11  ;;  %v2688_v50 = vsel %vm2430_vm14, %v2672_v52, %v5583_v43  ;;  %v5618_v37 = vunpack.i.h.bf16 %v7081_v26  ;;  %v5673_v3 = vunpack.i.h.bf16 %v5671_v28 }
 0x1c9   :  { %v5672_v63 = vunpack.i.l.bf16 %v5671_v28  ;;  %v5617_v53 = vunpack.i.l.bf16 %v7081_v26  ;;  %v2675_v25 = vsel %vm2413_vm13, %v5662_v19, %v5667_v36  ;;  %v2676_v16 = vsel %vm2413_vm13, %v5663_v38, %v5668_v32 }
 0x1ca   :  { %v5899_v21 = vpack.i.bf16 %v2688_v50, %v2687_v0  ;;  %v2674_v4 = vsel %vm2413_vm13, %v5618_v37, %v5623_v23  ;;  %v5628_v9 = vunpack.i.h.bf16 %v7095_v47  ;;  %v5627_v26 = vunpack.i.l.bf16 %v7095_v47 }
 0x1cb   :  { %v2673_v45 = vsel %vm2413_vm13, %v5617_v53, %v5622_v24  ;;  %v2691_v43 = vsel %vm2430_vm14, %v2675_v25, %v5672_v63  ;;  %v2692_v11 = vsel %vm2430_vm14, %v2676_v16, %v5673_v3  ;;  %v1139_v44 = vperm.slane %v6598_v59, 2  ;;  %v8407_v3 = vld [vmem:[#allocation26_spill] sm:$0xff] }
 0x1cc   :  { %5885 = vperm.xlu2 %5388, %v5884_v41   ;;  %v5889_v41 = vpack.i.bf16 %v2684_v33, %v2683_v20  ;;  %v1146_v5 = vperm.slane %v6598_v59, 3  ;;  %v2689_v23 = vsel %vm2430_vm14, %v2673_v45, %v5627_v26  ;;  %v2690_v32 = vsel %vm2430_vm14, %v2674_v4, %v5628_v9 }
 0x1cd   :  { %v5914_v36 = vpack.i.bf16 %v2692_v11, %v2691_v43  ;;  %v5693_v28 = vunpack.i.h.bf16 %v7191_v18  ;;  %v5692_v24 = vunpack.i.l.bf16 %v7191_v18  ;;  %v5904_v19 = vpack.i.bf16 %v2690_v32, %v2689_v23  ;;  %v8408_v43 = vld [vmem:[#allocation25_spill] sm:$0xff] }
 0x1ce   :  { %v7251_v54 = vpop.permute.xlu2 %5730  ;;  %5895 = vrot.lane.b32.xlu1 %v5894_v49, %s6416_s3  ;;  %5890 = vrot.lane.b32.xlu0 %v5889_v41, %s6416_s3  ;;  %v5686_v6 = vpop.permute.xlu1 %5685  ;;  %v5924_v37 = vpack.i.bf16 %v1146_v5, %v1139_v44  ;;  %v5438_v63 = vunpack.i.h.bf16 %v8407_v3  ;;  %v5437_v53 = vunpack.i.l.bf16 %v8407_v3  ;;  %v915_v16 = vperm.slane %v6595_v58, 2 }
 0x1cf   :  { %v5688_v15 = vunpack.i.h.bf16 %v5686_v6  ;;  %v5687_v42 = vunpack.i.l.bf16 %v5686_v6  ;;  %v5681_v61 = vpop.permute.xlu0 %5680  ;;  %v922_v41 = vperm.slane %v6595_v58, 3  ;;  %v1251_v6 = vperm.slane %v7110_v60, 2 }
 0x1d0   :  { %v5683_v48 = vunpack.i.h.bf16 %v5681_v61  ;;  %v5682_v52 = vunpack.i.l.bf16 %v5681_v61  ;;  %v1258_v9 = vperm.slane %v7110_v60, 3  ;;  %v5443_v11 = vunpack.i.h.bf16 %v8408_v43 }
 0x1d1   :  { %v2421_v44 = vsel %vm2413_vm13, 1.0, %v5438_v63  ;;  %v2420_v5 = vsel %vm2413_vm13, 1.0, %v5437_v53  ;;  %v2287_v32 = vperm.slane %v6831_v13, 6  ;;  %v1482_v63 = vperm.slane %v7132_v2, 3 }
 0x1d2   :  { %v2587_v49 = vsel %vm2582_vm6, %v7171_v29, %v5682_v52  ;;  %v2588_v20 = vsel %vm2582_vm6, %v7167_v39, %v5683_v48  ;;  %v1027_v29 = vperm.slane %v7086_v31, 2  ;;  %v1034_v39 = vperm.slane %v7086_v31, 3 }
 0x1d3   :  { %v2604_v33 = vsel %vm2599_vm7, %v2587_v49, %v5687_v42  ;;  %v2605_v38 = vsel %vm2599_vm7, %v2588_v20, %v5688_v15  ;;  %v5442_v15 = vunpack.i.l.bf16 %v8408_v43  ;;  %v5909_v48 = vpack.i.bf16 %v922_v41, %v915_v16 }
 0x1d4   :  { %5900 = vrot.lane.b32.xlu2 %v5899_v21, %s6416_s3  ;;  %v2621_v0 = vsel %vm2616_vm8, %v2604_v33, %v5692_v24  ;;  %v2622_v50 = vsel %vm2616_vm8, %v2605_v38, %v5693_v28  ;;  %v5919_v26 = vpack.i.bf16 %v1034_v39, %v1027_v29  ;;  %v5939_v52 = vpack.i.bf16 %v1258_v9, %v1251_v6  ;;  %v8409_v33 = vld [vmem:[#allocation17_spill] sm:$0xff] }
 0x1d5   :  { %v2438_v28 = vsel %vm2430_vm14, %v2421_v44, %v5443_v11  ;;  %v2437_v24 = vsel %vm2430_vm14, %v2420_v5, %v5442_v15  ;;  %v2175_v49 = vperm.slane %v6817_v34, 6  ;;  %v2182_v20 = vperm.slane %v6817_v34, 7 }
 0x1d6   :  { %v7272_v47 = vpop.permute.xlu2 %5745  ;;  %5915 = vrot.lane.b32.xlu1 %v5914_v36, %s6416_s3  ;;  %5905 = vrot.lane.b32.xlu0 %v5904_v19, %s6416_s3  ;;  %v7286_v18 = vpop.permute.xlu1 %5705  ;;  %v2294_v36 = vperm.slane %v6831_v13, 7  ;;  %v5448_v38 = vunpack.i.h.bf16 %v8409_v33  ;;  %v5447_v19 = vunpack.i.l.bf16 %v8409_v33  ;;  %v1475_v13 = vperm.slane %v7132_v2, 2 }
 0x1d7   :  { %v5696_v25 = vpop.permute.xlu0 %5695  ;;  %v5718_v16 = vunpack.i.h.bf16 %v7221_v46  ;;  %v5717_v41 = vunpack.i.l.bf16 %v7221_v46  ;;  %v1363_v5 = vperm.slane %v7118_v56, 2  ;;  %v1370_v46 = vperm.slane %v7118_v56, 3 }
 0x1d8   :  { %v5698_v21 = vunpack.i.h.bf16 %v5696_v25  ;;  %v5697_v45 = vunpack.i.l.bf16 %v5696_v25  ;;  %v2454_v53 = vsel %vm2447_vm15, %v2437_v24, %v5447_v19  ;;  %v2455_v25 = vsel %vm2447_vm15, %v2438_v28, %v5448_v38 }
 0x1d9   :  { %v5934_v34 = vpack.i.bf16 %v2294_v36, %v2287_v32  ;;  %v5954_v15 = vpack.i.bf16 %v1482_v63, %v1475_v13  ;;  %v1811_v24 = vperm.slane %v7158_v7, 2  ;;  %v5733_v13 = vunpack.i.h.bf16 %v7251_v54 }
 0x1da   :  { %v7301_v42 = vsel %vm8360_vm9, %v2621_v0, %v5697_v45  ;;  %v7304_v61 = vsel %vm8360_vm9, %v2622_v50, %v5698_v21  ;;  %v5732_v63 = vunpack.i.l.bf16 %v7251_v54  ;;  %v5747_v54 = vunpack.i.l.bf16 %v7272_v47 }
 0x1dc   :  { %5925 = vperm.xlu2 %5388, %v5924_v37  }
 0x1de   :  { %v7294_v4 = vpop.permute.xlu2 %5760  ;;  %5920 = vperm.xlu1 %5387, %v5919_v26   ;;  %5910 = vperm.xlu0 %5386, %v5909_v48   ;;  %v5711_v23 = vpop.permute.xlu1 %5710  ;;  %v5929_v26 = vpack.i.bf16 %v2182_v20, %v2175_v49  ;;  %v1818_v49 = vperm.slane %v7158_v7, 3  ;;  %v5949_v20 = vpack.i.bf16 %v1370_v46, %v1363_v5 }
 0x1df   :  { %v5713_v0 = vunpack.i.h.bf16 %v5711_v23  ;;  %v5712_v50 = vunpack.i.l.bf16 %v5711_v23  ;;  %v5701_v37 = vpop.permute.xlu0 %5700  ;;  %v2406_v23 = vperm.slane %v6833_v14, 7 }
 0x1e0   :  { %v5703_v29 = vunpack.i.h.bf16 %v5701_v37  ;;  %v5702_v39 = vunpack.i.l.bf16 %v5701_v37 }
 0x1e2   :  { %v2472_v21 = vsel %vm8363_vm12, %v2455_v25, %v5703_v29  ;;  %v2471_v45 = vsel %vm8363_vm12, %v2454_v53, %v5702_v39  ;;  %v5969_v29 = vpack.i.bf16 %v1818_v49, %v1811_v24  ;;  %v2035_v24 = vperm.slane %v7160_v35, 2 }
 0x1e3   :  { %v2489_v6 = vsel %vm8364_vm0, %v2472_v21, %v5713_v0  ;;  %v2488_v9 = vsel %vm8364_vm0, %v2471_v45, %v5712_v50  ;;  %v1699_v0 = vperm.slane %v7138_v62, 2  ;;  %v1706_v50 = vperm.slane %v7138_v62, 3 }
 0x1e4   :  { %5940 = vperm.xlu2 %5388, %v5939_v52   ;;  %v2505_v43 = vsel %vm2498_vm1, %v2488_v9, %v5717_v41  ;;  %v2506_v11 = vsel %vm2498_vm1, %v2489_v6, %v5718_v16  ;;  %v2399_v52 = vperm.slane %v6833_v14, 6  ;;  %v1587_v41 = vperm.slane %v7120_v1, 2 }
 0x1e5   :  { %v5964_v16 = vpack.i.bf16 %v1706_v50, %v1699_v0  ;;  %v1594_v21 = vperm.slane %v7120_v1, 3  ;;  %v1923_v49 = vperm.slane %v7142_v22, 2 }
 0x1e6   :  { %v7316_v3 = vpop.permute.xlu2 %5775  ;;  %5935 = vperm.xlu1 %5387, %v5934_v34   ;;  %5930 = vperm.xlu0 %5386, %v5929_v26   ;;  %v5726_v44 = vpop.permute.xlu1 %5725  ;;  %v5944_v19 = vpack.i.bf16 %v2406_v23, %v2399_v52 }
 0x1e7   :  { %v5721_v48 = vpop.permute.xlu0 %5720  ;;  %v5728_v14 = vunpack.i.h.bf16 %v5726_v44  ;;  %v5727_v37 = vunpack.i.l.bf16 %v5726_v44 }
 0x1e8   :  { %v5723_v32 = vunpack.i.h.bf16 %v5721_v48  ;;  %v5722_v36 = vunpack.i.l.bf16 %v5721_v48  ;;  %v5959_v48 = vpack.i.bf16 %v1594_v21, %v1587_v41 }
 0x1e9   :  { %v2677_v45 = vsel %vm2413_vm13, %v5727_v37, %v5732_v63  ;;  %v2678_v6 = vsel %vm2413_vm13, %v5728_v14, %v5733_v13  ;;  %v712_v13 = vperm.slane %v7066_v8, 5 }
 0x1ea   :  { %v2522_v33 = vsel %vm8362_vm3, %v2505_v43, %v5722_v36  ;;  %v2523_v38 = vsel %vm8362_vm3, %v2506_v11, %v5723_v32  ;;  %v5748_v11 = vunpack.i.h.bf16 %v7272_v47  ;;  %v2042_v47 = vperm.slane %v7160_v35, 3 }
 0x1ec   :  { %5955 = vperm.xlu2 %5388, %v5954_v15   ;;  %v5979_v63 = vpack.i.bf16 %v2042_v47, %v2035_v24 }
 0x1ee   :  { %v7334_v28 = vpop.permute.xlu2 %5785  ;;  %5950 = vperm.xlu1 %5387, %v5949_v20   ;;  %5945 = vperm.xlu0 %5386, %v5944_v19   ;;  %v5741_v39 = vpop.permute.xlu1 %5740  ;;  %v1930_v20 = vperm.slane %v7142_v22, 3 }
 0x1ef   :  { %v5743_v53 = vunpack.i.h.bf16 %v5741_v39  ;;  %v5742_v25 = vunpack.i.l.bf16 %v5741_v39  ;;  %v5736_v34 = vpop.permute.xlu0 %5735  ;;  %v705_v39 = vperm.slane %v7066_v8, 4 }
 0x1f0   :  { %v5738_v9 = vunpack.i.h.bf16 %v5736_v34  ;;  %v5737_v26 = vunpack.i.l.bf16 %v5736_v34  ;;  %v5762_v34 = vunpack.i.l.bf16 %v7294_v4 }
 0x1f1   :  { %v2693_v15 = vsel %vm2430_vm14, %v2677_v45, %v5742_v25  ;;  %v2694_v44 = vsel %vm2430_vm14, %v2678_v6, %v5743_v53  ;;  %v5974_v6 = vpack.i.bf16 %v1930_v20, %v1923_v49 }
 0x1f2   :  { %v2538_v5 = vsel %vm8359_vm2, %v2522_v33, %v5737_v26  ;;  %v2539_v46 = vsel %vm8359_vm2, %v2523_v38, %v5738_v9  ;;  %v5984_v32 = vpack.i.bf16 %v2694_v44, %v2693_v15  ;;  %vm2650_vm2 = vcmask 121856  }
 0x1f3   :  { %v2555_v52 = vsel %vm2548_vm4, %v2538_v5, %v5747_v54  ;;  %v2556_v23 = vsel %vm2548_vm4, %v2539_v46, %v5748_v11  ;;  %v5613_v33 = vunpack.i.h.bf16 %v7056_v27  ;;  %v5612_v38 = vunpack.i.l.bf16 %v7056_v27 }
 0x1f4   :  { %5970 = vperm.xlu2 %5388, %v5969_v29   ;;  %v5763_v27 = vunpack.i.h.bf16 %v7294_v4  ;;  %v593_v11 = vperm.slane %v7045_v51, 4  ;;  %v600_v4 = vperm.slane %v7045_v51, 5  ;;  %v481_v5 = vperm.slane %v7061_v10, 4 }
 0x1f5   :  { %v7371_v53 = vsel %vm2650_vm2, %v7151_v12, %v5612_v38  ;;  %v7375_v25 = vsel %vm2650_vm2, %v7154_v55, %v5613_v33  ;;  %v5999_v55 = vpack.i.bf16 %v712_v13, %v705_v39  ;;  %v488_v46 = vperm.slane %v7061_v10, 5 }
 0x1f6   :  { %v7348_v43 = vpop.permute.xlu2 %5800  ;;  %5965 = vperm.xlu1 %5387, %v5964_v16   ;;  %5960 = vperm.xlu0 %5386, %v5959_v48   ;;  %v5994_v24 = vpack.i.bf16 %v600_v4, %v593_v11  ;;  %v824_v39 = vperm.slane %v6592_v57, 5  ;;  %v1377_v13 = vperm.slane %v7118_v56, 4 }
 0x1f7   :  { %v5751_v50 = vpop.permute.xlu0 %5750  ;;  %v5989_v38 = vpack.i.bf16 %v488_v46, %v481_v5 }
 0x1f8   :  { %v5756_v36 = vpop.permute.xlu1 %5755  ;;  %v5753_v14 = vunpack.i.h.bf16 %v5751_v50  ;;  %v5752_v37 = vunpack.i.l.bf16 %v5751_v50  ;;  %v936_v50 = vperm.slane %v6595_v58, 5 }
 0x1f9   :  { %v5758_v19 = vunpack.i.h.bf16 %v5756_v36  ;;  %v5757_v0 = vunpack.i.l.bf16 %v5756_v36  ;;  %v1048_v36 = vperm.slane %v7086_v31, 5 }
 0x1fa   :  { %v2572_v16 = vsel %vm2565_vm5, %v2555_v52, %v5752_v37  ;;  %v2573_v41 = vsel %vm2565_vm5, %v2556_v23, %v5753_v14  ;;  %v817_v37 = vperm.slane %v6592_v57, 4 }
 0x1fb   :  { %v2589_v21 = vsel %vm2582_vm6, %v2572_v16, %v5757_v0  ;;  %v2590_v45 = vsel %vm2582_vm6, %v2573_v41, %v5758_v19  ;;  %v929_v0 = vperm.slane %v6595_v58, 4 }
 0x1fc   :  { %5985 = vrot.lane.b32.xlu2 %v5984_v32, %s6416_s3  ;;  %v2606_v12 = vsel %vm2599_vm7, %v2589_v21, %v5762_v34  ;;  %v2607_v9 = vsel %vm2599_vm7, %v2590_v45, %v5763_v27  ;;  %v1041_v32 = vperm.slane %v7086_v31, 4  ;;  %v5314_v27 = vld [vmem:[#allocation7 + $0x18] sm:$0xff]  ;;  %v5104_v34 = vld [vmem:[%s8336_s5 + $0x14] sm:$0x3]  ;;  %v5658_v21 = vunpack.i.h.bf16 %v7183_v40 }
 0x1fd   :  { %v5657_v45 = vunpack.i.l.bf16 %v7183_v40  ;;  %3519 = vmatpush.bf16.msrb.mxu1 %v5314_v27  ;;  %v6009_v40 = vpack.i.bf16 %v936_v50, %v929_v0  ;;  %v1265_v0 = vperm.slane %v7110_v60, 4  ;;  %v1272_v50 = vperm.slane %v7110_v60, 5 }
 0x1fe   :  { %v7365_v29 = vpop.permute.xlu2 %5815  ;;  %5980 = vperm.xlu1 %5387, %v5979_v63   ;;  %5975 = vperm.xlu0 %5386, %v5974_v6   ;;  %v6014_v19 = vpack.i.bf16 %v1048_v36, %v1041_v32  ;;  %v1384_v63 = vperm.slane %v7118_v56, 5  ;;  %v5788_v6 = vunpack.i.h.bf16 %v7334_v28  ;;  %v7428_v32 = vsel %vm2650_vm2, %v7227_v17, %v5658_v21 }
 0x1ff   :  { %v5766_v44 = vpop.permute.xlu0 %5765  ;;  %v6417_v36 = vmov 65535  }
 0x200   :  { %v5771_v26 = vpop.permute.xlu1 %5770  ;;  %v5768_v48 = vunpack.i.h.bf16 %v5766_v44  ;;  %v5767_v52 = vunpack.i.l.bf16 %v5766_v44 }
 0x201   :  { %v5773_v54 = vunpack.i.h.bf16 %v5771_v26  ;;  %v5772_v15 = vunpack.i.l.bf16 %v5771_v26 }
 0x202   :  { %v2623_v47 = vsel %vm2616_vm8, %v2606_v12, %v5767_v52  ;;  %v2624_v49 = vsel %vm2616_vm8, %v2607_v9, %v5768_v48  ;;  %v5787_v12 = vunpack.i.l.bf16 %v7334_v28  ;;  %v5313_v48 = vld [vmem:[#allocation7 + $0x10] sm:$0xff]  ;;  %v7424_v52 = vsel %vm2650_vm2, %v7224_v30, %v5657_v45 }
 0x203   :  { %v7396_v20 = vsel %vm8360_vm9, %v2623_v47, %v5772_v15  ;;  %v7399_v33 = vsel %vm8360_vm9, %v2624_v49, %v5773_v54  ;;  %vm2909_vm9 = vcmask 1040384   ;;  %v3655_v15 = vunpack.c.l.b16 %v5104_v34  ;;  %3520 = vmatpush.bf16.msrb.mxu1 %v5313_v48 }
 0x204   :  { %6000 = vperm.xlu2 %5388, %v5999_v55   ;;  %v6004_v47 = vpack.i.bf16 %v824_v39, %v817_v37  ;;  %v6029_v49 = vpack.i.bf16 %v1384_v63, %v1377_v13  ;;  %v1153_v30 = vperm.slane %v6598_v59, 4  ;;  %v1160_v37 = vperm.slane %v6598_v59, 5 }
 0x205   :  { %v5803_v39 = vunpack.i.h.bf16 %v7348_v43  ;;  %v5802_v13 = vunpack.i.l.bf16 %v7348_v43  ;;  %v1608_v48 = vperm.slane %v7120_v1, 5 }
 0x206   :  { %v7389_v23 = vpop.permute.xlu2 %5830  ;;  %5995 = vperm.xlu1 %5387, %v5994_v24   ;;  %5990 = vperm.xlu0 %5386, %v5989_v38   ;;  %v2910_v24 = vsel %vm2909_vm9, 4294967295, %v6417_v36  ;;  %v3657_v38 = vpack.c.b16 %v3655_v15, %v3655_v15 }
 0x207   :  { %v5791_v9 = vpop.permute.xlu0 %5790  ;;  %v7435_v17 = vsel %vm2799_vm11, %v2910_v24, 0  ;;  %vm8411_vm11 = vcmask 64512  }
 0x208   :  { %v5781_v14 = vpop.permute.xlu1 %5780  ;;  %v5793_v11 = vunpack.i.h.bf16 %v5791_v9  ;;  %v5792_v4 = vunpack.i.l.bf16 %v5791_v9  ;;  %vm8412_vm9 = vmmov %vm8411_vm11 }
 0x209   :  { %v5783_v16 = vunpack.i.h.bf16 %v5781_v14  ;;  %v5782_v41 = vunpack.i.l.bf16 %v5781_v14  ;;  %v5312_v14 = vld [vmem:[#allocation7 + $0x8] sm:$0xff] }
 0x20a   :  { %3521 = vmatpush.bf16.msrb.mxu1 %v5312_v14  ;;  %v2049_v14 = vperm.slane %v7160_v35, 4 }
 0x20b   :  { %v2423_v55 = vsel %vm2413_vm13, 1.0, %v5783_v16  ;;  %v2422_v26 = vsel %vm2413_vm13, 1.0, %v5782_v41  ;;  %v1713_v16 = vperm.slane %v7138_v62, 4  ;;  %v1720_v41 = vperm.slane %v7138_v62, 5 }
 0x20c   :  { %6015 = vperm.xlu2 %5388, %v6014_v19   ;;  %v2439_v44 = vsel %vm2430_vm14, %v2422_v26, %v5787_v12  ;;  %v2440_v5 = vsel %vm2430_vm14, %v2423_v55, %v5788_v6  ;;  %v3660_v55 = vand.u32 %v3657_v38, %v7435_v17  ;;  %v1496_v38 = vperm.slane %v7132_v2, 5 }
 0x20d   :  { %v2456_v46 = vsel %vm2447_vm15, %v2439_v44, %v5792_v4  ;;  %v2457_v28 = vsel %vm2447_vm15, %v2440_v5, %v5793_v11  ;;  %v6024_v11 = vpack.i.bf16 %v1272_v50, %v1265_v0  ;;  %v5311_v44 = vld [vmem:[#allocation7] sm:$0xff]  ;;  %v6019_v5 = vpack.i.bf16 %v1160_v37, %v1153_v30 }
 0x20e   :  { %v7416_v54 = vpop.permute.xlu2 %5845  ;;  %6010 = vperm.xlu1 %5387, %v6009_v40   ;;  %6005 = vperm.xlu0 %5386, %v6004_v47   ;;  %v6044_v40 = vpack.i.bf16 %v1720_v41, %v1713_v16  ;;  %v1944_v16 = vperm.slane %v7142_v22, 5  ;;  %v1825_v41 = vperm.slane %v7158_v7, 4 }
 0x20f   :  { %v5806_v63 = vpop.permute.xlu0 %5805  ;;  %3522 = vmatpush.bf16.msrb.mxu1 %v5311_v44 }
 0x210   :  { %v5796_v19 = vpop.permute.xlu1 %5795  ;;  %v5808_v6 = vunpack.i.h.bf16 %v5806_v63  ;;  %v5807_v12 = vunpack.i.l.bf16 %v5806_v63  ;;  %v1937_v63 = vperm.slane %v7142_v22, 4 }
 0x211   :  { %v5798_v27 = vunpack.i.h.bf16 %v5796_v19  ;;  %v5797_v34 = vunpack.i.l.bf16 %v5796_v19  ;;  %v8410_v19 = vld [vmem:[#allocation29_spill] sm:$0xff] }
 0x212   :  { %5067 = vmatmul.msk.bf16.vlgmr.msrb.gmra.mxu1 %vm8361_vm10, %v8410_v19  ;;  %vm8423_vm10 = vcmask 64512  }
 0x213   :  { %v2473_v21 = vsel %vm8363_vm12, %v2456_v46, %v5797_v34  ;;  %v2474_v45 = vsel %vm8363_vm12, %v2457_v28, %v5798_v27  ;;  %v1601_v28 = vperm.slane %v7120_v1, 4  ;;  %3668 = vmatpush.bf16.msra.mxu1 %v3660_v55  ;;  %v2056_v27 = vperm.slane %v7160_v35, 5 }
 0x214   :  { %6030 = vperm.xlu2 %5388, %v6029_v49   ;;  %v2490_v26 = vsel %vm8364_vm0, %v2473_v21, %v5802_v13  ;;  %v2491_v43 = vsel %vm8364_vm0, %v2474_v45, %v5803_v39  ;;  %v1489_v49 = vperm.slane %v7132_v2, 4  ;;  %v2874_v21 = vld [vmem:[%s8336_s5 + $0x8] sm:$0x3] }
 0x215   :  { %v2507_v4 = vsel %vm2498_vm1, %v2490_v26, %v5807_v12  ;;  %v2508_v15 = vsel %vm2498_vm1, %v2491_v43, %v5808_v6  ;;  %v6039_v34 = vpack.i.bf16 %v1608_v48, %v1601_v28  ;;  %v6059_v39 = vpack.i.bf16 %v2056_v27, %v2049_v14  ;;  %v5327_v48 = vld [vmem:[%s8336_s5 + $0xc] sm:$0xff] }
 0x216   :  { %v7444_v9 = vpop.permute.xlu2 %5860  ;;  %6025 = vperm.xlu1 %5387, %v6024_v11   ;;  %6020 = vperm.xlu0 %5386, %v6019_v5   ;;  %v6034_v37 = vpack.i.bf16 %v1496_v38, %v1489_v49  ;;  %v1832_v12 = vperm.slane %v7158_v7, 5  ;;  %v2880_v55 = vunpack.c.l.b16 %v2874_v21  ;;  %v5817_v49 = vunpack.i.l.bf16 %v7365_v29 }
 0x217   :  { %v5821_v47 = vpop.permute.xlu0 %5820  ;;  %3669 = vmatpush.bf16.msra.mxu1 %v5327_v48  ;;  %v943_v21 = vperm.slane %v6595_v58, 6 }
 0x218   :  { %v5811_v46 = vpop.permute.xlu1 %5810  ;;  %v5823_v26 = vunpack.i.h.bf16 %v5821_v47  ;;  %v5822_v43 = vunpack.i.l.bf16 %v5821_v47  ;;  %v5818_v47 = vunpack.i.h.bf16 %v7365_v29  ;;  %v6049_v19 = vpack.i.bf16 %v1832_v12, %v1825_v41 }
 0x219   :  { %v5813_v36 = vunpack.i.h.bf16 %v5811_v46  ;;  %v5812_v24 = vunpack.i.l.bf16 %v5811_v46 }
 0x21a   :  { %v2680_v14 = vsel %vm2413_vm13, %v5818_v47, %v5823_v26  ;;  %v838_v47 = vperm.slane %v6592_v57, 7 }
 0x21b   :  { %v2524_v0 = vsel %vm8362_vm3, %v2507_v4, %v5812_v24  ;;  %v2525_v50 = vsel %vm8362_vm3, %v2508_v15, %v5813_v36  ;;  %v607_v4 = vperm.slane %v7045_v51, 6  ;;  %v614_v15 = vperm.slane %v7045_v51, 7 }
 0x21c   :  { %6045 = vperm.xlu2 %5388, %v6044_v40   ;;  %v6054_v36 = vpack.i.bf16 %v1944_v16, %v1937_v63  ;;  %v2882_v24 = vpack.c.b16 %v2880_v55, %v2880_v55  ;;  %v5306_v63 = vld [vmem:[%s8336_s5] sm:$0xff] }
 0x21d   :  { %v6074_v27 = vpack.i.bf16 %v614_v15, %v607_v4 }
 0x21e   :  { %v7459_v30 = vpop.permute.xlu2 %5870  ;;  %6040 = vperm.xlu1 %5387, %v6039_v34   ;;  %6035 = vperm.xlu0 %5386, %v6034_v37   ;;  %v5833_v34 = vunpack.i.h.bf16 %v7389_v23  ;;  %v5832_v37 = vunpack.i.l.bf16 %v7389_v23  ;;  %v5848_v23 = vunpack.i.h.bf16 %v7416_v54 }
 0x21f   :  { %v5836_v11 = vpop.permute.xlu0 %5835 }
 0x220   :  { %v5826_v13 = vpop.permute.xlu1 %5825  ;;  %v5838_v40 = vunpack.i.h.bf16 %v5836_v11  ;;  %v5837_v46 = vunpack.i.l.bf16 %v5836_v11 }
 0x221   :  { %v5828_v45 = vunpack.i.h.bf16 %v5826_v13  ;;  %v5827_v6 = vunpack.i.l.bf16 %v5826_v13  ;;  %v502_v13 = vperm.slane %v7061_v10, 7 }
 0x223   :  { %v2540_v44 = vsel %vm8411_vm11, %v2524_v0, %v5827_v6  ;;  %v2541_v5 = vsel %vm8412_vm9, %v2525_v50, %v5828_v45  ;;  %v2913_v0 = vand.u32 %v7435_v17, %v2882_v24  ;;  %v2679_v50 = vsel %vm2413_vm13, %v5817_v49, %v5822_v43 }
 0x224   :  { %6060 = vperm.xlu2 %5388, %v6059_v39   ;;  %v2557_v51 = vsel %vm2548_vm4, %v2540_v44, %v5837_v46  ;;  %v2558_v38 = vsel %vm2548_vm4, %v2541_v5, %v5838_v40  ;;  %v495_v39 = vperm.slane %v7061_v10, 6  ;;  %v950_v45 = vperm.slane %v6595_v58, 7 }
 0x225   :  { %2921 = vmatpush.bf16.msra.mxu2 %v2913_v0  ;;  %v5847_v6 = vunpack.i.l.bf16 %v7416_v54  ;;  %v2695_v55 = vsel %vm2430_vm14, %v2679_v50, %v5832_v37  ;;  %v2696_v10 = vsel %vm2430_vm14, %v2680_v14, %v5833_v34  ;;  %v831_v24 = vperm.slane %v6592_v57, 6 }
 0x226   :  { %v7474_v28 = vpop.permute.xlu2 %5885  ;;  %6055 = vperm.xlu1 %5387, %v6054_v36   ;;  %6050 = vperm.xlu0 %5386, %v6049_v19   ;;  %v6069_v5 = vpack.i.bf16 %v502_v13, %v495_v39  ;;  %v6064_v46 = vpack.i.bf16 %v2696_v10, %v2695_v55  ;;  %v6089_v48 = vpack.i.bf16 %v950_v45, %v943_v21  ;;  %v726_v19 = vperm.slane %v7066_v8, 7 }
 0x227   :  { %v5851_v12 = vpop.permute.xlu0 %5850  ;;  %v5863_v0 = vunpack.i.h.bf16 %v7444_v9  ;;  %v5862_v50 = vunpack.i.l.bf16 %v7444_v9  ;;  %v1286_v34 = vperm.slane %v7110_v60, 7  ;;  %vm8413_vm11 = vcmask 113664  }
 0x228   :  { %v5841_v29 = vpop.permute.xlu1 %5840  ;;  %v5853_v11 = vunpack.i.h.bf16 %v5851_v12  ;;  %v5852_v4 = vunpack.i.l.bf16 %v5851_v12  ;;  %vm8414_vm9 = vmmov %vm8413_vm11  ;;  %v5873_v45 = vunpack.i.h.bf16 %v7459_v30  ;;  %v1167_v12 = vperm.slane %v6598_v59, 6 }
 0x229   :  { %v5843_v16 = vunpack.i.h.bf16 %v5841_v29  ;;  %v5842_v41 = vunpack.i.l.bf16 %v5841_v29  ;;  %2922 = vmatpush.bf16.msra.mxu2 %v5306_v63  ;;  %v1174_v55 = vperm.slane %v6598_v59, 7 }
 0x22b   :  { %v2574_v26 = vsel %vm2565_vm5, %v2557_v51, %v5842_v41  ;;  %v2575_v43 = vsel %vm2565_vm5, %v2558_v38, %v5843_v16  ;;  %v719_v38 = vperm.slane %v7066_v8, 6  ;;  %v6084_v16 = vpack.i.bf16 %v838_v47, %v831_v24 }
 0x22c   :  { %6075 = vperm.xlu2 %5388, %v6074_v27   ;;  %v2591_v44 = vsel %vm2582_vm6, %v2574_v26, %v5847_v6  ;;  %v2592_v58 = vsel %vm2582_vm6, %v2575_v43, %v5848_v23  ;;  %v1279_v27 = vperm.slane %v7110_v60, 6  ;;  %v5872_v23 = vunpack.i.l.bf16 %v7459_v30 }
 0x22d   :  { %v2608_v54 = vsel %vm2599_vm7, %v2591_v44, %v5852_v4  ;;  %v2609_v40 = vsel %vm2599_vm7, %v2592_v58, %v5853_v11  ;;  %v6079_v60 = vpack.i.bf16 %v726_v19, %v719_v38  ;;  %v1055_v11 = vperm.slane %v7086_v31, 6 }
 0x22e   :  { %v7501_v15 = vpop.permute.xlu2 %5900  ;;  %6070 = vperm.xlu1 %5387, %v6069_v5   ;;  %6065 = vrot.lane.b32.xlu0 %v6064_v46, %s6416_s3  ;;  %v6104_v21 = vpack.i.bf16 %v1286_v34, %v1279_v27  ;;  %v1062_v4 = vperm.slane %v7086_v31, 7  ;;  %v1615_v30 = vperm.slane %v7120_v1, 6  ;;  %v2424_v59 = vsel %vm2413_vm13, 1.0, %v5872_v23 }
 0x22f   :  { %v5866_v14 = vpop.permute.xlu0 %5865  ;;  %v6099_v46 = vpack.i.bf16 %v1174_v55, %v1167_v12  ;;  %v1510_v38 = vperm.slane %v7132_v2, 7  ;;  %v1391_v19 = vperm.slane %v7118_v56, 6  ;;  %v1951_v27 = vperm.slane %v7142_v22, 6 }
 0x230   :  { %v5856_v36 = vpop.permute.xlu1 %5855  ;;  %v5868_v29 = vunpack.i.h.bf16 %v5866_v14  ;;  %v5867_v39 = vunpack.i.l.bf16 %v5866_v14  ;;  %v6094_v47 = vpack.i.bf16 %v1062_v4, %v1055_v11  ;;  %v1398_v14 = vperm.slane %v7118_v56, 7 }
 0x231   :  { %v5858_v49 = vunpack.i.h.bf16 %v5856_v36  ;;  %v5857_v51 = vunpack.i.l.bf16 %v5856_v36  ;;  %v5708_v34 = vunpack.i.h.bf16 %v7286_v18  ;;  %v5903_v56 = vunpack.i.h.bf16 %v7501_v15 }
 0x232   :  { %v1846_v12 = vperm.slane %v7158_v7, 7 }
 0x233   :  { %v2625_v37 = vsel %vm2616_vm8, %v2608_v54, %v5857_v51  ;;  %v2626_v57 = vsel %vm2616_vm8, %v2609_v40, %v5858_v49  ;;  %v1622_v54 = vperm.slane %v7120_v1, 7  ;;  %v2425_v40 = vsel %vm2413_vm13, 1.0, %v5873_v45 }
 0x234   :  { %6090 = vperm.xlu2 %5388, %v6089_v48   ;;  %v2642_v63 = vsel %vm8413_vm11, %v2625_v37, %v5862_v50  ;;  %v2643_v8 = vsel %vm8414_vm9, %v2626_v57, %v5863_v0  ;;  %v1503_v51 = vperm.slane %v7132_v2, 6  ;;  %v5707_v37 = vunpack.i.l.bf16 %v7286_v18 }
 0x235   :  { %v7523_v9 = vsel %vm2650_vm2, %v2642_v63, %v5867_v39  ;;  %v7526_v41 = vsel %vm2650_vm2, %v2643_v8, %v5868_v29  ;;  %v6119_v49 = vpack.i.bf16 %v1622_v54, %v1615_v30  ;;  %vm2763_vm11 = vcmask 130048  }
 0x236   :  { %v7518_v13 = vpop.permute.xlu2 %5925  ;;  %6085 = vperm.xlu1 %5387, %v6084_v16   ;;  %6080 = vperm.xlu0 %5386, %v6079_v60   ;;  %v1958_v29 = vperm.slane %v7142_v22, 7  ;;  %v5902_v16 = vunpack.i.l.bf16 %v7501_v15  ;;  %v6114_v60 = vpack.i.bf16 %v1510_v38, %v1503_v51  ;;  %vm2884_vm9 = vcmask 154624  }
 0x237   :  { %v5876_v43 = vpop.permute.xlu0 %5875  ;;  %v2656_v15 = vsel %vm2650_vm2, %v7304_v61, %v5708_v34  ;;  %v2063_v54 = vperm.slane %v7160_v35, 6  ;;  %v5887_v34 = vunpack.i.l.bf16 %v7474_v28 }
 0x238   :  { %v5881_v6 = vpop.permute.xlu1 %5880  ;;  %v5878_v44 = vunpack.i.h.bf16 %v5876_v43  ;;  %v5877_v58 = vunpack.i.l.bf16 %v5876_v43  ;;  %v1734_v43 = vperm.slane %v7138_v62, 7 }
 0x239   :  { %v5883_v10 = vunpack.i.h.bf16 %v5881_v6  ;;  %v5882_v26 = vunpack.i.l.bf16 %v5881_v6  ;;  %v6134_v6 = vpack.i.bf16 %v1958_v29, %v1951_v27 }
 0x23a   :  { %v2441_v48 = vsel %vm2430_vm14, %v2424_v59, %v5877_v58  ;;  %v2442_v36 = vsel %vm2430_vm14, %v2425_v40, %v5878_v44  ;;  %v7590_v44 = vpop.f32.mrf.mxu1  ;;  %v2070_v40 = vperm.slane %v7160_v35, 7  ;;  %v8418_v59 = vld [vmem:[#allocation18_spill] sm:$0xff] }
 0x23b   :  { %v7543_v24 = vsel %vm2447_vm15, %v2441_v48, %v5882_v26  ;;  %v7546_v31 = vsel %vm2447_vm15, %v2442_v36, %v5883_v10  ;;  %v2769_v10 = vsel %vm2763_vm11, %v2656_v15, %v5903_v56  ;;  %v1727_v26 = vperm.slane %v7138_v62, 6 }
 0x23c   :  { %6105 = vperm.xlu2 %5388, %v6104_v21   ;;  %v3131_v62 = vperm.slane %v8418_v59, 1  ;;  %v5777_v36 = vunpack.i.l.bf16 %v7316_v3 }
 0x23d   :  { %v6124_v4 = vpack.i.bf16 %v1734_v43, %v1727_v26 }
 0x23e   :  { %v7534_v5 = vpop.permute.xlu2 %5940  ;;  %6100 = vperm.xlu1 %5387, %v6099_v46   ;;  %6095 = vperm.xlu0 %5386, %v6094_v47   ;;  %v3124_v46 = vperm.slane %v8418_v59, 0  ;;  %v2657_v35 = vsel %vm2650_vm2, %v7396_v20, %v5777_v36  ;;  %v5888_v20 = vunpack.i.h.bf16 %v7474_v28 }
 0x240   :  { %v5896_v1 = vpop.permute.xlu1 %5895  ;;  %v5891_v57 = vpop.permute.xlu0 %5890  ;;  %v6154_v51 = vpack.i.bf16 %v3131_v62, %v3124_v46  ;;  %v5943_v62 = vunpack.i.h.bf16 %v7534_v5 }
 0x241   :  { %v5898_v0 = vunpack.i.h.bf16 %v5896_v1  ;;  %v5897_v50 = vunpack.i.l.bf16 %v5896_v1  ;;  %v5893_v39 = vunpack.i.h.bf16 %v5891_v57  ;;  %v5892_v63 = vunpack.i.l.bf16 %v5891_v57 }
 0x242   :  { %v5778_v1 = vunpack.i.h.bf16 %v7316_v3 }
 0x243   :  { %v2766_v2 = vsel %vm2763_vm11, %v7424_v52, %v5897_v50  ;;  %v2767_v8 = vsel %vm2763_vm11, %v7428_v32, %v5898_v0  ;;  %v2764_v18 = vsel %vm2763_vm11, %v7371_v53, %v5892_v63  ;;  %v2765_v22 = vsel %vm2763_vm11, %v7375_v25, %v5893_v39  ;;  %v7620_v63 = vpop.f32.mrf.mxu1 }
 0x244   :  { %6120 = vperm.xlu2 %5388, %v6119_v49   ;;  %v7562_v21 = vpack.c.bf16 %v2767_v8, %v2766_v2  ;;  %v6109_v52 = vpack.i.bf16 %v1398_v14, %v1391_v19  ;;  %v7570_v23 = vpack.c.bf16 %v2765_v22, %v2764_v18  ;;  %v2655_v32 = vsel %vm2650_vm2, %v7301_v42, %v5707_v37 }
 0x245   :  { %v1839_v25 = vperm.slane %v7158_v7, 6  ;;  %v2768_v55 = vsel %vm2763_vm11, %v2655_v32, %v5902_v16  ;;  %v6139_v49 = vpack.i.bf16 %v2070_v40, %v2063_v54  ;;  %v2658_v0 = vsel %vm2650_vm2, %v7399_v33, %v5778_v1 }
 0x246   :  { %8415 = vst [vmem:[#allocation26_spill] sm:$0xff] %v7562_v21  ;;  %v7568_v45 = vpop.permute.xlu2 %5955  ;;  %6115 = vperm.xlu1 %5387, %v6114_v60   ;;  %6110 = vperm.xlu0 %5386, %v6109_v52   ;;  %v7586_v42 = vpack.c.bf16 %v2769_v10, %v2768_v55  ;;  %v2475_v39 = vsel %vm8363_vm12, %v7543_v24, %v5887_v34  ;;  %v8420_v52 = vld [vmem:[#allocation19_spill] sm:$0xff]  ;;  %v5927_v32 = vunpack.i.l.bf16 %v7518_v13 }
 0x247   :  { %8416 = vst [vmem:[#allocation25_spill] sm:$0xff] %v7570_v23  ;;  %5009 = vmatmul.msk.bf16.vlgmr.msra.gmra.mxu2 %vm2884_vm9, %v7570_v23  ;;  %5109 = vmatmul.msk.bf16.vlgmr.msra.gmra.mxu1 %vm2884_vm9, %v7570_v23  ;;  %v6129_v11 = vpack.i.bf16 %v1846_v12, %v1839_v25  ;;  %v2476_v2 = vsel %vm8363_vm12, %v7546_v31, %v5888_v20  ;;  %v5928_v12 = vunpack.i.h.bf16 %v7518_v13  ;;  %v5331_v23 = vld [vmem:[#allocation5 + $0x38] sm:$0xff] }
 0x248   :  { %v7578_v53 = vpop.permute.xlu1 %5915  ;;  %8417 = vst [vmem:[#allocation17_spill] sm:$0xff] %v7586_v42  ;;  %v5906_v61 = vpop.permute.xlu0 %5905 }
 0x249   :  { %v5907_v48 = vunpack.i.l.bf16 %v5906_v61  ;;  %v5908_v47 = vunpack.i.h.bf16 %v5906_v61  ;;  %v5918_v31 = vunpack.i.h.bf16 %v7578_v53  ;;  %v5917_v15 = vunpack.i.l.bf16 %v7578_v53 }
 0x24b   :  { %v2770_v3 = vsel %vm2763_vm11, %v2657_v35, %v5907_v48  ;;  %v2771_v27 = vsel %vm2763_vm11, %v2658_v0, %v5908_v47  ;;  %v2772_v13 = vsel %vm2763_vm11, %v7523_v9, %v5917_v15  ;;  %v2773_v46 = vsel %vm2763_vm11, %v7526_v41, %v5918_v31  ;;  %v8422_v47 = vld [vmem:[#allocation20_spill] sm:$0xff] }
 0x24c   :  { %6135 = vperm.xlu2 %5388, %v6134_v6   ;;  %v7615_v57 = vpack.c.bf16 %v2771_v27, %v2770_v3  ;;  %v5942_v48 = vunpack.i.l.bf16 %v7534_v5  ;;  %v7649_v36 = vpack.c.bf16 %v2773_v46, %v2772_v13  ;;  %v8426_v35 = vld [vmem:[#allocation16_spill] sm:$0xff] }
 0x24d   :  { %v3068_v0 = vperm.slane %v8426_v35, 0  ;;  %v3075_v3 = vperm.slane %v8426_v35, 1  ;;  %v8432_v46 = vld [vmem:[#allocation24_spill] sm:$0xff] }
 0x24e   :  { %6130 = vperm.xlu1 %5387, %v6129_v11   ;;  %v7592_v7 = vpop.permute.xlu2 %5970  ;;  %6125 = vperm.xlu0 %5386, %v6124_v4   ;;  %8419 = vst [vmem:[#allocation29_spill] sm:$0xff] %v7615_v57 }
 0x24f   :  { %8421 = vst [vmem:[#allocation18_spill] sm:$0xff] %v7649_v36 }
 0x250   :  { %v5921_v58 = vpop.permute.xlu1 %5920  ;;  %v5911_v30 = vpop.permute.xlu0 %5910 }
 0x251   :  { %v5912_v50 = vunpack.i.l.bf16 %v5911_v30  ;;  %v5913_v37 = vunpack.i.h.bf16 %v5911_v30  ;;  %v5922_v29 = vunpack.i.l.bf16 %v5921_v58  ;;  %v5923_v33 = vunpack.i.h.bf16 %v5921_v58 }
 0x253   :  { %v2492_v8 = vsel %vm8364_vm0, %v2475_v39, %v5912_v50  ;;  %v2493_v56 = vsel %vm8364_vm0, %v2476_v2, %v5913_v37  ;;  %v5958_v50 = vunpack.i.h.bf16 %v7568_v45 }
 0x254   :  { %3014 = vrot.lane.b32.xlu2 %v7590_v44, %s6409_s29  ;;  %v2509_v24 = vsel %vm2498_vm1, %v2492_v8, %v5922_v29  ;;  %v2510_v6 = vsel %vm2498_vm1, %v2493_v56, %v5923_v33  ;;  %v6149_v56 = vpack.i.bf16 %v3075_v3, %v3068_v0 }
 0x255   :  { %v2526_v11 = vsel %vm8362_vm3, %v2509_v24, %v5927_v32  ;;  %v2527_v58 = vsel %vm8362_vm3, %v2510_v6, %v5928_v12  ;;  %vm8424_vm3 = vmmov %vm8423_vm10 }
 0x256   :  { %6140 = vperm.xlu0 %5386, %v6139_v49   ;;  %v7608_v19 = vpop.permute.xlu2 %5985  ;;  %v2542_v1 = vsel %vm8423_vm10, %v2526_v11, %v5942_v48 }
 0x257   :  { %5010 = vmatmul.msk.bf16.gmra.mxu2 %vm2884_vm9, %v7562_v21  ;;  %5110 = vmatmul.msk.bf16.gmra.mxu1 %vm2884_vm9, %v7562_v21  ;;  %v5988_v12 = vunpack.i.h.bf16 %v7608_v19 }
 0x258   :  { %v5936_v38 = vpop.permute.xlu1 %5935  ;;  %v5931_v14 = vpop.permute.xlu0 %5930 }
 0x259   :  { %v5938_v16 = vunpack.i.h.bf16 %v5936_v38  ;;  %v5937_v60 = vunpack.i.l.bf16 %v5936_v38  ;;  %v5933_v18 = vunpack.i.h.bf16 %v5931_v14  ;;  %v5932_v22 = vunpack.i.l.bf16 %v5931_v14  ;;  %v8425_v38 = vld [vmem:[#allocation21_spill] sm:$0xff] }
 0x25a   :  { %v5957_v14 = vunpack.i.l.bf16 %v7568_v45 }
 0x25b   :  { %v2682_v26 = vsel %vm2413_vm13, %v5933_v18, %v5938_v16  ;;  %v2681_v43 = vsel %vm2413_vm13, %v5932_v22, %v5937_v60  ;;  %v8427_v16 = vld [vmem:[#allocation22_spill] sm:$0xff]  ;;  %v5973_v22 = vunpack.i.h.bf16 %v7592_v7 }
 0x25c   :  { %6155 = vperm.xlu2 %5388, %v6154_v51   ;;  %v2543_v51 = vsel %vm8424_vm3, %v2527_v58, %v5943_v62  ;;  %vm8428_vm3 = vcmask 113664  }
 0x25d   :  { %vm8429_vm10 = vmmov %vm8428_vm3 }
 0x25e   :  { %3016 = vrot.lane.b32.xlu0 %v7620_v63, %s6409_s29  ;;  %v7635_v55 = vpop.permute.xlu2 %6000 }
 0x25f   :  { %v6003_v3 = vunpack.i.h.bf16 %v7635_v55 }
 0x260   :  { %v5951_v28 = vpop.permute.xlu1 %5950  ;;  %v5946_v25 = vpop.permute.xlu0 %5945 }
 0x261   :  { %v5948_v10 = vunpack.i.h.bf16 %v5946_v25  ;;  %v5947_v61 = vunpack.i.l.bf16 %v5946_v25  ;;  %v5953_v4 = vunpack.i.h.bf16 %v5951_v28  ;;  %v5952_v54 = vunpack.i.l.bf16 %v5951_v28 }
 0x262   :  { %v5972_v28 = vunpack.i.l.bf16 %v7592_v7 }
 0x263   :  { %v2697_v53 = vsel %vm2430_vm14, %v2681_v43, %v5947_v61  ;;  %v2698_v30 = vsel %vm2430_vm14, %v2682_v26, %v5948_v10  ;;  %v2559_v9 = vsel %vm2548_vm4, %v2542_v1, %v5952_v54  ;;  %v2560_v41 = vsel %vm2548_vm4, %v2543_v51, %v5953_v4 }
 0x264   :  { %6170 = vperm.xlu2 %5388, %v8420_v52   ;;  %v6144_v40 = vpack.i.bf16 %v2698_v30, %v2697_v53  ;;  %v2576_v39 = vsel %vm2565_vm5, %v2559_v9, %v5957_v14  ;;  %v2577_v33 = vsel %vm2565_vm5, %v2560_v41, %v5958_v50  ;;  %v5987_v10 = vunpack.i.l.bf16 %v7608_v19  ;;  %v8430_v53 = vld [vmem:[#allocation23_spill] sm:$0xff] }
 0x265   :  { %v6002_v50 = vunpack.i.l.bf16 %v7635_v55 }
 0x266   :  { %6160 = vperm.xlu0 %5386, %v8422_v47   ;;  %6145 = vrot.lane.b32.xlu1 %v6144_v40, %s6416_s3  ;;  %v7666_v37 = vpop.permute.xlu2 %6015 }
 0x267   :  { %5011 = vmatmul.msk.bf16.gmra.mxu2 %vm2884_vm9, %v7586_v42  ;;  %5111 = vmatmul.msk.bf16.gmra.mxu1 %vm2884_vm9, %v7586_v42 }
 0x268   :  { %v5966_v49 = vpop.permute.xlu1 %5965  ;;  %v5961_v5 = vpop.permute.xlu0 %5960 }
 0x269   :  { %v5963_v27 = vunpack.i.h.bf16 %v5961_v5  ;;  %v5962_v34 = vunpack.i.l.bf16 %v5961_v5  ;;  %v5968_v20 = vunpack.i.h.bf16 %v5966_v49  ;;  %v5967_v29 = vunpack.i.l.bf16 %v5966_v49 }
 0x26b   :  { %v2593_v2 = vsel %vm2582_vm6, %v2576_v39, %v5962_v34  ;;  %v2594_v8 = vsel %vm2582_vm6, %v2577_v33, %v5963_v27 }
 0x26c   :  { %6185 = vperm.xlu2 %5388, %v8425_v38   ;;  %v2610_v45 = vsel %vm2599_vm7, %v2593_v2, %v5967_v29  ;;  %v2611_v18 = vsel %vm2599_vm7, %v2594_v8, %v5968_v20 }
 0x26d   :  { %v2627_v6 = vsel %vm2616_vm8, %v2610_v45, %v5972_v28  ;;  %v2628_v25 = vsel %vm2616_vm8, %v2611_v18, %v5973_v22  ;;  %v6018_v45 = vunpack.i.h.bf16 %v7666_v37  ;;  %v6017_v18 = vunpack.i.l.bf16 %v7666_v37 }
 0x26e   :  { %6175 = vperm.xlu0 %5386, %v8427_v16   ;;  %6150 = vperm.xlu1 %5387, %v6149_v56   ;;  %v6031_v11 = vpop.permute.xlu2 %6030 }
 0x26f   :  { %v6032_v37 = vunpack.i.l.bf16 %v6031_v11 }
 0x270   :  { %v5981_v60 = vpop.permute.xlu1 %5980  ;;  %v5976_v32 = vpop.permute.xlu0 %5975 }
 0x271   :  { %v5983_v24 = vunpack.i.h.bf16 %v5981_v60  ;;  %v5982_v52 = vunpack.i.l.bf16 %v5981_v60  ;;  %v5978_v31 = vunpack.i.h.bf16 %v5976_v32  ;;  %v5977_v15 = vunpack.i.l.bf16 %v5976_v32 }
 0x273   :  { %v2644_v61 = vsel %vm8428_vm3, %v2627_v6, %v5977_v15  ;;  %v2645_v26 = vsel %vm8429_vm10, %v2628_v25, %v5978_v31  ;;  %vm8433_vm3 = vcmask 56320  }
 0x274   :  { %v2661_v43 = vsel %vm2650_vm2, %v2644_v61, %v5982_v52  ;;  %v2662_v7 = vsel %vm2650_vm2, %v2645_v26, %v5983_v24  ;;  %vm8434_vm10 = vmmov %vm8433_vm3  ;;  %v6033_v26 = vunpack.i.h.bf16 %v6031_v11 }
 0x275   :  { %v2774_v4 = vsel %vm2763_vm11, %v2661_v43, %v5987_v10  ;;  %v2775_v58 = vsel %vm2763_vm11, %v2662_v7, %v5988_v12 }
 0x276   :  { %6165 = vperm.xlu1 %5387, %v8430_v53   ;;  %v7688_v54 = vpack.c.bf16 %v2775_v58, %v2774_v4  ;;  %v7695_v48 = vpop.permute.xlu2 %6045 }
 0x277   :  { %5012 = vmatmul.msk.bf16.gmra.mxu2 %vm2884_vm9, %v7615_v57  ;;  %5112 = vmatmul.msk.bf16.gmra.mxu1 %vm2884_vm9, %v7615_v57 }
 0x278   :  { %v5996_v30 = vpop.permute.xlu1 %5995  ;;  %8431 = vst [vmem:[#allocation19_spill] sm:$0xff] %v7688_v54  ;;  %v5991_v19 = vpop.permute.xlu0 %5990 }
 0x279   :  { %v5993_v40 = vunpack.i.h.bf16 %v5991_v19  ;;  %v5992_v13 = vunpack.i.l.bf16 %v5991_v19  ;;  %v5998_v47 = vunpack.i.h.bf16 %v5996_v30  ;;  %v5997_v49 = vunpack.i.l.bf16 %v5996_v30 }
 0x27b   :  { %v2427_v1 = vsel %vm2413_vm13, 1.0, %v5993_v40  ;;  %v2426_v51 = vsel %vm2413_vm13, 1.0, %v5992_v13 }
 0x27c   :  { %v2444_v41 = vsel %vm2430_vm14, %v2427_v1, %v5998_v47  ;;  %v2443_v5 = vsel %vm2430_vm14, %v2426_v51, %v5997_v49  ;;  %v6048_v47 = vunpack.i.h.bf16 %v7695_v48  ;;  %v6047_v49 = vunpack.i.l.bf16 %v7695_v48 }
 0x27d   :  { %v2461_v14 = vsel %vm2447_vm15, %v2444_v41, %v6003_v3  ;;  %v2460_v27 = vsel %vm2447_vm15, %v2443_v5, %v6002_v50 }
 0x27e   :  { %6180 = vperm.xlu1 %5387, %v8432_v46   ;;  %v6061_v8 = vpop.permute.xlu2 %6060 }
 0x280   :  { %v6011_v62 = vpop.permute.xlu1 %6010  ;;  %v6006_v9 = vpop.permute.xlu0 %6005 }
 0x281   :  { %v6008_v38 = vunpack.i.h.bf16 %v6006_v9  ;;  %v6007_v0 = vunpack.i.l.bf16 %v6006_v9  ;;  %v6013_v34 = vunpack.i.h.bf16 %v6011_v62  ;;  %v6012_v20 = vunpack.i.l.bf16 %v6011_v62 }
 0x283   :  { %v2477_v39 = vsel %vm8363_vm12, %v2460_v27, %v6007_v0  ;;  %v2478_v33 = vsel %vm8363_vm12, %v2461_v14, %v6008_v38  ;;  %vm8435_vm12 = vcmask 64512   ;;  %v6063_v27 = vunpack.i.h.bf16 %v6061_v8 }
 0x284   :  { %v2494_v55 = vsel %vm8364_vm0, %v2477_v39, %v6012_v20  ;;  %v2495_v56 = vsel %vm8364_vm0, %v2478_v33, %v6013_v34  ;;  %vm8436_vm0 = vmmov %vm8435_vm12  ;;  %v6062_v34 = vunpack.i.l.bf16 %v6061_v8 }
 0x285   :  { %v2511_v24 = vsel %vm2498_vm1, %v2494_v55, %v6017_v18  ;;  %v2512_v52 = vsel %vm2498_vm1, %v2495_v56, %v6018_v45 }
 0x286   :  { %v7721_v43 = vpop.permute.xlu2 %6075 }
 0x287   :  { %5013 = vmatmul.msk.bf16.gmra.mxu2 %vm2884_vm9, %v7649_v36  ;;  %5113 = vmatmul.msk.bf16.gmra.mxu1 %vm2884_vm9, %v7649_v36 }
 0x288   :  { %v6026_v29 = vpop.permute.xlu1 %6025  ;;  %v6021_v2 = vpop.permute.xlu0 %6020 }
 0x289   :  { %v6023_v16 = vunpack.i.h.bf16 %v6021_v2  ;;  %v6022_v60 = vunpack.i.l.bf16 %v6021_v2  ;;  %v6028_v22 = vunpack.i.h.bf16 %v6026_v29  ;;  %v6027_v28 = vunpack.i.l.bf16 %v6026_v29 }
 0x28b   :  { %v2528_v32 = vsel %vm8433_vm3, %v2511_v24, %v6022_v60  ;;  %v2529_v31 = vsel %vm8434_vm10, %v2512_v52, %v6023_v16 }
 0x28c   :  { %v2544_v25 = vsel %vm8435_vm12, %v2528_v32, %v6027_v28  ;;  %v2545_v12 = vsel %vm8436_vm0, %v2529_v31, %v6028_v22  ;;  %vm8437_vm12 = vmmov %vm8436_vm0  ;;  %vm8438_vm0 = vcmask 113664  }
 0x28d   :  { %v2561_v58 = vsel %vm2548_vm4, %v2544_v25, %v6032_v37  ;;  %v2562_v53 = vsel %vm2548_vm4, %v2545_v12, %v6033_v26  ;;  %v241_v11 = vsel %vm8437_vm12, %v8426_v35, 0.0  ;;  %vm8439_vm3 = vmmov %vm8438_vm0 }
 0x28e   :  { %v6091_v3 = vpop.permute.xlu2 %6090  ;;  %vm8440_vm10 = vmmov %vm8437_vm12 }
 0x28f   :  { %v244_v8 = vsel %vm8440_vm10, %v8418_v59, 0.0 }
 0x290   :  { %v6041_v15 = vpop.permute.xlu1 %6040  ;;  %v6036_v6 = vpop.permute.xlu0 %6035 }
 0x291   :  { %v6038_v10 = vunpack.i.h.bf16 %v6036_v6  ;;  %v6037_v61 = vunpack.i.l.bf16 %v6036_v6  ;;  %v6043_v7 = vunpack.i.h.bf16 %v6041_v15  ;;  %v6042_v4 = vunpack.i.l.bf16 %v6041_v15  ;;  %v7761_v15 = vld [vmem:[%s8337_s6] ss:$0 sm:$0xff] }
 0x292   :  { %v6077_v6 = vunpack.i.l.bf16 %v7721_v43 }
 0x293   :  { %v2578_v30 = vsel %vm2565_vm5, %v2561_v58, %v6037_v61  ;;  %v2579_v19 = vsel %vm2565_vm5, %v2562_v53, %v6038_v10  ;;  %v6078_v10 = vunpack.i.h.bf16 %v7721_v43  ;;  %v7773_v53 = vadd.f32 %v7761_v15, %v7590_v44 }
 0x294   :  { %v2595_v40 = vsel %vm2582_vm6, %v2578_v30, %v6042_v4  ;;  %v2596_v13 = vsel %vm2582_vm6, %v2579_v19, %v6043_v7 }
 0x295   :  { %v2612_v5 = vsel %vm2599_vm7, %v2595_v40, %v6047_v49  ;;  %v2613_v38 = vsel %vm2599_vm7, %v2596_v13, %v6048_v47  ;;  %v6092_v40 = vunpack.i.l.bf16 %v6091_v3  ;;  %v2980_v47 = vperm.slane %v7773_v53, 0 }
 0x296   :  { %v6106_v60 = vpop.permute.xlu2 %6105 }
 0x297   :  { %5014 = vmatmul.msk.bf16.gmra.mxu2 %vm2884_vm9, %v7688_v54  ;;  %5114 = vmatmul.msk.bf16.gmra.mxu1 %vm2884_vm9, %v7688_v54 }
 0x298   :  { %v6056_v46 = vpop.permute.xlu1 %6055  ;;  %242 = vadd.xlane.f32.xlu0 %v241_v11  ;;  %v6051_v62 = vpop.permute.xlu0 %6050 }
 0x299   :  { %v6053_v1 = vunpack.i.h.bf16 %v6051_v62  ;;  %v6052_v51 = vunpack.i.l.bf16 %v6051_v62  ;;  %v6058_v9 = vunpack.i.h.bf16 %v6056_v46  ;;  %v6057_v41 = vunpack.i.l.bf16 %v6056_v46 }
 0x29a   :  { %v6093_v62 = vunpack.i.h.bf16 %v6091_v3 }
 0x29b   :  { %v2629_v35 = vsel %vm2616_vm8, %v2612_v5, %v6052_v51  ;;  %v2630_v0 = vsel %vm2616_vm8, %v2613_v38, %v6053_v1 }
 0x29c   :  { %v2646_v50 = vsel %vm8438_vm0, %v2629_v35, %v6057_v41  ;;  %v2647_v14 = vsel %vm8439_vm3, %v2630_v0, %v6058_v9  ;;  %v2966_v0 = vrot.slane %v7773_v53, 1 }
 0x29d   :  { %v2663_v39 = vsel %vm2650_vm2, %v2646_v50, %v6062_v34  ;;  %v2664_v33 = vsel %vm2650_vm2, %v2647_v14, %v6063_v27  ;;  %v6107_v14 = vunpack.i.l.bf16 %v6106_v60 }
 0x29e   :  { %v7755_v22 = vpop.permute.xlu2 %6120 }
 0x2a0   :  { %v6066_v48 = vpop.permute.xlu0 %6065  ;;  %v6071_v16 = vpop.permute.xlu1 %6070 }
 0x2a1   :  { %v6068_v20 = vunpack.i.h.bf16 %v6066_v48  ;;  %v6067_v29 = vunpack.i.l.bf16 %v6066_v48  ;;  %v6072_v28 = vunpack.i.l.bf16 %v6071_v16  ;;  %v6073_v52 = vunpack.i.h.bf16 %v6071_v16 }
 0x2a2   :  { %v6108_v48 = vunpack.i.h.bf16 %v6106_v60 }
 0x2a3   :  { %v2776_v2 = vsel %vm2763_vm11, %v2663_v39, %v6067_v29  ;;  %v2777_v55 = vsel %vm2763_vm11, %v2664_v33, %v6068_v20  ;;  %v2428_v32 = vsel %vm2413_vm13, 1.0, %v6072_v28  ;;  %v2429_v59 = vsel %vm2413_vm13, 1.0, %v6073_v52 }
 0x2a4   :  { %v7747_v56 = vpack.c.bf16 %v2777_v55, %v2776_v2  ;;  %v2445_v26 = vsel %vm2430_vm14, %v2428_v32, %v6077_v6  ;;  %v2446_v7 = vsel %vm2430_vm14, %v2429_v59, %v6078_v10  ;;  %vm8441_vm13 = vcmask 31744  }
 0x2a5   :  { %vm8442_vm12 = vmmov %vm8441_vm13  ;;  %vm8443_vm14 = vcmask 39936   ;;  %v2981_v55 = vperm.slane %v2966_v0, 0  ;;  %v2967_v28 = vrot.slane %v7773_v53, 2 }
 0x2a6   :  { %v7766_v61 = vpop.permute.xlu2 %6135  ;;  %vm8444_vm0 = vmmov %vm8443_vm14 }
 0x2a7   :  { %5015 = vmatmul.msk.bf16.gmra.mxu2 %vm2884_vm9, %v7747_v56  ;;  %5115 = vmatmul.msk.bf16.gmra.mxu1 %vm2884_vm9, %v7747_v56 }
 0x2a8   :  { %245 = vadd.xlane.f32.xlu1 %v244_v8  ;;  %v6081_v45 = vpop.permute.xlu0 %6080  ;;  %v6086_v18 = vpop.permute.xlu1 %6085 }
 0x2a9   :  { %v6082_v31 = vunpack.i.l.bf16 %v6081_v45  ;;  %v6083_v25 = vunpack.i.h.bf16 %v6081_v45  ;;  %v6087_v37 = vunpack.i.l.bf16 %v6086_v18  ;;  %v6088_v4 = vunpack.i.h.bf16 %v6086_v18 }
 0x2ab   :  { %v2462_v58 = vsel %vm2447_vm15, %v2445_v26, %v6082_v31  ;;  %v2463_v30 = vsel %vm2447_vm15, %v2446_v7, %v6083_v25  ;;  %vm8445_vm15 = vcmask 56320   ;;  %v6122_v31 = vunpack.i.l.bf16 %v7755_v22 }
 0x2ac   :  { %v2479_v11 = vsel %vm8441_vm13, %v2462_v58, %v6087_v37  ;;  %v2480_v13 = vsel %vm8442_vm12, %v2463_v30, %v6088_v4  ;;  %vm8446_vm3 = vmmov %vm8445_vm15  ;;  %v6123_v25 = vunpack.i.h.bf16 %v7755_v22  ;;  %v2982_v37 = vperm.slane %v2967_v28, 0  ;;  %v5204_v22 = vld [vmem:[%s8336_s5 + $0x20] sm:$0x3] }
 0x2ad   :  { %v2496_v1 = vsel %vm8443_vm14, %v2479_v11, %v6092_v40  ;;  %v2497_v44 = vsel %vm8444_vm0, %v2480_v13, %v6093_v62 }
 0x2ae   :  { %v7782_v5 = vpop.permute.xlu2 %3014 }
 0x2af   :  { %v3020_v35 = vadd.f32 %v7782_v5, %v2980_v47  ;;  %v3021_v32 = vadd.f32 %v7782_v5, %v2981_v55  ;;  %v3022_v40 = vadd.f32 %v7782_v5, %v2982_v37  ;;  %v4287_v47 = vunpack.c.l.b16 %v5204_v22 }
 0x2b0   :  { %v6096_v24 = vpop.permute.xlu0 %6095  ;;  %v6101_v12 = vpop.permute.xlu1 %6100  ;;  %v2969_v55 = vrot.slane %v7773_v53, 4 }
 0x2b1   :  { %v6097_v43 = vunpack.i.l.bf16 %v6096_v24  ;;  %v6098_v46 = vunpack.i.h.bf16 %v6096_v24  ;;  %v6102_v49 = vunpack.i.l.bf16 %v6101_v12  ;;  %v6103_v51 = vunpack.i.h.bf16 %v6101_v12 }
 0x2b3   :  { %v2513_v9 = vsel %vm2498_vm1, %v2496_v1, %v6097_v43  ;;  %v2514_v38 = vsel %vm2498_vm1, %v2497_v44, %v6098_v46  ;;  %vm8447_vm1 = vmmov %vm8440_vm10  ;;  %v6137_v1 = vunpack.i.l.bf16 %v7766_v61  ;;  %v2968_v44 = vrot.slane %v7773_v53, 3 }
 0x2b4   :  { %v2530_v3 = vsel %vm8445_vm15, %v2513_v9, %v6102_v49  ;;  %v2531_v27 = vsel %vm8446_vm3, %v2514_v38, %v6103_v51  ;;  %v6138_v49 = vunpack.i.h.bf16 %v7766_v61  ;;  %v4289_v9 = vpack.c.b16 %v4287_v47, %v4287_v47 }
 0x2b5   :  { %v2546_v33 = vsel %vm8440_vm10, %v2530_v3, %v6107_v14  ;;  %v2547_v8 = vsel %vm8447_vm1, %v2531_v27, %v6108_v48 }
 0x2b8   :  { %v6111_v19 = vpop.permute.xlu0 %6110  ;;  %v6116_v41 = vpop.permute.xlu1 %6115 }
 0x2b9   :  { %v6112_v50 = vunpack.i.l.bf16 %v6111_v19  ;;  %v6113_v34 = vunpack.i.h.bf16 %v6111_v19  ;;  %v6117_v39 = vunpack.i.l.bf16 %v6116_v41  ;;  %v6118_v16 = vunpack.i.h.bf16 %v6116_v41 }
 0x2bb   :  { %v2563_v45 = vsel %vm2548_vm4, %v2546_v33, %v6112_v50  ;;  %v2564_v18 = vsel %vm2548_vm4, %v2547_v8, %v6113_v34  ;;  %vm8448_vm4 = vcmask 113664   ;;  %v7821_v34 = vand.u32 %v4289_v9, %v7435_v17  ;;  %v5348_v17 = vld [vmem:[%s8336_s5 + $0x18] sm:$0xff] }
 0x2bc   :  { %v2580_v24 = vsel %vm2565_vm5, %v2563_v45, %v6117_v39  ;;  %v2581_v6 = vsel %vm2565_vm5, %v2564_v18, %v6118_v16  ;;  %vm8449_vm5 = vmmov %vm8448_vm4  ;;  %v2984_v8 = vperm.slane %v2969_v55, 0  ;;  %v2970_v18 = vrot.slane %v7773_v53, 5 }
 0x2bd   :  { %v2597_v10 = vsel %vm2582_vm6, %v2580_v24, %v6122_v31  ;;  %v2598_v4 = vsel %vm2582_vm6, %v2581_v6, %v6123_v25  ;;  %8450 = vst [vmem:[#allocation20_spill] sm:$0xff] %v7821_v34  ;;  %5369 = vmatpush.bf16.msrb.mxu2 %v7821_v34 }
 0x2be   :  { %v3024_v45 = vadd.f32 %v7782_v5, %v2984_v8 }
 0x2c0   :  { %v6126_v20 = vpop.permute.xlu0 %6125  ;;  %v6131_v60 = vpop.permute.xlu1 %6130 }
 0x2c1   :  { %v6127_v52 = vunpack.i.l.bf16 %v6126_v20  ;;  %v6128_v59 = vunpack.i.h.bf16 %v6126_v20  ;;  %v6132_v12 = vunpack.i.l.bf16 %v6131_v60  ;;  %v6133_v7 = vunpack.i.h.bf16 %v6131_v60  ;;  %5371 = vmatpush.bf16.msrb.mxu2 %v5348_v17 }
 0x2c2   :  { %v2985_v60 = vperm.slane %v2970_v18, 0 }
 0x2c3   :  { %v2614_v58 = vsel %vm2599_vm7, %v2597_v10, %v6127_v52  ;;  %v2615_v19 = vsel %vm2599_vm7, %v2598_v4, %v6128_v59 }
 0x2c4   :  { %v2631_v43 = vsel %vm2616_vm8, %v2614_v58, %v6132_v12  ;;  %v2632_v13 = vsel %vm2616_vm8, %v2615_v19, %v6133_v7  ;;  %v3025_v52 = vadd.f32 %v7782_v5, %v2985_v60  ;;  %v2972_v12 = vrot.slane %v7773_v53, 7 }
 0x2c5   :  { %v2648_v41 = vsel %vm8448_vm4, %v2631_v43, %v6137_v1  ;;  %v2649_v38 = vsel %vm8449_vm5, %v2632_v13, %v6138_v49  ;;  %v7850_v43 = vpop.permute.xlu2 %6155  ;;  %vm3368_vm4 = vcmask 1041409  }
 0x2c6   :  { %v2987_v37 = vperm.slane %v2972_v12, 0 }
 0x2c8   :  { %v6141_v11 = vpop.permute.xlu0 %6140  ;;  %v3027_v7 = vadd.f32 %v7782_v5, %v2987_v37 }
 0x2c9   :  { %v6143_v46 = vunpack.i.h.bf16 %v6141_v11  ;;  %v6142_v62 = vunpack.i.l.bf16 %v6141_v11 }
 0x2ca   :  { %v2924_v29 = vpop.f32.mrf.mxu2 }
 0x2cb   :  { %v7790_v2 = vadd.f32 %v3020_v35, %v2924_v29  ;;  %v2665_v50 = vsel %vm2650_vm2, %v2648_v41, %v6142_v62  ;;  %v2666_v14 = vsel %vm2650_vm2, %v2649_v38, %v6143_v46  ;;  %v2983_v29 = vperm.slane %v2968_v44, 0 }
 0x2cc   :  { %vm8452_vm2 = vcmask 523264  }
 0x2cd   :  { %v3023_v39 = vadd.f32 %v7782_v5, %v2983_v29  ;;  %v3052_v1 = vmax.f32 %v7790_v2, 0.0  ;;  %vm8453_vm6 = vmmov %vm8452_vm2 }
 0x2ce   :  { %vm8454_vm7 = vmmov %vm8452_vm2 }
 0x2cf   :  { %vm8455_vm8 = vmmov %vm8452_vm2 }
 0x2d0   :  { %vm8457_vm13 = vmmov %vm8452_vm2 }
 0x2d1   :  { %vm8458_vm12 = vmmov %vm8452_vm2 }
 0x2d2   :  { %v2926_v26 = vpop.f32.mrf.mxu2  ;;  %vm8459_vm14 = vmmov %vm8452_vm2 }
 0x2d3   :  { %v7804_v30 = vadd.f32 %v3021_v32, %v2926_v26  ;;  %v2971_v32 = vrot.slane %v7773_v53, 6  ;;  %v7858_v53 = vpop.permute.xlu2 %6170  ;;  %vm8460_vm0 = vmmov %vm8452_vm2 }
 0x2d4   :  { %vm8461_vm15 = vmmov %vm8460_vm0 }
 0x2d5   :  { %v2986_v59 = vperm.slane %v2971_v32, 0  ;;  %vm8462_vm3 = vmmov %vm8460_vm0 }
 0x2d6   :  { %vm8463_vm10 = vmmov %vm8460_vm0 }
 0x2d7   :  { %v3026_v25 = vadd.f32 %v7782_v5, %v2986_v59  ;;  %vm8464_vm1 = vmmov %vm8460_vm0 }
 0x2d8   :  { %v6146_v51 = vpop.permute.xlu1 %6145  ;;  %vm8465_vm5 = vmmov %vm8460_vm0 }
 0x2d9   :  { %v6148_v35 = vunpack.i.h.bf16 %v6146_v51  ;;  %v6147_v0 = vunpack.i.l.bf16 %v6146_v51  ;;  %v3053_v51 = vmax.f32 %v7804_v30, 0.0 }
 0x2da   :  { %v2929_v3 = vpop.f32.mrf.mxu2 }
 0x2db   :  { %v3038_v27 = vadd.f32 %v3022_v40, %v2929_v3  ;;  %v2778_v61 = vsel %vm2763_vm11, %v2665_v50, %v6147_v0  ;;  %v2779_v48 = vsel %vm2763_vm11, %v2666_v14, %v6148_v35  ;;  %v7880_v3 = vunpack.i.l.bf16 %v7858_v53  ;;  %v7895_v55 = vpop.permute.xlu2 %6185  ;;  %vm8456_vm11 = vmmov %vm8452_vm2 }
 0x2dc   :  { %v7825_v20 = vpack.c.bf16 %v2779_v48, %v2778_v61 }
 0x2dd   :  { %v3054_v46 = vmax.f32 %v3038_v27, 0.0 }
 0x2de   :  { %8451 = vst [vmem:[#allocation21_spill] sm:$0xff] %v7825_v20  ;;  %5016 = vmatmul.msk.bf16.gmra.mxu2 %vm2884_vm9, %v7825_v20  ;;  %5116 = vmatmul.msk.bf16.gmra.mxu1 %vm2884_vm9, %v7825_v20 }
 0x2e0   :  { %v6151_v11 = vpop.permute.xlu1 %6150 }
 0x2e1   :  { %v7862_v5 = vunpack.i.h.bf16 %v6151_v11  ;;  %v7864_v47 = vunpack.i.l.bf16 %v6151_v11 }
 0x2e2   :  { %v2931_v33 = vpop.f32.mrf.mxu2 }
 0x2e3   :  { %v3039_v16 = vadd.f32 %v3023_v39, %v2931_v33  ;;  %v3180_v35 = vmul.f32 %v7864_v47, %v3052_v1  ;;  %v3181_v0 = vmul.f32 %v7862_v5, %v3053_v51 }
 0x2e5   :  { %v3055_v50 = vmax.f32 %v3039_v16, 0.0  ;;  %v3196_v39 = vsel %vm8453_vm6, %v3180_v35, 0.0  ;;  %v3203_v17 = vsel %vm8454_vm7, %v3181_v0, 0.0  ;;  %vm3372_vm6 = vcmask 1043459  }
 0x2e6   :  { %v3204_v60 = vrot.slane %v3203_v17, 4  ;;  %vm3374_vm7 = vcmask 1044484  }
 0x2e8   :  { %v7856_v13 = vpop.permute.xlu1 %6165 }
 0x2e9   :  { %v7873_v9 = vunpack.i.l.bf16 %v7856_v13 }
 0x2ea   :  { %v2934_v28 = vpop.f32.mrf.mxu2 }
 0x2eb   :  { %v3040_v24 = vadd.f32 %v3024_v45, %v2934_v28  ;;  %v3183_v48 = vmul.f32 %v7873_v9, %v3055_v50 }
 0x2ed   :  { %v3056_v41 = vmax.f32 %v3040_v24, 0.0  ;;  %v3197_v24 = vrot.slane %v3196_v39, 4 }
 0x2ee   :  { %5215 = vmatmul.msk.bf16.vlgmr.msrb.gmra.mxu2 %vm2884_vm9, %v7747_v56  ;;  %v7848_v56 = vpop.permute.xlu0 %3016 }
 0x2ef   :  { %v3184_v29 = vmul.f32 %v7880_v3, %v3056_v41 }
 0x2f0   :  { %v7882_v14 = vpop.permute.xlu1 %6180 }
 0x2f1   :  { %v7893_v33 = vunpack.i.l.bf16 %v7882_v14  ;;  %v3224_v32 = vsel %vm8456_vm11, %v3184_v29, 0.0  ;;  %vm3378_vm11 = vcmask 1046534  }
 0x2f2   :  { %v2936_v31 = vpop.f32.mrf.mxu2  ;;  %v3225_v12 = vrot.slane %v3224_v32, 4 }
 0x2f3   :  { %v3041_v6 = vadd.f32 %v3025_v52, %v2936_v31  ;;  %v3217_v52 = vsel %vm8455_vm8, %v3183_v48, 0.0  ;;  %v7905_v31 = vadd.f32 %v7761_v15, %v7620_v63  ;;  %vm3376_vm8 = vcmask 1045509  }
 0x2f4   :  { %v3226_v1 = vadd.f32 %v3225_v12, %v3224_v32 }
 0x2f5   :  { %v3057_v2 = vmax.f32 %v3041_v6, 0.0  ;;  %v7908_v6 = vunpack.i.l.bf16 %v7895_v55  ;;  %v2973_v11 = vrot.slane %v7905_v31, 1  ;;  %v2974_v63 = vrot.slane %v7905_v31, 2 }
 0x2f6   :  { %v7854_v22 = vpop.permute.xlu0 %6160 }
 0x2f7   :  { %v7867_v49 = vunpack.i.l.bf16 %v7854_v22 }
 0x2f9   :  { %v3182_v44 = vmul.f32 %v7867_v49, %v3054_v46 }
 0x2fa   :  { %v2939_v10 = vpop.f32.mrf.mxu2 }
 0x2fb   :  { %v3042_v26 = vadd.f32 %v3026_v25, %v2939_v10  ;;  %v3210_v27 = vsel %vm8452_vm2, %v3182_v44, 0.0  ;;  %v3218_v25 = vrot.slane %v3217_v52, 4  ;;  %vm3370_vm2 = vcmask 1042434  }
 0x2fc   :  { %v3211_v45 = vrot.slane %v3210_v27, 4 }
 0x2fd   :  { %v3058_v30 = vmax.f32 %v3042_v26, 0.0  ;;  %v3219_v15 = vadd.f32 %v3218_v25, %v3217_v52 }
 0x2fe   :  { %v7875_v38 = vpop.permute.xlu0 %6175  ;;  %v3212_v37 = vadd.f32 %v3211_v45, %v3210_v27  ;;  %v2975_v27 = vrot.slane %v7905_v31, 3  ;;  %v3227_v45 = vrot.slane %v3226_v1, 2 }
 0x2ff   :  { %v7886_v61 = vunpack.i.l.bf16 %v7875_v38  ;;  %v3186_v18 = vmul.f32 %v7893_v33, %v3058_v30  ;;  %v2989_v30 = vperm.slane %v2973_v11, 0  ;;  %v7924_v11 = vunpack.i.h.bf16 %v7850_v43 }
 0x300   :  { %v3213_v44 = vrot.slane %v3212_v37, 2  ;;  %v2991_v25 = vperm.slane %v2975_v27, 0 }
 0x301   :  { %v3185_v16 = vmul.f32 %v7886_v61, %v3057_v2  ;;  %v3238_v10 = vsel %vm8458_vm12, %v3186_v18, 0.0  ;;  %v2988_v2 = vperm.slane %v7905_v31, 0  ;;  %v2977_v18 = vrot.slane %v7905_v31, 5  ;;  %vm8466_vm12 = vmmov %vm8460_vm0 }
 0x302   :  { %v2941_v4 = vpop.f32.mrf.mxu2  ;;  %v3239_v46 = vrot.slane %v3238_v10, 4 }
 0x303   :  { %v3043_v58 = vadd.f32 %v3027_v7, %v2941_v4  ;;  %v3231_v59 = vsel %vm8457_vm13, %v3185_v16, 0.0  ;;  %v3198_v7 = vadd.f32 %v3197_v24, %v3196_v39  ;;  %v3205_v4 = vadd.f32 %v3204_v60, %v3203_v17 }
 0x304   :  { %v3240_v48 = vadd.f32 %v3239_v46, %v3238_v10  ;;  %v2990_v39 = vperm.slane %v2974_v63, 0  ;;  %v2976_v17 = vrot.slane %v7905_v31, 4  ;;  %v3220_v16 = vrot.slane %v3219_v15, 2 }
 0x305   :  { %v3059_v28 = vmax.f32 %v3043_v58, 0.0  ;;  %v3232_v58 = vrot.slane %v3231_v59, 4  ;;  %v3199_v41 = vrot.slane %v3198_v7, 2  ;;  %v3206_v35 = vrot.slane %v3205_v4, 2 }
 0x306   :  { %v3028_v32 = vadd.f32 %v7848_v56, %v2988_v2  ;;  %v3241_v12 = vrot.slane %v3240_v48, 2  ;;  %v3030_v10 = vadd.f32 %v7848_v56, %v2990_v39  ;;  %v3221_v46 = vadd.f32 %v3220_v16, %v3219_v15 }
 0x307   :  { %v3187_v26 = vmul.f32 %v7908_v6, %v3059_v28  ;;  %v3233_v50 = vadd.f32 %v3232_v58, %v3231_v59  ;;  %v3214_v28 = vadd.f32 %v3213_v44, %v3212_v37  ;;  %v3200_v24 = vadd.f32 %v3199_v41, %v3198_v7 }
 0x308   :  { %v3207_v60 = vadd.f32 %v3206_v35, %v3205_v4  ;;  %v3029_v59 = vadd.f32 %v7848_v56, %v2989_v30  ;;  %v2992_v58 = vperm.slane %v2976_v17, 0  ;;  %v3228_v63 = vadd.f32 %v3227_v45, %v3226_v1 }
 0x309   :  { %v3245_v51 = vsel %vm8459_vm14, %v3187_v26, 0.0  ;;  %v3234_v52 = vrot.slane %v3233_v50, 2  ;;  %v2993_v20 = vperm.slane %v2977_v18, 0  ;;  %v7927_v37 = vunpack.i.l.bf16 %v7850_v43  ;;  %vm8468_vm14 = vmmov %vm8460_vm0 }
 0x30a   :  { %v7846_v19 = vpop.f32.mrf.mxu2  ;;  %v3246_v29 = vrot.slane %v3245_v51, 4  ;;  %v3215_v41 = vrot.slane %v3214_v28, 1  ;;  %v3031_v2 = vadd.f32 %v7848_v56, %v2991_v25  ;;  %v3201_v30 = vrot.slane %v3200_v24, 1 }
 0x30b   :  { %v3044_v7 = vadd.f32 %v3028_v32, %v7846_v19  ;;  %v3235_v35 = vadd.f32 %v3234_v52, %v3233_v50  ;;  %v3242_v27 = vadd.f32 %v3241_v12, %v3240_v48  ;;  %v3032_v15 = vadd.f32 %v7848_v56, %v2992_v58 }
 0x30c   :  { %v3247_v26 = vadd.f32 %v3246_v29, %v3245_v51  ;;  %v3208_v51 = vrot.slane %v3207_v60, 1  ;;  %v3222_v39 = vrot.slane %v3221_v46, 1  ;;  %v3229_v43 = vrot.slane %v3228_v63, 1 }
 0x30d   :  { %v3033_v19 = vadd.f32 %v7848_v56, %v2993_v20  ;;  %v7937_v50 = vunpack.i.h.bf16 %v7858_v53  ;;  %v7940_v18 = vunpack.i.h.bf16 %v7854_v22  ;;  %v3236_v48 = vrot.slane %v3235_v35, 1 }
 0x30e   :  { %v3248_v29 = vrot.slane %v3247_v26, 2  ;;  %v3216_v32 = vadd.f32 %v3215_v41, %v3214_v28  ;;  %v3243_v25 = vrot.slane %v3242_v27, 1  ;;  %v3230_v58 = vadd.f32 %v3229_v43, %v3228_v63 }
 0x30f   :  { %v7946_v22 = vunpack.i.h.bf16 %v7875_v38  ;;  %v3237_v28 = vadd.f32 %v3236_v48, %v3235_v35  ;;  %vm3380_vm13 = vcmask 1047559  }
 0x310   :  { %v3249_v12 = vadd.f32 %v3248_v29, %v3247_v26  ;;  %v3310_v26 = vpack.c.bf16 %v3216_v32, %v3216_v32 }
 0x312   :  { %v7852_v40 = vpop.f32.mrf.mxu2  ;;  %v3250_v63 = vrot.slane %v3249_v12, 1 }
 0x313   :  { %v3045_v4 = vadd.f32 %v3029_v59, %v7852_v40  ;;  %v3060_v40 = vmax.f32 %v3044_v7, 0.0  ;;  %v3209_v59 = vadd.f32 %v3208_v51, %v3207_v60 }
 0x315   :  { %v3061_v16 = vmax.f32 %v3045_v4, 0.0  ;;  %v3188_v7 = vmul.f32 %v7927_v37, %v3060_v40 }
 0x317   :  { %v3252_v29 = vsel %vm8460_vm0, %v3188_v7, 0.0 }
 0x318   :  { %v3253_v40 = vrot.slane %v3252_v29, 4 }
 0x31a   :  { %v7860_v62 = vpop.f32.mrf.mxu2 }
 0x31b   :  { %v3046_v44 = vadd.f32 %v3030_v10, %v7860_v62  ;;  %v3202_v10 = vadd.f32 %v3201_v30, %v3200_v24  ;;  %v3309_v24 = vpack.c.bf16 %v3209_v59, %v3209_v59 }
 0x31d   :  { %v3062_v62 = vmax.f32 %v3046_v44, 0.0  ;;  %v7949_v44 = vunpack.i.h.bf16 %v7856_v13  ;;  %v3308_v41 = vpack.c.bf16 %v3202_v10, %v3202_v10  ;;  %v3353_v43 = vunpack.c.l.b16 %v3309_v24 }
 0x31f   :  { %v3190_v53 = vmul.f32 %v7940_v18, %v3062_v62  ;;  %v3352_v48 = vunpack.c.l.b16 %v3308_v41 }
 0x321   :  { %v3266_v38 = vsel %vm8462_vm3, %v3190_v53, 0.0  ;;  %v3254_v53 = vadd.f32 %v3253_v40, %v3252_v29  ;;  %v3369_v24 = vsel %vm3368_vm4, %v3353_v43, %v3352_v48  ;;  %v5307_v48 = vld [vmem:[#allocation5] sm:$0xff]  ;;  %vm8472_vm3 = vmmov %vm8460_vm0 }
 0x322   :  { %v7898_v8 = vpop.f32.mrf.mxu2  ;;  %v3267_v62 = vrot.slane %v3266_v38, 4 }
 0x323   :  { %v3047_v17 = vadd.f32 %v3031_v2, %v7898_v8  ;;  %v3223_v8 = vadd.f32 %v3222_v39, %v3221_v46  ;;  %v3244_v46 = vadd.f32 %v3243_v25, %v3242_v27  ;;  %v3312_v2 = vpack.c.bf16 %v3230_v58, %v3230_v58  ;;  %v5310_v25 = vld [vmem:[#allocation5 + $0x18] sm:$0xff] }
 0x324   :  { %v2978_v39 = vrot.slane %v7905_v31, 6  ;;  %v3354_v27 = vunpack.c.l.b16 %v3310_v26  ;;  %3421 = vmatpush.bf16.msra.mxu3 %v5310_v25 }
 0x325   :  { %v3063_v20 = vmax.f32 %v3047_v17, 0.0  ;;  %v3311_v51 = vpack.c.bf16 %v3223_v8, %v3223_v8  ;;  %v3314_v17 = vpack.c.bf16 %v3244_v46, %v3244_v46  ;;  %v3356_v32 = vunpack.c.l.b16 %v3312_v2 }
 0x326   :  { %v2994_v58 = vperm.slane %v2978_v39, 0  ;;  %v3371_v41 = vsel %vm3370_vm2, %v3354_v27, %v3369_v24 }
 0x327   :  { %v3191_v30 = vmul.f32 %v7949_v44, %v3063_v20  ;;  %v3358_v20 = vunpack.c.l.b16 %v3314_v17 }
 0x328   :  { %v3034_v46 = vadd.f32 %v7848_v56, %v2994_v58 }
 0x32a   :  { %v2954_v0 = vpop.f32.mrf.mxu2 }
 0x32b   :  { %v3048_v45 = vadd.f32 %v3032_v15, %v2954_v0  ;;  %v3189_v0 = vmul.f32 %v7924_v11, %v3061_v16 }
 0x32d   :  { %v3064_v4 = vmax.f32 %v3048_v45, 0.0  ;;  %v3259_v15 = vsel %vm8461_vm15, %v3189_v0, 0.0  ;;  %v3273_v45 = vsel %vm8463_vm10, %v3191_v30, 0.0  ;;  %v5308_v30 = vld [vmem:[#allocation5 + $0x8] sm:$0xff]  ;;  %vm8471_vm15 = vmmov %vm8460_vm0 }
 0x32e   :  { %v3260_v16 = vrot.slane %v3259_v15, 4  ;;  %v3274_v7 = vrot.slane %v3273_v45, 4  ;;  %vm8478_vm10 = vmmov %vm8460_vm0 }
 0x32f   :  { %v3192_v13 = vmul.f32 %v7937_v50, %v3064_v4 }
 0x330   :  { %v3261_v4 = vadd.f32 %v3260_v16, %v3259_v15  ;;  %v5318_v16 = vld [vmem:[#allocation8 + $0x18] sm:$0xff] }
 0x331   :  { %v3280_v59 = vsel %vm8464_vm1, %v3192_v13, 0.0  ;;  %3481 = vmatpush.bf16.msrb.mxu0 %v5318_v16  ;;  %vm8479_vm1 = vmmov %vm8460_vm0 }
 0x332   :  { %v2956_v1 = vpop.f32.mrf.mxu2 }
 0x333   :  { %v3049_v52 = vadd.f32 %v3033_v19, %v2956_v1  ;;  %v3313_v1 = vpack.c.bf16 %v3237_v28, %v3237_v28  ;;  %v3251_v19 = vadd.f32 %v3250_v63, %v3249_v12  ;;  %v5309_v12 = vld [vmem:[#allocation5 + $0x10] sm:$0xff]  ;;  %v3268_v28 = vadd.f32 %v3267_v62, %v3266_v38 }
 0x334   :  { %v2979_v63 = vrot.slane %v7905_v31, 7  ;;  %3422 = vmatpush.bf16.msra.mxu3 %v5309_v12  ;;  %v3262_v31 = vrot.slane %v3261_v4, 2  ;;  %v3255_v62 = vrot.slane %v3254_v53, 2 }
 0x335   :  { %v3065_v60 = vmax.f32 %v3049_v52, 0.0  ;;  %v3355_v52 = vunpack.c.l.b16 %v3311_v51  ;;  %v3357_v10 = vunpack.c.l.b16 %v3313_v1  ;;  %v3315_v0 = vpack.c.bf16 %v3251_v19, %v3251_v19 }
 0x336   :  { %v3275_v51 = vadd.f32 %v3274_v7, %v3273_v45  ;;  %v3269_v43 = vrot.slane %v3268_v28, 2  ;;  %v2995_v19 = vperm.slane %v2979_v63, 0 }
 0x337   :  { %v3193_v35 = vmul.f32 %v7946_v22, %v3065_v60  ;;  %v3281_v60 = vrot.slane %v3280_v59, 4  ;;  %v3359_v29 = vunpack.c.l.b16 %v3315_v0  ;;  %v3373_v15 = vsel %vm3372_vm6, %v3355_v52, %v3371_v41 }
 0x338   :  { %v3375_v1 = vsel %vm3374_vm7, %v3356_v32, %v3373_v15  ;;  %v3276_v45 = vrot.slane %v3275_v51, 2  ;;  %3423 = vmatpush.bf16.msra.mxu3 %v5308_v30  ;;  %v3035_v58 = vadd.f32 %v7848_v56, %v2995_v19  ;;  %v7979_v41 = vunpack.i.h.bf16 %v7895_v55 }
 0x339   :  { %v3287_v8 = vsel %vm8465_vm5, %v3193_v35, 0.0  ;;  %v3282_v38 = vadd.f32 %v3281_v60, %v3280_v59  ;;  %v7968_v35 = vunpack.i.h.bf16 %v7882_v14  ;;  %v3377_v27 = vsel %vm3376_vm8, %v3357_v10, %v3375_v1  ;;  %vm8480_vm5 = vmmov %vm8460_vm0 }
 0x33a   :  { %v3288_v26 = vrot.slane %v3287_v8, 4  ;;  %v3379_v40 = vsel %vm3378_vm11, %v3358_v20, %v3377_v27  ;;  %v3263_v59 = vadd.f32 %v3262_v31, %v3261_v4  ;;  %v3270_v10 = vadd.f32 %v3269_v43, %v3268_v28  ;;  %8467 = vst [vmem:[#allocation16_spill] sm:$0xff] %v7979_v41 }
 0x33b   :  { %v7973_v52 = vsel %vm3380_vm13, %v3359_v29, %v3379_v40  ;;  %v3283_v32 = vrot.slane %v3282_v38, 2  ;;  %v3256_v20 = vadd.f32 %v3255_v62, %v3254_v53  ;;  %v3277_v7 = vadd.f32 %v3276_v45, %v3275_v51 }
 0x33c   :  { %v3289_v39 = vadd.f32 %v3288_v26, %v3287_v8  ;;  %3424 = vmatpush.bf16.msra.mxu3 %v5307_v48  ;;  %v3264_v24 = vrot.slane %v3263_v59, 1  ;;  %v3271_v4 = vrot.slane %v3270_v10, 1 }
 0x33d   :  { %v3284_v60 = vadd.f32 %v3283_v32, %v3282_v38  ;;  %v3257_v28 = vrot.slane %v3256_v20, 1  ;;  %v3278_v30 = vrot.slane %v3277_v7, 1 }
 0x33e   :  { %v3290_v25 = vrot.slane %v3289_v39, 2  ;;  %v3265_v53 = vadd.f32 %v3264_v24, %v3263_v59  ;;  %v3272_v1 = vadd.f32 %v3271_v4, %v3270_v10 }
 0x33f   :  { %v3285_v15 = vrot.slane %v3284_v60, 1  ;;  %v3258_v31 = vadd.f32 %v3257_v28, %v3256_v20 }
 0x340   :  { %v3318_v16 = vpack.c.bf16 %v3272_v1, %v3272_v1  ;;  %v5315_v1 = vld [vmem:[#allocation8] sm:$0xff] }
 0x341   :  { %v3286_v55 = vadd.f32 %v3285_v15, %v3284_v60  ;;  %v3316_v45 = vpack.c.bf16 %v3258_v31, %v3258_v31  ;;  %v6197_v31 = vld [vmem:[%s8339_s8] ss:$0 sm:$0xff] }
 0x342   :  { %v3362_v10 = vunpack.c.l.b16 %v3318_v16 }
 0x361   :  { %v2959_v2 = vpop.f32.mrf.mxu2 }
 0x362   :  { %v3050_v13 = vadd.f32 %v3034_v46, %v2959_v2  ;;  %v3291_v46 = vadd.f32 %v3290_v25, %v3289_v39  ;;  %v3279_v39 = vadd.f32 %v3278_v30, %v3277_v7 }
 0x364   :  { %v3066_v17 = vmax.f32 %v3050_v13, 0.0  ;;  %v3292_v51 = vrot.slane %v3291_v46, 1  ;;  %v3319_v48 = vpack.c.bf16 %v3279_v39, %v3279_v39  ;;  %v7995_v39 = vpop.xlane.xlu0 %242 }
 0x365   :  { %8469 = vst [vmem:[#allocation22_spill] sm:$0xff] %v7995_v39 }
 0x366   :  { %v3194_v14 = vmul.f32 %v7968_v35, %v3066_v17  ;;  %v3317_v17 = vpack.c.bf16 %v3265_v53, %v3265_v53  ;;  %v3293_v19 = vadd.f32 %v3292_v51, %v3291_v46  ;;  %v3363_v20 = vunpack.c.l.b16 %v3319_v48  ;;  %v5317_v51 = vld [vmem:[#allocation8 + $0x10] sm:$0xff] }
 0x367   :  { %3482 = vmatpush.bf16.msrb.mxu0 %v5317_v51  ;;  %v5321_v48 = vld [vmem:[#allocation10 + $0x10] sm:$0xff] }
 0x368   :  { %v3294_v8 = vsel %vm8466_vm12, %v3194_v14, 0.0  ;;  %v3320_v14 = vpack.c.bf16 %v3286_v55, %v3286_v55  ;;  %v3361_v59 = vunpack.c.l.b16 %v3317_v17  ;;  %v3321_v25 = vpack.c.bf16 %v3293_v19, %v3293_v19  ;;  %vm8481_vm12 = vmmov %vm8460_vm0 }
 0x369   :  { %v3295_v12 = vrot.slane %v3294_v8, 4  ;;  %v2961_v0 = vpop.f32.mrf.mxu2 }
 0x36a   :  { %v3051_v26 = vadd.f32 %v3035_v58, %v2961_v0  ;;  %v3364_v0 = vunpack.c.l.b16 %v3320_v14  ;;  %v5319_v14 = vld [vmem:[#allocation10] sm:$0xff] }
 0x36b   :  { %v3296_v63 = vadd.f32 %v3295_v12, %v3294_v8  ;;  %v3360_v12 = vunpack.c.l.b16 %v3316_v45  ;;  %v5322_v45 = vld [vmem:[#allocation10 + $0x18] sm:$0xff] }
 0x36c   :  { %v3067_v2 = vmax.f32 %v3051_v26, 0.0  ;;  %v3365_v26 = vunpack.c.l.b16 %v3321_v25  ;;  %3575 = vmatpush.bf16.msrb.mxu3 %v5322_v45  ;;  %v3524_v25 = vpop.f32.mrf.mxu1 }
 0x36d   :  { %v3297_v29 = vrot.slane %v3296_v63, 2  ;;  %v3382_v60 = vsel %vm3368_vm4, %v3361_v59, %v3360_v12  ;;  %v5326_v59 = vld [vmem:[#allocation2 + $0x38] sm:$0xff] }
 0x36e   :  { %v3195_v56 = vmul.f32 %v7979_v41, %v3067_v2  ;;  %v3383_v46 = vsel %vm3370_vm2, %v3362_v10, %v3382_v60 }
 0x36f   :  { %v3298_v13 = vadd.f32 %v3297_v29, %v3296_v63  ;;  %v3384_v2 = vsel %vm3372_vm6, %v3363_v20, %v3383_v46 }
 0x370   :  { %v3301_v38 = vsel %vm8468_vm14, %v3195_v56, 0.0  ;;  %v3385_v28 = vsel %vm3374_vm7, %v3364_v0, %v3384_v2  ;;  %3576 = vmatpush.bf16.msrb.mxu3 %v5321_v48  ;;  %v5323_v2 = vld [vmem:[#allocation2 + $0x20] sm:$0xff]  ;;  %vm8482_vm14 = vmmov %vm8460_vm0 }
 0x371   :  { %v3299_v27 = vrot.slane %v3298_v13, 1  ;;  %v3302_v43 = vrot.slane %v3301_v38, 4  ;;  %v3386_v29 = vsel %vm3376_vm8, %v3365_v26, %v3385_v28 }
 0x373   :  { %v3303_v40 = vadd.f32 %v3302_v43, %v3301_v38  ;;  %v3300_v62 = vadd.f32 %v3299_v27, %v3298_v13  ;;  %v5316_v13 = vld [vmem:[#allocation8 + $0x8] sm:$0xff]  ;;  %v7997_v27 = vpop.xlane.xlu1 %245  ;;  %v3334_v43 = vmul.f32 %v6197_v31, %v7995_v39 }
 0x374   :  { %3483 = vmatpush.bf16.msrb.mxu0 %v5316_v13  ;;  %8470 = vst [vmem:[#allocation23_spill] sm:$0xff] %v7997_v27  ;;  %v3526_v12 = vpop.f32.mrf.mxu1 }
 0x375   :  { %v3304_v32 = vrot.slane %v3303_v40, 2  ;;  %v3322_v58 = vpack.c.bf16 %v3300_v62, %v3300_v62 }
 0x377   :  { %v3305_v8 = vadd.f32 %v3304_v32, %v3303_v40  ;;  %v3366_v63 = vunpack.c.l.b16 %v3322_v58  ;;  %v5320_v32 = vld [vmem:[#allocation10 + $0x8] sm:$0xff]  ;;  %v6200_v58 = vld [vmem:[%s8342_s11] ss:$0 sm:$0xff] }
 0x378   :  { %3484 = vmatpush.bf16.msrb.mxu0 %v5315_v1  ;;  %3577 = vmatpush.bf16.msrb.mxu3 %v5320_v32 }
 0x379   :  { %v3306_v7 = vrot.slane %v3305_v8, 1  ;;  %v3387_v15 = vsel %vm3378_vm11, %v3366_v63, %v3386_v29  ;;  %v5325_v63 = vld [vmem:[#allocation2 + $0x30] sm:$0xff] }
 0x37b   :  { %v3307_v24 = vadd.f32 %v3306_v7, %v3305_v8 }
 0x37c   :  { %3632 = vmatpush.bf16.msra.mxu0 %v5326_v59  ;;  %3578 = vmatpush.bf16.msrb.mxu3 %v5319_v14 }
 0x37d   :  { %v3323_v4 = vpack.c.bf16 %v3307_v24, %v3307_v24 }
 0x37f   :  { %v3367_v30 = vunpack.c.l.b16 %v3323_v4  ;;  %v5324_v4 = vld [vmem:[#allocation2 + $0x28] sm:$0xff] }
 0x380   :  { %3633 = vmatpush.bf16.msra.mxu0 %v5325_v63 }
 0x381   :  { %v3388_v56 = vsel %vm3380_vm13, %v3367_v30, %v3387_v15  ;;  %v8473_v30 = vld [vmem:[#allocation27_spill] sm:$0xff] }
 0x382   :  { %v3389_v53 = vpack.c.b16 %v3388_v56, %v7973_v52  ;;  %v3335_v52 = vmul.f32 %v6197_v31, %v7997_v27  ;;  %v6201_v15 = vld [vmem:[%s8344_s13] ss:$0 sm:$0xff]  ;;  %v3671_v31 = vpop.f32.mrf.mxu1 }
 0x384   :  { %5033 = vmatmul.msk.bf16.vlgmr.msra.gmra.mxu3 %vm8460_vm0, %v3389_v53  ;;  %3634 = vmatpush.bf16.msra.mxu0 %v5324_v4  ;;  %v8474_v53 = vld [vmem:[#allocation28_spill] sm:$0xff] }
 0x385   :  { %4050 = vmatpush.bf16.msra.mxu3 %v5331_v23 }
 0x388   :  { %3635 = vmatpush.bf16.msra.mxu0 %v5323_v2 }
 0x407   :  { %v3426_v38 = vpop.f32.mrf.mxu3 }
 0x408   :  { %v3427_v55 = vadd.f32 %v3426_v38, %v3334_v43  ;;  %v3673_v43 = vpop.f32.mrf.mxu1 }
 0x40a   :  { %v3431_v40 = vmul.f32 0.25, %v3427_v55 }
 0x40f   :  { %v3428_v17 = vpop.f32.mrf.mxu3 }
 0x410   :  { %v3429_v19 = vadd.f32 %v3428_v17, %v3335_v52  ;;  %v3676_v52 = vpop.f32.mrf.mxu1 }
 0x412   :  { %v3432_v16 = vmul.f32 0.25, %v3429_v19 }
 0x414   :  { %v3441_v62 = vpack.c.bf16 %v3432_v16, %v3431_v40 }
 0x416   :  { %5050 = vmatmul.msk.bf16.vlgmr.msrb.gmra.mxu0 %vm8471_vm15, %v3441_v62  ;;  %vm8483_vm15 = vmmov %vm8460_vm0 }
 0x418   :  { %v3678_v55 = vpop.f32.mrf.mxu1 }
 0x420   :  { %v3681_v19 = vpop.f32.mrf.mxu1 }
 0x428   :  { %v3683_v16 = vpop.f32.mrf.mxu1 }
 0x430   :  { %v3686_v62 = vpop.f32.mrf.mxu1 }
 0x438   :  { %v3688_v45 = vpop.f32.mrf.mxu1 }
 0x440   :  { %v8023_v48 = vpop.f32.mrf.mxu1 }
 0x448   :  { %v8025_v32 = vpop.f32.mrf.mxu1 }
 0x450   :  { %v8027_v14 = vpop.f32.mrf.mxu1 }
 0x458   :  { %v8029_v59 = vpop.f32.mrf.mxu1 }
 0x493   :  { %v3486_v8 = vpop.f32.mrf.mxu0 }
 0x494   :  { %v3525_v10 = vadd.f32 %v3524_v25, %v3486_v8  ;;  %v6202_v25 = vld [vmem:[%s8337_s6 + $0x1] ss:$0 sm:$0xff] }
 0x496   :  { %v3531_v7 = vadd.f32 %v6200_v58, %v3525_v10 }
 0x498   :  { %v3533_v26 = vmax.f32 %v3531_v7, 0.0 }
 0x49b   :  { %v3488_v20 = vpop.f32.mrf.mxu0 }
 0x49c   :  { %v3527_v0 = vadd.f32 %v3526_v12, %v3488_v20 }
 0x49e   :  { %v3532_v60 = vadd.f32 %v6200_v58, %v3527_v0 }
 0x4a0   :  { %v3534_v24 = vmax.f32 %v3532_v60, 0.0 }
 0x4a2   :  { %v3535_v46 = vpack.c.bf16 %v3534_v24, %v3533_v26  ;;  %v8034_v26 = vpop.f32.mrf.mxu1 }
 0x4a4   :  { %5084 = vmatmul.msk.bf16.vlgmr.msrb.gmra.mxu3 %vm8472_vm3, %v3535_v46  ;;  %vm8485_vm3 = vmmov %vm8460_vm0 }
 0x527   :  { %v3580_v28 = vpop.f32.mrf.mxu3 }
 0x528   :  { %v3585_v29 = vadd.f32 %v3580_v28, %v8473_v30 }
 0x52a   :  { %v8011_v13 = vadd.f32 %v6201_v15, %v3585_v29 }
 0x52c   :  { %8475 = vst [vmem:[#allocation24_spill] sm:$0xff] %v8011_v13 }
 0x52f   :  { %v3582_v56 = vpop.f32.mrf.mxu3 }
 0x530   :  { %v3586_v51 = vadd.f32 %v3582_v56, %v8474_v53 }
 0x532   :  { %v8013_v1 = vadd.f32 %v6201_v15, %v3586_v51 }
 0x534   :  { %8476 = vst [vmem:[#allocation27_spill] sm:$0xff] %v8013_v1  ;;  %v8017_v38 = vpack.c.bf16 %v8013_v1, %v8011_v13 }
 0x536   :  { %8477 = vst [vmem:[#allocation28_spill] sm:$0xff] %v8017_v38  ;;  %5101 = vmatmul.msk.bf16.vlgmr.msra.gmra.mxu0 %vm8478_vm10, %v8017_v38  ;;  %vm8486_vm10 = vmmov %vm8460_vm0 }
 0x5b3   :  { %v3637_v17 = vpop.f32.mrf.mxu0 }
 0x5b4   :  { %3761 = vrot.lane.b32.xlu2 %v3637_v17, %s6409_s29  ;;  %v3644_v8 = vadd.f32 %v6202_v25, %v3637_v17 }
 0x5b6   :  { %v3713_v10 = vrot.slane %v3644_v8, 1  ;;  %v3714_v58 = vrot.slane %v3644_v8, 2  ;;  %v3715_v12 = vrot.slane %v3644_v8, 3  ;;  %v3716_v20 = vrot.slane %v3644_v8, 4 }
 0x5b7   :  { %v3717_v7 = vrot.slane %v3644_v8, 5  ;;  %v3718_v0 = vrot.slane %v3644_v8, 6  ;;  %v3719_v60 = vrot.slane %v3644_v8, 7  ;;  %v3727_v46 = vperm.slane %v3644_v8, 0  ;;  %v8046_v8 = vpop.f32.mrf.mxu1 }
 0x5b8   :  { %v3728_v63 = vperm.slane %v3713_v10, 0  ;;  %v3729_v4 = vperm.slane %v3714_v58, 0  ;;  %v3730_v2 = vperm.slane %v3715_v12, 0  ;;  %v3731_v28 = vperm.slane %v3716_v20, 0 }
 0x5b9   :  { %v3732_v30 = vperm.slane %v3717_v7, 0  ;;  %v3733_v29 = vperm.slane %v3718_v0, 0  ;;  %v3734_v15 = vperm.slane %v3719_v60, 0 }
 0x5bb   :  { %v3639_v40 = vpop.f32.mrf.mxu0 }
 0x5bc   :  { %3763 = vrot.lane.b32.xlu2 %v3639_v40, %s6409_s29  ;;  %v8036_v24 = vadd.f32 %v6202_v25, %v3639_v40 }
 0x5be   :  { %v3720_v56 = vrot.slane %v8036_v24, 1  ;;  %v3721_v53 = vrot.slane %v8036_v24, 2  ;;  %v3722_v51 = vrot.slane %v8036_v24, 3  ;;  %v3723_v17 = vrot.slane %v8036_v24, 4 }
 0x5bf   :  { %v3724_v40 = vrot.slane %v8036_v24, 5  ;;  %v3725_v25 = vrot.slane %v8036_v24, 6  ;;  %v3735_v10 = vperm.slane %v8036_v24, 0 }
 0x60e   :  { %v3762_v1 = vpop.permute.xlu2 %3761 }
 0x60f   :  { %v3767_v58 = vadd.f32 %v3762_v1, %v3727_v46  ;;  %v3768_v12 = vadd.f32 %v3762_v1, %v3728_v63  ;;  %v3769_v20 = vadd.f32 %v3762_v1, %v3729_v4  ;;  %v3770_v7 = vadd.f32 %v3762_v1, %v3730_v2  ;;  %v5330_v2 = vld [vmem:[#allocation5 + $0x30] sm:$0xff] }
 0x610   :  { %v3771_v0 = vadd.f32 %v3762_v1, %v3731_v28  ;;  %v3772_v60 = vadd.f32 %v3762_v1, %v3732_v30  ;;  %v3773_v13 = vadd.f32 %v3762_v1, %v3733_v29  ;;  %v3774_v54 = vadd.f32 %v3762_v1, %v3734_v15  ;;  %4051 = vmatpush.bf16.msra.mxu3 %v5330_v2 }
 0x611   :  { %v3783_v36 = vadd.f32 %v3767_v58, %v3671_v31  ;;  %v3784_v57 = vadd.f32 %v3768_v12, %v3673_v43  ;;  %v3785_v42 = vadd.f32 %v3769_v20, %v3676_v52  ;;  %v3786_v21 = vadd.f32 %v3770_v7, %v3678_v55  ;;  %v3706_v20 = vpop.f32.mrf.mxu1 }
 0x612   :  { %v3787_v34 = vadd.f32 %v3771_v0, %v3681_v19  ;;  %v3788_v27 = vadd.f32 %v3772_v60, %v3683_v16  ;;  %v3789_v39 = vadd.f32 %v3773_v13, %v3686_v62  ;;  %v3790_v38 = vadd.f32 %v3774_v54, %v3688_v45 }
 0x613   :  { %v3799_v41 = vmax.f32 %v3783_v36, 0.0  ;;  %v3800_v46 = vmax.f32 %v3784_v57, 0.0  ;;  %v3801_v63 = vmax.f32 %v3785_v42, 0.0  ;;  %v3802_v4 = vmax.f32 %v3786_v21, 0.0 }
 0x614   :  { %v3803_v28 = vmax.f32 %v3787_v34, 0.0  ;;  %v3804_v30 = vmax.f32 %v3788_v27, 0.0  ;;  %v3736_v1 = vperm.slane %v3720_v56, 0  ;;  %v3737_v31 = vperm.slane %v3721_v53, 0 }
 0x615   :  { %v3815_v43 = vmul.f32 %v7864_v47, %v3799_v41  ;;  %v3816_v52 = vmul.f32 %v7862_v5, %v3800_v46  ;;  %v3817_v55 = vmul.f32 %v7867_v49, %v3801_v63  ;;  %v3818_v54 = vmul.f32 %v7873_v9, %v3802_v4  ;;  %v5329_v41 = vld [vmem:[#allocation5 + $0x28] sm:$0xff]  ;;  %v5328_v63 = vld [vmem:[#allocation5 + $0x20] sm:$0xff] }
 0x616   :  { %v3819_v13 = vmul.f32 %v7880_v3, %v3803_v28  ;;  %v3738_v36 = vperm.slane %v3722_v51, 0  ;;  %v3739_v57 = vperm.slane %v3723_v17, 0  ;;  %v3740_v42 = vperm.slane %v3724_v40, 0  ;;  %v3764_v29 = vpop.permute.xlu2 %3763  ;;  %4052 = vmatpush.bf16.msra.mxu3 %v5329_v41 }
 0x617   :  { %v3831_v21 = vsel %vm8479_vm1, %v3815_v43, 0.0  ;;  %v3838_v23 = vsel %vm8480_vm5, %v3816_v52, 0.0  ;;  %v3845_v34 = vsel %vm8481_vm12, %v3817_v55, 0.0  ;;  %v3852_v27 = vsel %vm8482_vm14, %v3818_v54, 0.0  ;;  %vm8487_vm1 = vmmov %vm8460_vm0 }
 0x618   :  { %v3832_v19 = vrot.slane %v3831_v21, 4  ;;  %v3839_v16 = vrot.slane %v3838_v23, 4  ;;  %v3846_v62 = vrot.slane %v3845_v34, 4  ;;  %v3853_v45 = vrot.slane %v3852_v27, 4  ;;  %vm8488_vm5 = vmmov %vm8460_vm0 }
 0x619   :  { %v3805_v15 = vmax.f32 %v3789_v39, 0.0  ;;  %v3806_v56 = vmax.f32 %v3790_v38, 0.0  ;;  %v3820_v53 = vmul.f32 %v7886_v61, %v3804_v30  ;;  %v3859_v51 = vsel %vm8460_vm0, %v3819_v13, 0.0  ;;  %vm8489_vm12 = vmmov %vm8460_vm0 }
 0x61a   :  { %v3833_v17 = vadd.f32 %v3832_v19, %v3831_v21  ;;  %v3840_v40 = vadd.f32 %v3839_v16, %v3838_v23  ;;  %v3847_v58 = vadd.f32 %v3846_v62, %v3845_v34  ;;  %v3854_v12 = vadd.f32 %v3853_v45, %v3852_v27  ;;  %4053 = vmatpush.bf16.msra.mxu3 %v5328_v63  ;;  %vm8490_vm14 = vmmov %vm8460_vm0 }
 0x61b   :  { %v3741_v7 = vperm.slane %v3725_v25, 0  ;;  %v3775_v0 = vadd.f32 %v3764_v29, %v3735_v10  ;;  %v3776_v60 = vadd.f32 %v3764_v29, %v3736_v1  ;;  %v3777_v46 = vadd.f32 %v3764_v29, %v3737_v31 }
 0x61c   :  { %v3834_v4 = vrot.slane %v3833_v17, 2  ;;  %v3841_v2 = vrot.slane %v3840_v40, 2  ;;  %v3860_v28 = vrot.slane %v3859_v51, 4  ;;  %v3778_v39 = vadd.f32 %v3764_v29, %v3738_v36 }
 0x61d   :  { %v3848_v38 = vrot.slane %v3847_v58, 2  ;;  %v8060_v30 = vsel %vm8483_vm15, %v3820_v53, 0.0  ;;  %v3779_v43 = vadd.f32 %v3764_v29, %v3739_v57  ;;  %v3780_v52 = vadd.f32 %v3764_v29, %v3740_v42  ;;  %vm8491_vm15 = vmmov %vm8460_vm0 }
 0x61e   :  { %v8063_v55 = vmul.f32 %v7893_v33, %v3805_v15  ;;  %v8066_v25 = vmul.f32 %v7908_v6, %v3806_v56  ;;  %v3855_v10 = vrot.slane %v3854_v12, 2  ;;  %v8484_v1 = vrot.slane %v8036_v24, 7 }
 0x61f   :  { %v3835_v54 = vadd.f32 %v3834_v4, %v3833_v17  ;;  %v3791_v13 = vadd.f32 %v3775_v0, %v8023_v48  ;;  %v3792_v36 = vadd.f32 %v3776_v60, %v8025_v32  ;;  %v3793_v21 = vadd.f32 %v3777_v46, %v8027_v14 }
 0x620   :  { %v3742_v31 = vperm.slane %v8484_v1, 0  ;;  %v3842_v57 = vadd.f32 %v3841_v2, %v3840_v40  ;;  %v3861_v42 = vadd.f32 %v3860_v28, %v3859_v51  ;;  %v3867_v23 = vrot.slane %v8060_v30, 4  ;;  %v3708_v40 = vpop.f32.mrf.mxu1 }
 0x621   :  { %v3794_v34 = vadd.f32 %v3778_v39, %v8029_v59  ;;  %v8075_v27 = vadd.f32 %v3848_v38, %v3847_v58  ;;  %v3781_v41 = vadd.f32 %v3764_v29, %v3741_v7  ;;  %v3795_v24 = vadd.f32 %v3779_v43, %v8034_v26 }
 0x622   :  { %v3796_v19 = vadd.f32 %v3780_v52, %v8046_v8  ;;  %v8079_v16 = vadd.f32 %v3855_v10, %v3854_v12  ;;  %v3782_v48 = vadd.f32 %v3764_v29, %v3742_v31  ;;  %v3807_v32 = vmax.f32 %v3791_v13, 0.0 }
 0x623   :  { %v3808_v62 = vmax.f32 %v3792_v36, 0.0  ;;  %v3836_v14 = vrot.slane %v3835_v54, 1  ;;  %v3809_v45 = vmax.f32 %v3793_v21, 0.0  ;;  %v3810_v15 = vmax.f32 %v3794_v34, 0.0 }
 0x624   :  { %v3811_v56 = vmax.f32 %v3795_v24, 0.0  ;;  %v3843_v53 = vrot.slane %v3842_v57, 1  ;;  %v3812_v51 = vmax.f32 %v3796_v19, 0.0  ;;  %v3823_v59 = vmul.f32 %v7927_v37, %v3807_v32 }
 0x625   :  { %v3824_v17 = vmul.f32 %v7924_v11, %v3808_v62  ;;  %v3797_v58 = vadd.f32 %v3781_v41, %v3706_v20  ;;  %v3825_v26 = vmul.f32 %v7940_v18, %v3809_v45  ;;  %v3826_v8 = vmul.f32 %v7949_v44, %v3810_v15 }
 0x626   :  { %v3827_v29 = vmul.f32 %v7937_v50, %v3811_v56  ;;  %v3850_v12 = vrot.slane %v8075_v27, 1  ;;  %v3798_v7 = vadd.f32 %v3782_v48, %v3708_v40  ;;  %v3887_v0 = vsel %vm8485_vm3, %v3823_v59, 0.0  ;;  %v5334_v40 = vld [vmem:[#allocation7 + $0x30] sm:$0xff]  ;;  %vm8493_vm3 = vmmov %vm8460_vm0 }
 0x627   :  { %v3894_v60 = vsel %vm8486_vm10, %v3824_v17, 0.0  ;;  %v3888_v46 = vrot.slane %v3887_v0, 4  ;;  %v3901_v4 = vsel %vm8487_vm1, %v3825_v26, 0.0  ;;  %v3908_v2 = vsel %vm8488_vm5, %v3826_v8, 0.0  ;;  %vm8494_vm10 = vmmov %vm8460_vm0 }
 0x628   :  { %v3895_v63 = vrot.slane %v3894_v60, 4  ;;  %v3828_v20 = vmul.f32 %v7946_v22, %v3812_v51  ;;  %v3902_v28 = vrot.slane %v3901_v4, 4  ;;  %v3909_v39 = vrot.slane %v3908_v2, 4  ;;  %vm8495_vm1 = vmmov %vm8460_vm0 }
 0x629   :  { %v3915_v38 = vsel %vm8489_vm12, %v3827_v29, 0.0  ;;  %v8093_v43 = vadd.f32 %v3836_v14, %v3835_v54  ;;  %v3813_v52 = vmax.f32 %v3797_v58, 0.0  ;;  %v3889_v10 = vadd.f32 %v3888_v46, %v3887_v0  ;;  %v5335_v54 = vld [vmem:[#allocation7 + $0x38] sm:$0xff]  ;;  %vm8497_vm5 = vmmov %vm8460_vm0 }
 0x62a   :  { %v3896_v1 = vadd.f32 %v3895_v63, %v3894_v60  ;;  %v8095_v31 = vadd.f32 %v3843_v53, %v3842_v57  ;;  %v3814_v13 = vmax.f32 %v3798_v7, 0.0  ;;  %v3903_v36 = vadd.f32 %v3902_v28, %v3901_v4  ;;  %4150 = vmatpush.bf16.msrb.mxu3 %v5335_v54  ;;  %vm8500_vm12 = vmmov %vm8460_vm0 }
 0x62b   :  { %v3910_v21 = vadd.f32 %v3909_v39, %v3908_v2  ;;  %v3890_v34 = vrot.slane %v3889_v10, 2  ;;  %v3916_v24 = vrot.slane %v3915_v38, 4  ;;  %v3862_v19 = vrot.slane %v3861_v42, 2  ;;  %v5333_v39 = vld [vmem:[#allocation7 + $0x28] sm:$0xff] }
 0x62c   :  { %v3897_v41 = vrot.slane %v3896_v1, 2  ;;  %v3904_v48 = vrot.slane %v3903_v36, 2  ;;  %v3922_v62 = vsel %vm8490_vm14, %v3828_v20, 0.0  ;;  %v3868_v45 = vadd.f32 %v3867_v23, %v8060_v30  ;;  %v8492_v23 = vld [vmem:[#allocation16_spill] sm:$0xff]  ;;  %vm8502_vm14 = vmmov %vm8460_vm0 }
 0x62d   :  { %v3911_v32 = vrot.slane %v3910_v21, 2  ;;  %v3829_v14 = vmul.f32 %v7968_v35, %v3813_v52  ;;  %v3891_v15 = vadd.f32 %v3890_v34, %v3889_v10  ;;  %v3857_v57 = vrot.slane %v8079_v16, 1 }
 0x62e   :  { %v3873_v56 = vsel %vm8460_vm0, %v8063_v55, 0.0  ;;  %v3898_v53 = vadd.f32 %v3897_v41, %v3896_v1  ;;  %v3863_v51 = vadd.f32 %v3862_v19, %v3861_v42  ;;  %v3869_v59 = vrot.slane %v3868_v45, 2  ;;  %4151 = vmatpush.bf16.msrb.mxu3 %v5334_v40 }
 0x62f   :  { %v3874_v17 = vrot.slane %v3873_v56, 4  ;;  %v3905_v58 = vadd.f32 %v3904_v48, %v3903_v36  ;;  %v3917_v26 = vadd.f32 %v3916_v24, %v3915_v38  ;;  %v3923_v8 = vrot.slane %v3922_v62, 4 }
 0x630   :  { %v3880_v30 = vsel %vm8491_vm15, %v8066_v25, 0.0  ;;  %v3830_v29 = vmul.f32 %v8492_v23, %v3814_v13  ;;  %v3912_v7 = vadd.f32 %v3911_v32, %v3910_v21  ;;  %v3892_v46 = vrot.slane %v3891_v15, 1  ;;  %v5332_v32 = vld [vmem:[#allocation7 + $0x20] sm:$0xff]  ;;  %vm8516_vm15 = vmmov %vm8460_vm0 }
 0x631   :  { %v3875_v0 = vadd.f32 %v3874_v17, %v3873_v56  ;;  %v3881_v60 = vrot.slane %v3880_v30, 4  ;;  %v8107_v55 = vadd.f32 %v3850_v12, %v8075_v27  ;;  %v8110_v42 = vadd.f32 %v3857_v57, %v8079_v16 }
 0x632   :  { %v3870_v63 = vadd.f32 %v3869_v59, %v3868_v45  ;;  %v3899_v4 = vrot.slane %v3898_v53, 1  ;;  %v3864_v2 = vrot.slane %v3863_v51, 1  ;;  %v3906_v25 = vrot.slane %v3905_v58, 1  ;;  %4152 = vmatpush.bf16.msrb.mxu3 %v5333_v39 }
 0x633   :  { %v3876_v20 = vrot.slane %v3875_v0, 2  ;;  %v3882_v28 = vadd.f32 %v3881_v60, %v3880_v30  ;;  %v3918_v38 = vrot.slane %v3917_v26, 2  ;;  %v3924_v52 = vadd.f32 %v3923_v8, %v3922_v62 }
 0x634   :  { %v3929_v10 = vsel %vm8493_vm3, %v3829_v14, 0.0  ;;  %v3913_v36 = vrot.slane %v3912_v7, 1  ;;  %v3871_v12 = vrot.slane %v3870_v63, 1  ;;  %v3936_v34 = vsel %vm8494_vm10, %v3830_v29, 0.0  ;;  %vm8517_vm3 = vmmov %vm8460_vm0 }
 0x635   :  { %v3877_v1 = vadd.f32 %v3876_v20, %v3875_v0  ;;  %v3883_v13 = vrot.slane %v3882_v28, 2  ;;  %v3930_v27 = vrot.slane %v3929_v10, 4  ;;  %v3919_v21 = vadd.f32 %v3918_v38, %v3917_v26  ;;  %v5339_v20 = vld [vmem:[#allocation8 + $0x38] sm:$0xff]  ;;  %vm8518_vm10 = vmmov %vm8460_vm0 }
 0x636   :  { %v3925_v16 = vrot.slane %v3924_v52, 2  ;;  %v3893_v41 = vadd.f32 %v3892_v46, %v3891_v15  ;;  %v3937_v48 = vrot.slane %v3936_v34, 4  ;;  %v3900_v45 = vadd.f32 %v3899_v4, %v3898_v53  ;;  %4153 = vmatpush.bf16.msrb.mxu3 %v5332_v32  ;;  %4112 = vmatpush.bf16.msrb.mxu0 %v5339_v20  ;;  %v5338_v20 = vld [vmem:[#allocation8 + $0x30] sm:$0xff] }
 0x637   :  { %v3884_v24 = vadd.f32 %v3883_v13, %v3882_v28  ;;  %v3931_v19 = vadd.f32 %v3930_v27, %v3929_v10  ;;  %v3878_v54 = vrot.slane %v3877_v1, 1  ;;  %v3920_v62 = vrot.slane %v3919_v21, 1 }
 0x638   :  { %v3926_v57 = vadd.f32 %v3925_v16, %v3924_v52  ;;  %v3865_v14 = vadd.f32 %v3864_v2, %v3863_v51  ;;  %v3907_v56 = vadd.f32 %v3906_v25, %v3905_v58  ;;  %v3938_v17 = vadd.f32 %v3937_v48, %v3936_v34 }
 0x639   :  { %v3932_v59 = vrot.slane %v3931_v19, 2  ;;  %v3872_v40 = vadd.f32 %v3871_v12, %v3870_v63  ;;  %v3885_v8 = vrot.slane %v3884_v24, 1  ;;  %v3914_v26 = vadd.f32 %v3913_v36, %v3912_v7 }
 0x63a   :  { %v3927_v30 = vrot.slane %v3926_v57, 1  ;;  %v3939_v29 = vrot.slane %v3938_v17, 2  ;;  %v3943_v15 = vpack.c.bf16 %v8093_v43, %v8093_v43  ;;  %v3944_v60 = vpack.c.bf16 %v8095_v31, %v8095_v31  ;;  %4113 = vmatpush.bf16.msrb.mxu0 %v5338_v20  ;;  %v8510_v20 = vld [vmem:[#allocation27_spill] sm:$0xff] }
 0x63b   :  { %v3933_v0 = vadd.f32 %v3932_v59, %v3931_v19  ;;  %v3879_v53 = vadd.f32 %v3878_v54, %v3877_v1  ;;  %v3921_v46 = vadd.f32 %v3920_v62, %v3919_v21  ;;  %v3945_v51 = vpack.c.bf16 %v8107_v55, %v8107_v55 }
 0x63c   :  { %v3946_v58 = vpack.c.bf16 %v8110_v42, %v8110_v42  ;;  %v3940_v7 = vadd.f32 %v3939_v29, %v3938_v17  ;;  %v3947_v4 = vpack.c.bf16 %v3865_v14, %v3865_v14  ;;  %v3951_v2 = vpack.c.bf16 %v3893_v41, %v3893_v41 }
 0x63d   :  { %v3934_v63 = vrot.slane %v3933_v0, 1  ;;  %v3886_v28 = vadd.f32 %v3885_v8, %v3884_v24  ;;  %v3928_v39 = vadd.f32 %v3927_v30, %v3926_v57  ;;  %v3952_v43 = vpack.c.bf16 %v3900_v45, %v3900_v45 }
 0x63e   :  { %v3953_v25 = vpack.c.bf16 %v3907_v56, %v3907_v56  ;;  %v3941_v31 = vrot.slane %v3940_v7, 1  ;;  %v3988_v52 = vunpack.c.l.b16 %v3943_v15  ;;  %v3989_v10 = vunpack.c.l.b16 %v3944_v60 }
 0x63f   :  { %v3935_v38 = vadd.f32 %v3934_v63, %v3933_v0  ;;  %v3948_v1 = vpack.c.bf16 %v3872_v40, %v3872_v40  ;;  %v3954_v13 = vpack.c.bf16 %v3914_v26, %v3914_v26  ;;  %v3990_v55 = vunpack.c.l.b16 %v3945_v51 }
 0x640   :  { %v3942_v36 = vadd.f32 %v3941_v31, %v3940_v7  ;;  %v3949_v27 = vpack.c.bf16 %v3879_v53, %v3879_v53  ;;  %v3955_v42 = vpack.c.bf16 %v3921_v46, %v3921_v46  ;;  %v3996_v12 = vunpack.c.l.b16 %v3951_v2  ;;  %v8496_v2 = vld [vmem:[#allocation28_spill] sm:$0xff] }
 0x641   :  { %v3950_v21 = vpack.c.bf16 %v3886_v28, %v3886_v28  ;;  %v3956_v16 = vpack.c.bf16 %v3928_v39, %v3928_v39  ;;  %v3997_v34 = vunpack.c.l.b16 %v3952_v43  ;;  %v3998_v41 = vunpack.c.l.b16 %v3953_v25  ;;  %v5337_v28 = vld [vmem:[#allocation8 + $0x28] sm:$0xff]  ;;  %v5336_v39 = vld [vmem:[#allocation8 + $0x20] sm:$0xff] }
 0x642   :  { %v3957_v24 = vpack.c.bf16 %v3935_v38, %v3935_v38  ;;  %v3991_v19 = vunpack.c.l.b16 %v3946_v58  ;;  %v3992_v48 = vunpack.c.l.b16 %v3947_v4  ;;  %v4004_v32 = vsel %vm3368_vm4, %v3989_v10, %v3988_v52  ;;  %4114 = vmatpush.bf16.msrb.mxu0 %v5337_v28  ;;  %v6198_v25 = vld [vmem:[%s8339_s8 + $0x1] ss:$0 sm:$0xff]  ;;  %v8498_v38 = vld [vmem:[#allocation22_spill] sm:$0xff] }
 0x643   :  { %v3958_v45 = vpack.c.bf16 %v3942_v36, %v3942_v36  ;;  %v3999_v54 = vunpack.c.l.b16 %v3954_v13  ;;  %v4005_v62 = vsel %vm3370_vm2, %v3990_v55, %v4004_v32  ;;  %v4011_v57 = vsel %vm3368_vm4, %v3997_v34, %v3996_v12  ;;  %v8499_v52 = vld [vmem:[#allocation23_spill] sm:$0xff] }
 0x644   :  { %v3993_v14 = vunpack.c.l.b16 %v3948_v1  ;;  %v4000_v56 = vunpack.c.l.b16 %v3955_v42  ;;  %v4006_v59 = vsel %vm3372_vm6, %v3991_v19, %v4005_v62  ;;  %v4012_v17 = vsel %vm3370_vm2, %v3998_v41, %v4011_v57  ;;  %v5343_v12 = vld [vmem:[#allocation10 + $0x38] sm:$0xff]  ;;  %v5340_v34 = vld [vmem:[#allocation10 + $0x20] sm:$0xff] }
 0x645   :  { %v3994_v40 = vunpack.c.l.b16 %v3949_v27  ;;  %v4001_v8 = vunpack.c.l.b16 %v3956_v16  ;;  %v4007_v26 = vsel %vm3374_vm7, %v3992_v48, %v4006_v59  ;;  %v4013_v30 = vsel %vm3372_vm6, %v3999_v54, %v4012_v17  ;;  %v5341_v16 = vld [vmem:[#allocation10 + $0x28] sm:$0xff] }
 0x646   :  { %v3995_v0 = vunpack.c.l.b16 %v3950_v21  ;;  %v4002_v29 = vunpack.c.l.b16 %v3957_v24  ;;  %v4008_v15 = vsel %vm3376_vm8, %v3993_v14, %v4007_v26  ;;  %v4014_v60 = vsel %vm3374_vm7, %v4000_v56, %v4013_v30  ;;  %4115 = vmatpush.bf16.msrb.mxu0 %v5336_v39  ;;  %v5342_v21 = vld [vmem:[#allocation10 + $0x30] sm:$0xff]  ;;  %v8501_v41 = vld [vmem:[#allocation20_spill] sm:$0xff]  ;;  %v6255_v24 = vld [vmem:[%s8336_s5 + $0x18] sm:$0xff] }
 0x647   :  { %v4003_v53 = vunpack.c.l.b16 %v3958_v45  ;;  %v4009_v46 = vsel %vm3378_vm11, %v3994_v40, %v4008_v15  ;;  %v4015_v51 = vsel %vm3376_vm8, %v4001_v8, %v4014_v60  ;;  %v3970_v31 = vmul.f32 %v6198_v25, %v8498_v38  ;;  %v6203_v45 = vld [vmem:[%s8342_s11 + $0x1] ss:$0 sm:$0xff]  ;;  %v8503_v8 = vld [vmem:[#allocation25_spill] sm:$0xff]  ;;  %v8504_v26 = vld [vmem:[#allocation26_spill] sm:$0xff] }
 0x648   :  { %v4010_v58 = vsel %vm3380_vm13, %v3995_v0, %v4009_v46  ;;  %v4016_v63 = vsel %vm3378_vm11, %v4002_v29, %v4015_v51  ;;  %v3971_v10 = vmul.f32 %v6198_v25, %v8499_v52  ;;  %v8505_v30 = vld [vmem:[#allocation17_spill] sm:$0xff]  ;;  %v5347_v29 = vld [vmem:[#allocation2 + $0x58] sm:$0xff]  ;;  %v5344_v51 = vld [vmem:[#allocation2 + $0x40] sm:$0xff] }
 0x649   :  { %v4017_v7 = vsel %vm3380_vm13, %v4003_v53, %v4016_v63  ;;  %v8506_v0 = vld [vmem:[#allocation29_spill] sm:$0xff]  ;;  %v8507_v15 = vld [vmem:[#allocation18_spill] sm:$0xff]  ;;  %v8508_v60 = vld [vmem:[#allocation19_spill] sm:$0xff] }
 0x64a   :  { %v4018_v4 = vpack.c.b16 %v4017_v7, %v4010_v58  ;;  %4207 = vmatpush.bf16.msra.mxu0 %v5343_v12  ;;  %v5346_v53 = vld [vmem:[#allocation2 + $0x50] sm:$0xff]  ;;  %v5345_v46 = vld [vmem:[#allocation2 + $0x48] sm:$0xff] }
 0x64b   :  { %v8509_v63 = vld [vmem:[#allocation24_spill] sm:$0xff] }
 0x64c   :  { %5133 = vmatmul.msk.bf16.vlgmr.msra.gmra.mxu3 %vm8495_vm1, %v4018_v4  ;;  %v6204_v4 = vld [vmem:[%s8344_s13 + $0x1] ss:$0 sm:$0xff]  ;;  %vm8519_vm1 = vmmov %vm8460_vm0 }
 0x64d   :  { %4264 = vmatpush.bf16.msra.mxu3 %v5347_v29 }
 0x64e   :  { %4208 = vmatpush.bf16.msra.mxu0 %v5342_v21 }
 0x651   :  { %4265 = vmatpush.bf16.msra.mxu3 %v5346_v53 }
 0x652   :  { %4209 = vmatpush.bf16.msra.mxu0 %v5341_v16 }
 0x655   :  { %4266 = vmatpush.bf16.msra.mxu3 %v5345_v46 }
 0x656   :  { %4210 = vmatpush.bf16.msra.mxu0 %v5340_v34  ;;  %v6205_v34 = vld [vmem:[%s8337_s6 + $0x2] ss:$0 sm:$0xff] }
 0x659   :  { %4267 = vmatpush.bf16.msra.mxu3 %v5344_v51 }
 0x65c   :  { %5167 = vmatmul.msk.bf16.vlgmr.msrb.gmra.mxu3 %vm8497_vm5, %v8496_v2  ;;  %vm8520_vm5 = vmmov %vm8460_vm0 }
 0x65d   :  { %5370 = vmatpush.bf16.msrb.mxu3 %v8501_v41 }
 0x661   :  { %5372 = vmatpush.bf16.msrb.mxu3 %v6255_v24 }
 0x6cf   :  { %v4055_v43 = vpop.f32.mrf.mxu3 }
 0x6d0   :  { %v4056_v1 = vadd.f32 %v4055_v43, %v3970_v31  ;;  %v8514_v31 = vld [vmem:[#allocation21_spill] sm:$0xff] }
 0x6d2   :  { %v4060_v36 = vmul.f32 0.25, %v4056_v1 }
 0x6d7   :  { %v4057_v13 = vpop.f32.mrf.mxu3 }
 0x6d8   :  { %v4058_v55 = vadd.f32 %v4057_v13, %v3971_v10 }
 0x6da   :  { %v4061_v27 = vmul.f32 0.25, %v4058_v55 }
 0x6dc   :  { %v4071_v42 = vpack.c.bf16 %v4061_v27, %v4060_v36 }
 0x6de   :  { %5150 = vmatmul.msk.bf16.vlgmr.msrb.gmra.mxu0 %vm8500_vm12, %v4071_v42  ;;  %vm8521_vm12 = vmmov %vm8460_vm0 }
 0x6df   :  { %4300 = vmatpush.bf16.msrb.mxu0 %v8501_v41  ;;  %v4155_v19 = vpop.f32.mrf.mxu3 }
 0x6e3   :  { %4301 = vmatpush.bf16.msrb.mxu0 %v6255_v24 }
 0x6e7   :  { %v4157_v54 = vpop.f32.mrf.mxu3 }
 0x75b   :  { %v4117_v48 = vpop.f32.mrf.mxu0 }
 0x75c   :  { %v4156_v32 = vadd.f32 %v4155_v19, %v4117_v48 }
 0x75e   :  { %v4162_v57 = vadd.f32 %v6203_v45, %v4156_v32 }
 0x760   :  { %v4164_v59 = vmax.f32 %v4162_v57, 0.0 }
 0x763   :  { %v4119_v62 = vpop.f32.mrf.mxu0 }
 0x764   :  { %v4158_v14 = vadd.f32 %v4157_v54, %v4119_v62 }
 0x766   :  { %v4163_v56 = vadd.f32 %v6203_v45, %v4158_v14 }
 0x768   :  { %v4165_v17 = vmax.f32 %v4163_v56, 0.0 }
 0x76a   :  { %v4166_v40 = vpack.c.bf16 %v4165_v17, %v4164_v59 }
 0x76c   :  { %5184 = vmatmul.msk.bf16.vlgmr.msra.gmra.mxu0 %vm8502_vm14, %v4166_v40  ;;  %vm8522_vm14 = vmmov %vm8460_vm0 }
 0x77c   :  { %5209 = vmatmul.msk.bf16.vlgmr.msrb.gmra.mxu0 %vm2884_vm9, %v8503_v8 }
 0x78c   :  { %5210 = vmatmul.msk.bf16.gmra.mxu0 %vm2884_vm9, %v8504_v26 }
 0x79c   :  { %5211 = vmatmul.msk.bf16.gmra.mxu0 %vm2884_vm9, %v8505_v30 }
 0x7ac   :  { %5212 = vmatmul.msk.bf16.gmra.mxu0 %vm2884_vm9, %v8506_v0 }
 0x7bc   :  { %5213 = vmatmul.msk.bf16.gmra.mxu0 %vm2884_vm9, %v8507_v15 }
 0x7cc   :  { %5214 = vmatmul.msk.bf16.gmra.mxu0 %vm2884_vm9, %v8508_v60 }
 0x7e9   :  { %v4212_v58 = vpop.f32.mrf.mxu0 }
 0x7ea   :  { %v4217_v7 = vadd.f32 %v4212_v58, %v8509_v63 }
 0x7ec   :  { %v8171_v39 = vadd.f32 %v6204_v4, %v4217_v7 }
 0x7ee   :  { %8511 = vst [vmem:[#allocation16_spill] sm:$0xff] %v8171_v39 }
 0x7f1   :  { %v4214_v2 = vpop.f32.mrf.mxu0 }
 0x7f2   :  { %v4218_v28 = vadd.f32 %v4214_v2, %v8510_v20 }
 0x7f4   :  { %v8173_v43 = vadd.f32 %v6204_v4, %v4218_v28 }
 0x7f6   :  { %8512 = vst [vmem:[#allocation28_spill] sm:$0xff] %v8173_v43  ;;  %v8177_v25 = vpack.c.bf16 %v8173_v43, %v8171_v39 }
 0x7f8   :  { %8513 = vst [vmem:[#allocation22_spill] sm:$0xff] %v8177_v25  ;;  %5201 = vmatmul.msk.bf16.vlgmr.msra.gmra.mxu3 %vm8460_vm0, %v8177_v25 }
 0x7f9   :  { %v4303_v10 = vpop.f32.mrf.mxu0 }
 0x801   :  { %v4305_v13 = vpop.f32.mrf.mxu0 }
 0x808   :  { %5216 = vmatmul.msk.bf16.vlgmr.msrb.gmra.mxu3 %vm2884_vm9, %v8514_v31  ;;  %vm8515_vm9 = vmmov %vm8460_vm0 }
 0x809   :  { %v4308_v36 = vpop.f32.mrf.mxu0 }
 0x811   :  { %v4310_v27 = vpop.f32.mrf.mxu0 }
 0x819   :  { %v4313_v42 = vpop.f32.mrf.mxu0 }
 0x821   :  { %v4315_v12 = vpop.f32.mrf.mxu0 }
 0x829   :  { %v4318_v21 = vpop.f32.mrf.mxu0 }
 0x831   :  { %v4320_v16 = vpop.f32.mrf.mxu0 }
 0x839   :  { %v8188_v41 = vpop.f32.mrf.mxu0 }
 0x841   :  { %v8195_v40 = vpop.f32.mrf.mxu0 }
 0x87b   :  { %v4269_v1 = vpop.f32.mrf.mxu3 }
 0x87c   :  { %4393 = vrot.lane.b32.xlu2 %v4269_v1, %s6409_s29  ;;  %v4276_v24 = vadd.f32 %v6205_v34, %v4269_v1 }
 0x87e   :  { %v4345_v48 = vrot.slane %v4276_v24, 1  ;;  %v4346_v32 = vrot.slane %v4276_v24, 2  ;;  %v4347_v45 = vrot.slane %v4276_v24, 3  ;;  %v4348_v54 = vrot.slane %v4276_v24, 4 }
 0x87f   :  { %v4349_v62 = vrot.slane %v4276_v24, 5  ;;  %v4350_v57 = vrot.slane %v4276_v24, 6  ;;  %v4351_v14 = vrot.slane %v4276_v24, 7  ;;  %v4359_v8 = vperm.slane %v4276_v24, 0 }
 0x880   :  { %v4360_v26 = vperm.slane %v4345_v48, 0  ;;  %v4361_v30 = vperm.slane %v4346_v32, 0  ;;  %v4362_v0 = vperm.slane %v4347_v45, 0  ;;  %v4363_v29 = vperm.slane %v4348_v54, 0 }
 0x881   :  { %v4364_v15 = vperm.slane %v4349_v62, 0  ;;  %v4365_v60 = vperm.slane %v4350_v57, 0  ;;  %v4366_v53 = vperm.slane %v4351_v14, 0 }
 0x883   :  { %v4271_v55 = vpop.f32.mrf.mxu3 }
 0x884   :  { %4395 = vrot.lane.b32.xlu2 %v4271_v55, %s6409_s29  ;;  %v8190_v19 = vadd.f32 %v6205_v34, %v4271_v55 }
 0x886   :  { %v4352_v56 = vrot.slane %v8190_v19, 1  ;;  %v4353_v59 = vrot.slane %v8190_v19, 2  ;;  %v4354_v17 = vrot.slane %v8190_v19, 3  ;;  %v4355_v46 = vrot.slane %v8190_v19, 4 }
 0x887   :  { %v4356_v51 = vrot.slane %v8190_v19, 5  ;;  %v4357_v58 = vrot.slane %v8190_v19, 6  ;;  %v4358_v63 = vrot.slane %v8190_v19, 7  ;;  %v4367_v4 = vperm.slane %v8190_v19, 0 }
 0x888   :  { %v4368_v2 = vperm.slane %v4352_v56, 0  ;;  %v4369_v20 = vperm.slane %v4353_v59, 0  ;;  %v8202_v28 = vperm.slane %v4354_v17, 0  ;;  %v4371_v25 = vperm.slane %v4355_v46, 0 }
 0x889   :  { %v4372_v19 = vperm.slane %v4356_v51, 0 }
 0x8d6   :  { %v4394_v7 = vpop.permute.xlu2 %4393 }
 0x8d7   :  { %v4399_v31 = vadd.f32 %v4394_v7, %v4359_v8  ;;  %v4400_v1 = vadd.f32 %v4394_v7, %v4360_v26  ;;  %v4401_v55 = vadd.f32 %v4394_v7, %v4361_v30  ;;  %v4402_v34 = vadd.f32 %v4394_v7, %v4362_v0 }
 0x8d8   :  { %v4403_v24 = vadd.f32 %v4394_v7, %v4363_v29  ;;  %v4404_v48 = vadd.f32 %v4394_v7, %v4364_v15  ;;  %v4405_v32 = vadd.f32 %v4394_v7, %v4365_v60  ;;  %v4406_v45 = vadd.f32 %v4394_v7, %v4366_v53  ;;  %v4328_v29 = vpop.f32.mrf.mxu0 }
 0x8d9   :  { %v4415_v54 = vadd.f32 %v4399_v31, %v4303_v10  ;;  %v4416_v62 = vadd.f32 %v4400_v1, %v4305_v13  ;;  %v4417_v57 = vadd.f32 %v4401_v55, %v4308_v36  ;;  %v4418_v14 = vadd.f32 %v4402_v34, %v4310_v27  ;;  %v4333_v27 = vpop.f32.mrf.mxu2 }
 0x8da   :  { %v4419_v43 = vadd.f32 %v4403_v24, %v4313_v42  ;;  %v4420_v39 = vadd.f32 %v4404_v48, %v4315_v12  ;;  %v4421_v8 = vadd.f32 %v4405_v32, %v4318_v21  ;;  %v4422_v26 = vadd.f32 %v4406_v45, %v4320_v16  ;;  %v4338_v42 = vpop.f32.mrf.mxu3  ;;  %v5352_v16 = vld [vmem:[#allocation5 + $0x58] sm:$0xff] }
 0x8db   :  { %v4431_v56 = vmax.f32 %v4415_v54, 0.0  ;;  %v4432_v59 = vmax.f32 %v4416_v62, 0.0  ;;  %v4433_v17 = vmax.f32 %v4417_v57, 0.0  ;;  %v4434_v52 = vmax.f32 %v4418_v14, 0.0  ;;  %4682 = vmatpush.bf16.msra.mxu3 %v5352_v16 }
 0x8dc   :  { %v4435_v30 = vmax.f32 %v4419_v43, 0.0  ;;  %v4436_v0 = vmax.f32 %v4420_v39, 0.0  ;;  %v4373_v53 = vperm.slane %v4357_v58, 0  ;;  %v4374_v21 = vperm.slane %v4358_v63, 0 }
 0x8dd   :  { %v4447_v15 = vmul.f32 %v7864_v47, %v4431_v56  ;;  %v4448_v10 = vmul.f32 %v7862_v5, %v4432_v59  ;;  %v4449_v13 = vmul.f32 %v7867_v49, %v4433_v17  ;;  %v4450_v36 = vmul.f32 %v7873_v9, %v4434_v52  ;;  %v5350_v56 = vld [vmem:[#allocation5 + $0x48] sm:$0xff] }
 0x8de   :  { %v4451_v12 = vmul.f32 %v7880_v3, %v4435_v30  ;;  %v4452_v60 = vmul.f32 %v7886_v61, %v4436_v0  ;;  %v4396_v51 = vpop.permute.xlu2 %4395  ;;  %v5351_v3 = vld [vmem:[#allocation5 + $0x50] sm:$0xff]  ;;  %v4437_v7 = vmax.f32 %v4421_v8, 0.0  ;;  %v4438_v61 = vmax.f32 %v4422_v26, 0.0 }
 0x8df   :  { %v4463_v39 = vsel %vm8515_vm9, %v4447_v15, 0.0  ;;  %v4470_v43 = vsel %vm8516_vm15, %v4448_v10, 0.0  ;;  %v4477_v47 = vsel %vm8517_vm3, %v4449_v13, 0.0  ;;  %v4484_v5 = vsel %vm8518_vm10, %v4450_v36, 0.0  ;;  %4683 = vmatpush.bf16.msra.mxu3 %v5351_v3  ;;  %vm8523_vm9 = vmmov %vm8460_vm0 }
 0x8e0   :  { %v4464_v49 = vrot.slane %v4463_v39, 4  ;;  %v4471_v46 = vrot.slane %v4470_v43, 4  ;;  %v4478_v9 = vrot.slane %v4477_v47, 4  ;;  %v4485_v52 = vrot.slane %v4484_v5, 4  ;;  %vm8524_vm15 = vmmov %vm8460_vm0 }
 0x8e1   :  { %v4491_v58 = vsel %vm8519_vm1, %v4451_v12, 0.0  ;;  %v8216_v63 = vsel %vm8520_vm5, %v4452_v60, 0.0  ;;  %v4407_v48 = vadd.f32 %v4396_v51, %v4367_v4  ;;  %v4408_v32 = vadd.f32 %v4396_v51, %v4368_v2  ;;  %v5349_v60 = vld [vmem:[#allocation5 + $0x40] sm:$0xff]  ;;  %vm8525_vm3 = vmmov %vm8460_vm0 }
 0x8e2   :  { %v4465_v31 = vadd.f32 %v4464_v49, %v4463_v39  ;;  %v4472_v1 = vadd.f32 %v4471_v46, %v4470_v43  ;;  %v4479_v55 = vadd.f32 %v4478_v9, %v4477_v47  ;;  %v4486_v34 = vadd.f32 %v4485_v52, %v4484_v5  ;;  %v4340_v36 = vpop.f32.mrf.mxu3  ;;  %vm8526_vm10 = vmmov %vm8460_vm0 }
 0x8e3   :  { %v4492_v24 = vrot.slane %v4491_v58, 4  ;;  %v4409_v45 = vadd.f32 %v4396_v51, %v4369_v20  ;;  %v4410_v14 = vadd.f32 %v4396_v51, %v8202_v28  ;;  %v8220_v59 = vmul.f32 %v7893_v33, %v4437_v7  ;;  %v4330_v20 = vpop.f32.mrf.mxu0  ;;  %v4335_v33 = vpop.f32.mrf.mxu2  ;;  %4684 = vmatpush.bf16.msra.mxu3 %v5350_v56  ;;  %vm8527_vm1 = vmmov %vm8460_vm0 }
 0x8e4   :  { %v4466_v54 = vrot.slane %v4465_v31, 2  ;;  %v4473_v62 = vrot.slane %v4472_v1, 2  ;;  %v4480_v57 = vrot.slane %v4479_v55, 2  ;;  %v4411_v17 = vadd.f32 %v4396_v51, %v4371_v25  ;;  %vm8528_vm5 = vmmov %vm8460_vm0 }
 0x8e5   :  { %v4412_v8 = vadd.f32 %v4396_v51, %v4372_v19  ;;  %v4413_v26 = vadd.f32 %v4396_v51, %v4373_v53  ;;  %v8223_v30 = vmul.f32 %v7908_v6, %v4438_v61  ;;  %v4487_v4 = vrot.slane %v4486_v34, 2 }
 0x8e6   :  { %v8225_v0 = vadd.f32 %v4466_v54, %v4465_v31  ;;  %v4499_v2 = vrot.slane %v8216_v63, 4  ;;  %v4414_v15 = vadd.f32 %v4396_v51, %v4374_v21  ;;  %v4423_v28 = vadd.f32 %v4407_v48, %v8188_v41 }
 0x8e7   :  { %v4424_v10 = vadd.f32 %v4408_v32, %v8195_v40  ;;  %v4425_v13 = vadd.f32 %v4409_v45, %v4328_v29  ;;  %v4474_v25 = vadd.f32 %v4473_v62, %v4472_v1  ;;  %v8230_v19 = vadd.f32 %v4480_v57, %v4479_v55  ;;  %4685 = vmatpush.bf16.msra.mxu3 %v5349_v60 }
 0x8e8   :  { %v8232_v12 = vadd.f32 %v4492_v24, %v4491_v58  ;;  %v4426_v6 = vadd.f32 %v4410_v14, %v4330_v20  ;;  %v4427_v53 = vadd.f32 %v4411_v17, %v4333_v27  ;;  %v4428_v16 = vadd.f32 %v4412_v8, %v4335_v33 }
 0x8e9   :  { %v4429_v39 = vadd.f32 %v4413_v26, %v4338_v42  ;;  %v4430_v43 = vadd.f32 %v4414_v15, %v4340_v36  ;;  %v4468_v21 = vrot.slane %v8225_v0, 1  ;;  %v8235_v41 = vadd.f32 %v4487_v4, %v4486_v34  ;;  %v5360_v26 = vld [vmem:[#allocation8 + $0x58] sm:$0xff] }
 0x8ea   :  { %v4439_v40 = vmax.f32 %v4423_v28, 0.0  ;;  %v4440_v29 = vmax.f32 %v4424_v10, 0.0  ;;  %v4441_v47 = vmax.f32 %v4425_v13, 0.0  ;;  %v4442_v5 = vmax.f32 %v4426_v6, 0.0 }
 0x8eb   :  { %v4443_v49 = vmax.f32 %v4427_v53, 0.0  ;;  %v4444_v46 = vmax.f32 %v4428_v16, 0.0  ;;  %v4445_v9 = vmax.f32 %v4429_v39, 0.0  ;;  %v4446_v52 = vmax.f32 %v4430_v43, 0.0  ;;  %4744 = vmatpush.bf16.msrb.mxu3 %v5360_v26 }
 0x8ec   :  { %v4455_v51 = vmul.f32 %v7927_v37, %v4439_v40  ;;  %v4456_v3 = vmul.f32 %v7924_v11, %v4440_v29  ;;  %v4457_v27 = vmul.f32 %v7940_v18, %v4441_v47  ;;  %v4458_v42 = vmul.f32 %v7949_v44, %v4442_v5 }
 0x8ed   :  { %v4459_v7 = vmul.f32 %v7937_v50, %v4443_v49  ;;  %v4460_v61 = vmul.f32 %v7946_v22, %v4444_v46  ;;  %v4461_v58 = vmul.f32 %v7968_v35, %v4445_v9  ;;  %v4462_v31 = vmul.f32 %v8492_v23, %v4446_v52 }
 0x8ee   :  { %v4519_v1 = vsel %vm8521_vm12, %v4455_v51, 0.0  ;;  %v4526_v55 = vsel %vm8522_vm14, %v4456_v3, 0.0  ;;  %v4533_v11 = vsel %vm8460_vm0, %v4457_v27, 0.0  ;;  %v4540_v18 = vsel %vm8523_vm9, %v4458_v42, 0.0  ;;  %vm8529_vm12 = vmmov %vm8460_vm0 }
 0x8ef   :  { %v4520_v37 = vrot.slane %v4519_v1, 4  ;;  %v4527_v34 = vrot.slane %v4526_v55, 4  ;;  %v4534_v24 = vrot.slane %v4533_v11, 4  ;;  %v4541_v44 = vrot.slane %v4540_v18, 4 }
 0x8f0   :  { %v4547_v50 = vsel %vm8524_vm15, %v4459_v7, 0.0  ;;  %v4554_v22 = vsel %vm8525_vm3, %v4460_v61, 0.0  ;;  %v4475_v45 = vrot.slane %v4474_v25, 1  ;;  %v4561_v57 = vsel %vm8526_vm10, %v4461_v58, 0.0 }
 0x8f1   :  { %v4521_v48 = vadd.f32 %v4520_v37, %v4519_v1  ;;  %v4528_v35 = vadd.f32 %v4527_v34, %v4526_v55  ;;  %v4548_v32 = vrot.slane %v4547_v50, 4  ;;  %v4555_v23 = vrot.slane %v4554_v22, 4 }
 0x8f2   :  { %v4535_v54 = vadd.f32 %v4534_v24, %v4533_v11  ;;  %v4542_v62 = vadd.f32 %v4541_v44, %v4540_v18  ;;  %v4482_v4 = vrot.slane %v8230_v19, 1  ;;  %v4568_v28 = vsel %vm8527_vm1, %v4462_v31, 0.0 }
 0x8f3   :  { %v4522_v14 = vrot.slane %v4521_v48, 2  ;;  %v4529_v56 = vrot.slane %v4528_v35, 2  ;;  %v4549_v17 = vadd.f32 %v4548_v32, %v4547_v50  ;;  %v4556_v8 = vadd.f32 %v4555_v23, %v4554_v22 }
 0x8f4   :  { %v4536_v20 = vrot.slane %v4535_v54, 2  ;;  %v4543_v15 = vrot.slane %v4542_v62, 2  ;;  %v8255_v10 = vadd.f32 %v4468_v21, %v8225_v0  ;;  %v8257_v6 = vadd.f32 %v4475_v45, %v4474_v25 }
 0x8f5   :  { %v4523_v13 = vadd.f32 %v4522_v14, %v4521_v48  ;;  %v4530_v33 = vadd.f32 %v4529_v56, %v4528_v35  ;;  %v4550_v36 = vrot.slane %v4549_v17, 2  ;;  %v4562_v16 = vrot.slane %v4561_v57, 4 }
 0x8f6   :  { %v4537_v60 = vadd.f32 %v4536_v20, %v4535_v54  ;;  %v4544_v53 = vadd.f32 %v4543_v15, %v4542_v62  ;;  %v4557_v40 = vrot.slane %v4556_v8, 2  ;;  %v4569_v29 = vrot.slane %v4568_v28, 4 }
 0x8f7   :  { %v4524_v39 = vrot.slane %v4523_v13, 1  ;;  %v4531_v43 = vrot.slane %v4530_v33, 1  ;;  %v4551_v5 = vadd.f32 %v4550_v36, %v4549_v17  ;;  %v4494_v49 = vrot.slane %v8232_v12, 2 }
 0x8f8   :  { %v4538_v47 = vrot.slane %v4537_v60, 1  ;;  %v4500_v0 = vadd.f32 %v4499_v2, %v8216_v63  ;;  %v4545_v9 = vrot.slane %v4544_v53, 1  ;;  %v4489_v25 = vrot.slane %v8235_v41, 1 }
 0x8f9   :  { %v4525_v21 = vadd.f32 %v4524_v39, %v4523_v13  ;;  %v4532_v46 = vadd.f32 %v4531_v43, %v4530_v33  ;;  %v4563_v51 = vadd.f32 %v4562_v16, %v4561_v57  ;;  %v4495_v3 = vadd.f32 %v4494_v49, %v8232_v12 }
 0x8fa   :  { %v4539_v52 = vadd.f32 %v4538_v47, %v4537_v60  ;;  %v4501_v27 = vrot.slane %v4500_v0, 2  ;;  %v4505_v61 = vsel %vm8528_vm5, %v8220_v59, 0.0  ;;  %v4512_v58 = vsel %vm8529_vm12, %v8223_v30, 0.0 }
 0x8fb   :  { %v4583_v42 = vpack.c.bf16 %v4525_v21, %v4525_v21  ;;  %v4584_v7 = vpack.c.bf16 %v4532_v46, %v4532_v46  ;;  %v4552_v31 = vrot.slane %v4551_v5, 1  ;;  %v4506_v1 = vrot.slane %v4505_v61, 4 }
 0x8fc   :  { %v4585_v63 = vpack.c.bf16 %v4539_v52, %v4539_v52  ;;  %v4502_v2 = vadd.f32 %v4501_v27, %v4500_v0  ;;  %v4546_v55 = vadd.f32 %v4545_v9, %v4544_v53  ;;  %v4483_v37 = vadd.f32 %v4482_v4, %v8230_v19 }
 0x8fd   :  { %v4490_v34 = vadd.f32 %v4489_v25, %v8235_v41  ;;  %v4513_v11 = vrot.slane %v4512_v58, 4  ;;  %v4628_v12 = vunpack.c.l.b16 %v4583_v42  ;;  %v4629_v18 = vunpack.c.l.b16 %v4584_v7 }
 0x8fe   :  { %v4496_v24 = vrot.slane %v4495_v3, 1  ;;  %v4507_v44 = vadd.f32 %v4506_v1, %v4505_v61  ;;  %v4558_v22 = vadd.f32 %v4557_v40, %v4556_v8  ;;  %v4564_v59 = vrot.slane %v4563_v51, 2 }
 0x8ff   :  { %v4514_v50 = vadd.f32 %v4513_v11, %v4512_v58  ;;  %v4570_v48 = vadd.f32 %v4569_v29, %v4568_v28  ;;  %v4630_v35 = vunpack.c.l.b16 %v4585_v63  ;;  %v4503_v30 = vrot.slane %v4502_v2, 1 }
 0x900   :  { %v4508_v32 = vrot.slane %v4507_v44, 2  ;;  %v4553_v23 = vadd.f32 %v4552_v31, %v4551_v5  ;;  %v4559_v54 = vrot.slane %v4558_v22, 1  ;;  %v4565_v62 = vadd.f32 %v4564_v59, %v4563_v51 }
 0x901   :  { %v4515_v45 = vrot.slane %v4514_v50, 2  ;;  %v4571_v57 = vrot.slane %v4570_v48, 2  ;;  %v4497_v19 = vadd.f32 %v4496_v24, %v4495_v3  ;;  %v4575_v41 = vpack.c.bf16 %v8255_v10, %v8255_v10 }
 0x902   :  { %v4509_v14 = vadd.f32 %v4508_v32, %v4507_v44  ;;  %v4576_v56 = vpack.c.bf16 %v8257_v6, %v8257_v6  ;;  %v4566_v8 = vrot.slane %v4565_v62, 1  ;;  %v4577_v4 = vpack.c.bf16 %v4483_v37, %v4483_v37  ;;  %v5357_v32 = vld [vmem:[#allocation8 + $0x40] sm:$0xff] }
 0x903   :  { %v4516_v17 = vadd.f32 %v4515_v45, %v4514_v50  ;;  %v4572_v26 = vadd.f32 %v4571_v57, %v4570_v48  ;;  %v4504_v20 = vadd.f32 %v4503_v30, %v4502_v2  ;;  %v4560_v28 = vadd.f32 %v4559_v54, %v4558_v22  ;;  %v5358_v30 = vld [vmem:[#allocation8 + $0x48] sm:$0xff]  ;;  %v5355_v45 = vld [vmem:[#allocation7 + $0x50] sm:$0xff] }
 0x904   :  { %v4510_v15 = vrot.slane %v4509_v14, 1  ;;  %v4578_v13 = vpack.c.bf16 %v4490_v34, %v4490_v34  ;;  %v4567_v36 = vadd.f32 %v4566_v8, %v4565_v62  ;;  %v4586_v53 = vpack.c.bf16 %v4546_v55, %v4546_v55  ;;  %v5354_v54 = vld [vmem:[#allocation7 + $0x48] sm:$0xff]  ;;  %v5353_v62 = vld [vmem:[#allocation7 + $0x40] sm:$0xff] }
 0x905   :  { %v4517_v33 = vrot.slane %v4516_v17, 1  ;;  %v4573_v60 = vrot.slane %v4572_v26, 1  ;;  %v4579_v39 = vpack.c.bf16 %v4497_v19, %v4497_v19  ;;  %v4620_v43 = vunpack.c.l.b16 %v4575_v41  ;;  %v6199_v19 = vld [vmem:[%s8339_s8 + $0x2] ss:$0 sm:$0xff]  ;;  %v8531_v41 = vld [vmem:[#allocation23_spill] sm:$0xff] }
 0x906   :  { %v4511_v16 = vadd.f32 %v4510_v15, %v4509_v14  ;;  %v4621_v40 = vunpack.c.l.b16 %v4576_v56  ;;  %v4587_v47 = vpack.c.bf16 %v4553_v23, %v4553_v23  ;;  %v4622_v6 = vunpack.c.l.b16 %v4577_v4  ;;  %v5356_v23 = vld [vmem:[#allocation7 + $0x58] sm:$0xff] }
 0x907   :  { %v4518_v10 = vadd.f32 %v4517_v33, %v4516_v17  ;;  %v4574_v29 = vadd.f32 %v4573_v60, %v4572_v26  ;;  %v4580_v5 = vpack.c.bf16 %v4504_v20, %v4504_v20  ;;  %v4588_v49 = vpack.c.bf16 %v4560_v28, %v4560_v28  ;;  %v8533_v28 = vld [vmem:[#allocation22_spill] sm:$0xff] }
 0x908   :  { %v4581_v0 = vpack.c.bf16 %v4511_v16, %v4511_v16  ;;  %v4589_v21 = vpack.c.bf16 %v4567_v36, %v4567_v36  ;;  %v4623_v46 = vunpack.c.l.b16 %v4578_v13  ;;  %v4631_v9 = vunpack.c.l.b16 %v4586_v53  ;;  %v5364_v13 = vld [vmem:[#allocation10 + $0x58] sm:$0xff]  ;;  %v5363_v33 = vld [vmem:[#allocation10 + $0x50] sm:$0xff]  ;;  %v5362_v36 = vld [vmem:[#allocation10 + $0x48] sm:$0xff] }
 0x909   :  { %v4582_v25 = vpack.c.bf16 %v4518_v10, %v4518_v10  ;;  %v4590_v52 = vpack.c.bf16 %v4574_v29, %v4574_v29  ;;  %v4636_v51 = vsel %vm3368_vm4, %v4621_v40, %v4620_v43  ;;  %v4643_v3 = vsel %vm3368_vm4, %v4629_v18, %v4628_v12  ;;  %4839 = vmatpush.bf16.msra.mxu2 %v5364_v13  ;;  %v6206_v43 = vld [vmem:[%s8342_s11 + $0x2] ss:$0 sm:$0xff] }
 0x90a   :  { %v4624_v27 = vunpack.c.l.b16 %v4579_v39  ;;  %v4632_v42 = vunpack.c.l.b16 %v4587_v47  ;;  %v4637_v7 = vsel %vm3370_vm2, %v4622_v6, %v4636_v51  ;;  %v4644_v61 = vsel %vm3370_vm2, %v4630_v35, %v4643_v3  ;;  %vm8530_vm2 = vmmov %vm8460_vm0  ;;  %v5359_v35 = vld [vmem:[#allocation8 + $0x50] sm:$0xff]  ;;  %v8536_v51 = vld [vmem:[#allocation16_spill] sm:$0xff] }
 0x90b   :  { %v4625_v58 = vunpack.c.l.b16 %v4580_v5  ;;  %v4633_v31 = vunpack.c.l.b16 %v4588_v49  ;;  %v4638_v63 = vsel %vm3372_vm6, %v4623_v46, %v4637_v7  ;;  %v4645_v2 = vsel %vm3372_vm6, %v4631_v9, %v4644_v61  ;;  %4745 = vmatpush.bf16.msrb.mxu3 %v5359_v35  ;;  %vm8532_vm6 = vmmov %vm8460_vm0  ;;  %v6207_v46 = vld [vmem:[%s8344_s13 + $0x2] ss:$0 sm:$0xff]  ;;  %v5366_v7 = vld [vmem:[%s8345_s14 + $0x8] sm:$0xff] }
 0x90c   :  { %v4626_v1 = vunpack.c.l.b16 %v4581_v0  ;;  %v4634_v55 = vunpack.c.l.b16 %v4589_v21  ;;  %v4639_v37 = vsel %vm3374_vm7, %v4624_v27, %v4638_v63  ;;  %v4646_v34 = vsel %vm3374_vm7, %v4632_v42, %v4645_v2  ;;  %vm8534_vm7 = vmmov %vm8460_vm0  ;;  %v5368_v21 = vld [vmem:[%s8345_s14 + $0x18] sm:$0xff] }
 0x90d   :  { %v4627_v11 = vunpack.c.l.b16 %v4582_v25  ;;  %v4635_v12 = vunpack.c.l.b16 %v4590_v52  ;;  %v4640_v18 = vsel %vm3376_vm8, %v4625_v58, %v4639_v37  ;;  %v4647_v24 = vsel %vm3376_vm8, %v4633_v31, %v4646_v34  ;;  %4840 = vmatpush.bf16.msra.mxu2 %v5363_v33  ;;  %vm8535_vm8 = vmmov %vm8460_vm0  ;;  %v5367_v52 = vld [vmem:[%s8345_s14 + $0x10] sm:$0xff] }
 0x90e   :  { %v4641_v44 = vsel %vm3378_vm11, %v4626_v1, %v4640_v18  ;;  %v4648_v50 = vsel %vm3378_vm11, %v4634_v55, %v4647_v24  ;;  %v4602_v14 = vmul.f32 %v6199_v19, %v8498_v38  ;;  %v4603_v56 = vmul.f32 %v6199_v19, %v8531_v41  ;;  %v5361_v38 = vld [vmem:[#allocation10 + $0x40] sm:$0xff]  ;;  %vm8537_vm11 = vmmov %vm8460_vm0 }
 0x90f   :  { %v4642_v22 = vsel %vm3380_vm13, %v4627_v11, %v4641_v44  ;;  %v4649_v59 = vsel %vm3380_vm13, %v4635_v12, %v4648_v50  ;;  %4746 = vmatpush.bf16.msrb.mxu3 %v5358_v30  ;;  %v6418_v0 = vmov 8.0   ;;  %v5365_v1 = vld [vmem:[%s8345_s14] sm:$0xff]  ;;  %vm8539_vm13 = vmmov %vm8460_vm0  ;;  %vm4941_vm9 = vcmask 16384  }
 0x910   :  { %v4650_v48 = vpack.c.b16 %v4649_v59, %v4642_v22  ;;  %6253 = vrcp.f32 %v6418_v0  ;;  %v8538_v55 = vld [vmem:[#allocation28_spill] sm:$0xff] }
 0x911   :  { %4841 = vmatpush.bf16.msra.mxu2 %v5362_v36 }
 0x912   :  { %5233 = vmatmul.msk.bf16.vlgmr.msra.gmra.mxu3 %vm8530_vm2, %v4650_v48 }
 0x913   :  { %4747 = vmatpush.bf16.msrb.mxu3 %v5357_v32 }
 0x915   :  { %4842 = vmatpush.bf16.msra.mxu2 %v5361_v38 }
 0x916   :  { %v6254_v9 = vpop.eup %6253 }
 0x917   :  { %4782 = vmatpush.bf16.msra.mxu3 %v5356_v23  ;;  %v4870_v42 = vmul.f32 8.0, %v6254_v9  ;;  %vm4874_vm14 = vweird.f32 %v6254_v9 }
 0x919   :  { %v4871_v31 = vsub.f32 1.0, %v4870_v42 }
 0x91b   :  { %4783 = vmatpush.bf16.msra.mxu3 %v5355_v45  ;;  %v4872_v11 = vmul.f32 %v6254_v9, %v4871_v31 }
 0x91d   :  { %v4873_v22 = vadd.f32 %v6254_v9, %v4872_v11 }
 0x91f   :  { %4784 = vmatpush.bf16.msra.mxu3 %v5354_v54  ;;  %v4875_v30 = vsel %vm4874_vm14, %v6254_v9, %v4873_v22 }
 0x923   :  { %4785 = vmatpush.bf16.msra.mxu3 %v5353_v62 }
 0x995   :  { %v4687_v57 = vpop.f32.mrf.mxu3 }
 0x996   :  { %v4688_v17 = vadd.f32 %v4687_v57, %v4602_v14 }
 0x998   :  { %v4692_v4 = vmul.f32 0.25, %v4688_v17 }
 0x99d   :  { %v4689_v8 = vpop.f32.mrf.mxu3 }
 0x99e   :  { %v4690_v26 = vadd.f32 %v4689_v8, %v4603_v56  ;;  %v6208_v8 = vld [vmem:[%s8346_s15] ss:$0 sm:$0xff] }
 0x9a0   :  { %v4693_v20 = vmul.f32 0.25, %v4690_v26 }
 0x9a2   :  { %v4703_v15 = vpack.c.bf16 %v4693_v20, %v4692_v4 }
 0x9a4   :  { %5250 = vmatmul.msk.bf16.vlgmr.msrb.gmra.mxu3 %vm8532_vm6, %v4703_v15 }
 0x9a5   :  { %4929 = vmatpush.bf16.msrb.mxu3 %v5368_v21 }
 0x9a9   :  { %4930 = vmatpush.bf16.msrb.mxu3 %v5367_v52 }
 0x9ad   :  { %4931 = vmatpush.bf16.msrb.mxu3 %v5366_v7 }
 0x9b1   :  { %4932 = vmatpush.bf16.msrb.mxu3 %v5365_v1 }
 0x9b4   :  { %5267 = vmatmul.msk.bf16.vlgmr.msra.gmra.mxu3 %vm8534_vm7, %v8533_v28 }
 0xa27   :  { %v4749_v60 = vpop.f32.mrf.mxu3 }
 0xa2f   :  { %v4751_v53 = vpop.f32.mrf.mxu3 }
 0xa37   :  { %v4787_v16 = vpop.f32.mrf.mxu3 }
 0xa38   :  { %v4788_v39 = vadd.f32 %v4787_v16, %v4749_v60 }
 0xa3a   :  { %v4794_v10 = vadd.f32 %v6206_v43, %v4788_v39 }
 0xa3c   :  { %v4796_v6 = vmax.f32 %v4794_v10, 0.0 }
 0xa3f   :  { %v4789_v40 = vpop.f32.mrf.mxu3 }
 0xa40   :  { %v4790_v29 = vadd.f32 %v4789_v40, %v4751_v53 }
 0xa42   :  { %v4795_v47 = vadd.f32 %v6206_v43, %v4790_v29 }
 0xa44   :  { %v4797_v5 = vmax.f32 %v4795_v47, 0.0 }
 0xa46   :  { %v4798_v49 = vpack.c.bf16 %v4797_v5, %v4796_v6 }
 0xa48   :  { %5284 = vmatmul.msk.bf16.vlgmr.msra.gmra.mxu2 %vm8535_vm8, %v4798_v49 }
 0xacb   :  { %v4844_v25 = vpop.f32.mrf.mxu2 }
 0xacc   :  { %v4849_v3 = vadd.f32 %v4844_v25, %v8536_v51 }
 0xace   :  { %v4853_v27 = vadd.f32 %v6207_v46, %v4849_v3 }
 0xad0   :  { %v4855_v61 = vsel %vm8537_vm11, %v4853_v27, 0.0 }
 0xad1   :  { %v4856_v58 = vrot.slane %v4855_v61, 4 }
 0xad3   :  { %v4857_v63 = vadd.f32 %v4856_v58, %v4855_v61  ;;  %v4846_v2 = vpop.f32.mrf.mxu2 }
 0xad4   :  { %v4850_v37 = vadd.f32 %v4846_v2, %v8538_v55 }
 0xad5   :  { %v4858_v34 = vrot.slane %v4857_v63, 2 }
 0xad6   :  { %v4854_v12 = vadd.f32 %v6207_v46, %v4850_v37 }
 0xad7   :  { %v4859_v18 = vadd.f32 %v4858_v34, %v4857_v63 }
 0xad8   :  { %v4862_v24 = vsel %vm8539_vm13, %v4854_v12, 0.0 }
 0xad9   :  { %v4860_v44 = vrot.slane %v4859_v18, 1  ;;  %v4863_v50 = vrot.slane %v4862_v24, 4 }
 0xadb   :  { %v4864_v59 = vadd.f32 %v4863_v50, %v4862_v24  ;;  %v4861_v48 = vadd.f32 %v4860_v44, %v4859_v18 }
 0xadd   :  { %v4865_v35 = vrot.slane %v4864_v59, 2  ;;  %v4876_v23 = vmul.f32 %v4875_v30, %v4861_v48 }
 0xadf   :  { %v4866_v32 = vadd.f32 %v4865_v35, %v4864_v59  ;;  %v4878_v62 = vpack.c.bf16 %v4876_v23, %v4876_v23 }
 0xae1   :  { %v4867_v45 = vrot.slane %v4866_v32, 1  ;;  %v4894_v14 = vunpack.c.l.b16 %v4878_v62 }
 0xae3   :  { %v4868_v54 = vadd.f32 %v4867_v45, %v4866_v32 }
 0xae5   :  { %v4877_v57 = vmul.f32 %v4875_v30, %v4868_v54 }
 0xae7   :  { %v4879_v19 = vpack.c.bf16 %v4877_v57, %v4877_v57 }
 0xae9   :  { %v4895_v41 = vunpack.c.l.b16 %v4879_v19 }
 0xaeb   :  { %v4896_v56 = vsel %vm3368_vm4, %v4895_v41, %v4894_v14 }
 0xaec   :  { %v4897_v17 = vpack.c.b16 %v4896_v56, %v4896_v56 }
 0xaee   :  { %5301 = vmatmul.msk.bf16.vlgmr.msrb.gmra.mxu3 %vm8460_vm0, %v4897_v17 }
 0xb71   :  { %v4934_v26 = vpop.f32.mrf.mxu3 }
 0xb72   :  { %v4935_v4 = vadd.f32 %v6208_v8, %v4934_v26 }
 0xb74   :  { %v4939_v20 = vrot.slane %v4935_v4, 1  ;;  %4942 = vst.msk [vmem:[#allocation11] sm:$0x1] %vm4941_vm9, %v4935_v4 }
 0xb76   :  { %4943 = vst.msk [vmem:[#allocation11 + $0x1] sm:$0x1] %vm4941_vm9, %v4939_v20 }
 0xb77   :  { %4956 = dma.vmem_to_hbm [thread:$0]  %s4949_s18, 32, %s4951_s0, [#allocation4], %s6416_s3, %s6416_s3, %s6420_s19  }
 0xb79   :  { %v4936_v15 = vpop.f32.mrf.mxu3 }
 0xb7a   :  { %6406 = dma.done.wait [#allocation4], 32  }
 0xb7b   :  { %6407 = vsyncadd [#allocation4], 4294967264 }
 0xb7c   :  { %4961 = vsyncpa [#allocation3], 1 }
 0xb7d   :  { %4962 = vsyncpa [#allocation6], 1 }
 0xb7e   :  { %4963 = vsyncpa [#allocation9], 1 }
 0xb7f   :  { %4964 = vsyncpa [#allocation4], 1 }

</bundles_post_ra>
